<compile_context>
chip_gen: v7x
topology: tpu7x:2x2x1
jax: 0.10.0
libtpu: 0.0.40
codegen_flags: <defaults>
</compile_context>

<pallas_src>
import functools

import numpy as np
import jax
import jax.numpy as jnp
from jax.experimental import pallas as pl
from jax.experimental.pallas import tpu as pltpu

ACT_DTYPE = jnp.bfloat16       # intermediate activations / GEMM operands
TM_MAX = 512                   # tile along the spatial (lane) axis
TK_MAX = 512                   # tile along the reduction axis
VMEM_LIMIT = 48 * 1024 * 1024  # safe on v7x (64 MiB phys), headroom on v5e/v6e


def _pad_to(x, axis, multiple):
    size = x.shape[axis]
    pad = (-size) % multiple
    if pad == 0:
        return x
    widths = [(0, 0)] * x.ndim
    widths[axis] = (0, pad)
    return jnp.pad(x, widths)


# ----------------------------------------------------------------------------
# Fused conv-as-GEMM kernel:
#   acc (Cout, tm) += W (Cout, tk) @ patches (tk, tm)   over the K grid axis
#   epilogue: + bias (Cout,1) [+ residual] [relu]  -> bf16 lane-dense store
# ----------------------------------------------------------------------------
def _conv_gemm_kernel(*refs, relu, has_res):
    if has_res:
        w_ref, p_ref, b_ref, r_ref, o_ref, acc_ref = refs
    else:
        w_ref, p_ref, b_ref, o_ref, acc_ref = refs
        r_ref = None
    kidx = pl.program_id(2)

    @pl.when(kidx == 0)
    def _():
        acc_ref[...] = jnp.zeros_like(acc_ref)

    acc_ref[...] += jnp.dot(w_ref[...], p_ref[0],
                            preferred_element_type=jnp.float32)

    @pl.when(kidx == pl.num_programs(2) - 1)
    def _():
        y = acc_ref[...] + b_ref[...]                 # (Cout,tm) + (Cout,1)
        if has_res:
            y = y + r_ref[0].astype(jnp.float32)
        if relu:
            y = jnp.maximum(y, 0.0)
        o_ref[0] = y.astype(o_ref.dtype)


def _im2col(x, k, pad):
    """x: (N, C, H, W) -> (N, k*k*C, H*W); stride 1, symmetric zero padding."""
    n, c, h, w = x.shape
    if k == 1:
        return x.reshape(n, c, h * w)
    xp = jnp.pad(x, ((0, 0), (0, 0), (pad, pad), (pad, pad)))
    taps = []
    for dh in range(k):
        for dw in range(k):
            taps.append(xp[:, :, dh:dh + h, dw:dw + w])
    p = jnp.stack(taps, axis=1)                       # (N, k*k, C, H, W)
    return p.reshape(n, k * k * c, h * w)


def conv_bn(x, w_folded, bias, ksize, pad, relu=False, residual=None):
    """x: (N,Cin,H,W) bf16; w_folded: (Cout, k*k*Cin) bf16 (BN scale folded in);
    bias: (Cout,1) f32.  Returns (N, Cout, H, W) bf16."""
    n, _, h, w = x.shape
    cout = w_folded.shape[0]
    m = h * w

    patches = _im2col(x.astype(ACT_DTYPE), ksize, pad)      # (N, K, M)
    kdim = patches.shape[1]

    res = None
    if residual is not None:
        res = residual.reshape(n, cout, m).astype(ACT_DTYPE)

    # --- tiling / padding (ragged M and K handled with zero padding) ---
    if m <= TM_MAX:
        tm = m
    else:
        tm = TM_MAX
        patches = _pad_to(patches, 2, tm)
        if res is not None:
            res = _pad_to(res, 2, tm)
    mp = patches.shape[2]

    if kdim <= TK_MAX:
        tk = kdim
    else:
        tk = TK_MAX
        patches = _pad_to(patches, 1, tk)
        w_folded = _pad_to(w_folded, 1, tk)
    kp = patches.shape[1]

    grid = (n, mp // tm, kp // tk)     # (batch, M tiles, K tiles); K innermost

    in_specs = [
        pl.BlockSpec((cout, tk), lambda b, i, j: (0, j)),      # folded weights
        pl.BlockSpec((1, tk, tm), lambda b, i, j: (b, j, i)),  # patches
        pl.BlockSpec((cout, 1), lambda b, i, j: (0, 0)),       # bias
    ]
    args = [w_folded, patches, bias]
    if res is not None:
        in_specs.append(pl.BlockSpec((1, cout, tm), lambda b, i, j: (b, 0, i)))
        args.append(res)

    kernel = functools.partial(_conv_gemm_kernel, relu=relu,
                               has_res=res is not None)
    out = pl.pallas_call(
        kernel,
        out_shape=jax.ShapeDtypeStruct((n, cout, mp), ACT_DTYPE),
        grid=grid,
        in_specs=in_specs,
        out_specs=pl.BlockSpec((1, cout, tm), lambda b, i, j: (b, 0, i)),
        scratch_shapes=[pltpu.VMEM((cout, tm), jnp.float32)],
        compiler_params=pltpu.CompilerParams(
            dimension_semantics=("parallel", "parallel", "arbitrary"),
            vmem_limit_bytes=VMEM_LIMIT),
    )(*args)

    return out[:, :, :m].reshape(n, cout, h, w)


# ----------------------------------------------------------------------------
# Bilinear upsample (align_corners=False) — one fused Pallas call:
#   per (n,c) slice:  Wh (OH,H) @ x (H,W) @ WwT (W,OW), intermediate in VMEM.
# ----------------------------------------------------------------------------
def _interp_matrix(out_size, in_size):
    o = np.arange(out_size, dtype=np.float64)
    scale = in_size / out_size
    src = np.clip((o + 0.5) * scale - 0.5, 0.0, None)   # PyTorch clamps negatives
    i0 = np.minimum(np.floor(src).astype(np.int64), in_size - 1)
    i1 = np.minimum(i0 + 1, in_size - 1)
    lam = src - i0
    m = np.zeros((out_size, in_size), np.float32)
    m[np.arange(out_size), i0] += (1.0 - lam).astype(np.float32)
    m[np.arange(out_size), i1] += lam.astype(np.float32)
    return m


def _bilerp_kernel(wh_ref, x_ref, wwt_ref, o_ref):
    t = jnp.dot(wh_ref[...], x_ref[0], preferred_element_type=jnp.float32)
    o_ref[0] = jnp.dot(t.astype(ACT_DTYPE), wwt_ref[...],
                       preferred_element_type=jnp.float32).astype(o_ref.dtype)


def bilinear_upsample(x, out_h, out_w):
    """x: (N,C,H,W) bf16 -> (N,C,out_h,out_w) bf16; bilinear, align_corners=False."""
    n, c, h, w = x.shape
    wh = jnp.asarray(_interp_matrix(out_h, h), ACT_DTYPE)      # (out_h, H)
    wwt = jnp.asarray(_interp_matrix(out_w, w).T, ACT_DTYPE)   # (W, out_w)
    xb = x.astype(ACT_DTYPE).reshape(n * c, h, w)
    out = pl.pallas_call(
        _bilerp_kernel,
        out_shape=jax.ShapeDtypeStruct((n * c, out_h, out_w), ACT_DTYPE),
        grid=(n * c,),
        in_specs=[pl.BlockSpec((out_h, h), lambda b: (0, 0)),
                  pl.BlockSpec((1, h, w), lambda b: (b, 0, 0)),
                  pl.BlockSpec((w, out_w), lambda b: (0, 0))],
        out_specs=pl.BlockSpec((1, out_h, out_w), lambda b: (b, 0, 0)),
        compiler_params=pltpu.CompilerParams(
            dimension_semantics=("parallel",),
            vmem_limit_bytes=VMEM_LIMIT),
    )(wh, xb, wwt)
    return out.reshape(n, c, out_h, out_w)


# ----------------------------------------------------------------------------
# Parameter initialization (deterministic, synthetic) with BN folded in.
# ----------------------------------------------------------------------------
def _conv_init(key, cout, cin, k):
    fan_in = cin * k * k
    return jax.random.normal(key, (cout, cin, k, k), jnp.float32) / np.sqrt(fan_in)


def _bn_init(key, c, eps=1e-5):
    k1, k2, k3, k4 = jax.random.split(key, 4)
    gamma = 1.0 + 0.1 * jax.random.normal(k1, (c,), jnp.float32)
    beta = 0.1 * jax.random.normal(k2, (c,), jnp.float32)
    r_mean = 0.1 * jax.random.normal(k3, (c,), jnp.float32)
    r_var = jax.random.uniform(k4, (c,), jnp.float32, 0.5, 1.5)
    scale = gamma / jnp.sqrt(r_var + eps)
    bias = beta - r_mean * scale
    return scale, bias


def _fold_conv_bn(wkey, bnkey, cout, cin, k):
    """Conv weight with BN scale folded: (Cout, k*k*Cin) bf16, bias (Cout,1) f32."""
    w = _conv_init(wkey, cout, cin, k)
    scale, bias = _bn_init(bnkey, cout)
    wt = jnp.transpose(w, (0, 2, 3, 1)).reshape(cout, k * k * cin)
    wt = (wt * scale[:, None]).astype(ACT_DTYPE)
    return wt, bias.reshape(cout, 1).astype(jnp.float32)


def _init_up(key, cin, cout):
    ks = jax.random.split(key, 6)
    w1, b1 = _fold_conv_bn(ks[0], ks[1], cout, cin, 5)
    w12, b12 = _fold_conv_bn(ks[2], ks[3], cout, cout, 3)
    w2, b2 = _fold_conv_bn(ks[4], ks[5], cout, cin, 5)
    return dict(w1=w1, b1=b1, w1_2=w12, b1_2=b12, w2=w2, b2=b2)


def init_d_params(key, num_features=64):
    ks = jax.random.split(key, 6)
    nf = num_features
    params = {}
    params["w0"], params["b0"] = _fold_conv_bn(ks[0], ks[1], nf // 2, nf, 1)
    nf //= 2
    params["up1"] = _init_up(ks[2], nf, nf // 2); nf //= 2
    params["up2"] = _init_up(ks[3], nf, nf // 2); nf //= 2
    params["up3"] = _init_up(ks[4], nf, nf // 2); nf //= 2
    params["up4"] = _init_up(ks[5], nf, nf // 2); nf //= 2
    return params


# ----------------------------------------------------------------------------
# Forward pass (matches D.forward)
# ----------------------------------------------------------------------------
def _up_projection(x, p, size):
    xu = bilinear_upsample(x, size[0], size[1])
    x_conv1 = conv_bn(xu, p["w1"], p["b1"], 5, 2, relu=True)
    bran1 = conv_bn(x_conv1, p["w1_2"], p["b1_2"], 3, 1, relu=False)
    # out = relu(bn2(conv2(xu)) + bran1)  -- residual add + relu fused in kernel
    out = conv_bn(xu, p["w2"], p["b2"], 5, 2, relu=True, residual=bran1)
    return out


def d_forward(params, x_block1, x_block2, x_block3, x_block4):
    """Inputs and output are NCHW (PyTorch convention)."""
    x4 = x_block4.astype(ACT_DTYPE)
    x_d0 = conv_bn(x4, params["w0"], params["b0"], 1, 0, relu=True)
    x_d1 = _up_projection(x_d0, params["up1"],
                          (x_block3.shape[2], x_block3.shape[3]))
    x_d2 = _up_projection(x_d1, params["up2"],
                          (x_block2.shape[2], x_block2.shape[3]))
    x_d3 = _up_projection(x_d2, params["up3"],
                          (x_block1.shape[2], x_block1.shape[3]))
    x_d4 = _up_projection(x_d3, params["up4"],
                          (x_block1.shape[2] * 2, x_block1.shape[3] * 2))
    return x_d4.astype(jnp.float32)


if __name__ == "__main__":
    key = jax.random.PRNGKey(0)
    k_par, k1, k2, k3, k4 = jax.random.split(key, 5)

    num_features = 64  # scaled-down stand-in for 2048
    params = init_d_params(k_par, num_features)

    # Typical backbone pyramid: block4 smallest spatial, block1 largest.
    x_block4 = jax.random.normal(k4, (2, num_features, 2, 2), jnp.float32)
    x_block3 = jax.random.normal(k3, (2, 32, 4, 4), jnp.float32)
    x_block2 = jax.random.normal(k2, (2, 16, 8, 8), jnp.float32)
    x_block1 = jax.random.normal(k1, (2, 8, 16, 16), jnp.float32)

    fwd = jax.jit(d_forward)
    out = fwd(params, x_block1, x_block2, x_block3, x_block4)
    out = jax.block_until_ready(out)

    expected = (2, num_features // 32, x_block1.shape[2] * 2, x_block1.shape[3] * 2)
    assert out.shape == expected, (out.shape, expected)
    assert jnp.all(jnp.isfinite(out))
    print("KERNEL_OK")
</pallas_src>

<mosaic_0001>
module attributes {stable_mosaic.version = 11 : i64} {
  func.func @_conv_gemm_kernel(%arg0: i32, %arg1: i32, %arg2: i32, %arg3: memref<32x64xbf16, #tpu.memory_space<vmem>>, %arg4: memref<1x64x4xbf16, #tpu.memory_space<vmem>>, %arg5: memref<32x1xf32, #tpu.memory_space<vmem>>, %arg6: memref<1x32x4xbf16, #tpu.memory_space<vmem>>, %arg7: memref<32x4xf32, #tpu.memory_space<vmem>>) attributes {dimension_semantics = [#tpu.dimension_semantics<parallel>, #tpu.dimension_semantics<parallel>, #tpu.dimension_semantics<arbitrary>], iteration_bounds = array<i64: 2, 1, 1>, scalar_prefetch = 0 : i64, scratch_operands = 1 : i64, tpu.core_type = #tpu.core_type<tc>, window_params = [{transform_indices = @transform_0, window_bounds = array<i64: 32, 64>}, {transform_indices = @transform_1, window_bounds = array<i64: 1, 64, 4>}, {pipeline_mode = #tpu.pipeline_mode<synchronous>, transform_indices = @transform_2, window_bounds = array<i64: 32, 1>}, {transform_indices = @transform_3, window_bounds = array<i64: 1, 32, 4>}]} {
    %c0_i32 = arith.constant 0 : i32
    %0 = arith.cmpi eq, %arg2, %c0_i32 : i32
    %1 = arith.extui %0 : i1 to i32
    %c0_i32_0 = arith.constant 0 : i32
    %2 = arith.cmpi ne, %1, %c0_i32_0 : i32
    scf.if %2 {
      %cst_11 = arith.constant 0.000000e+00 : f32
      %13 = vector.broadcast %cst_11 : f32 to vector<32x4xf32>
      %c0_12 = arith.constant 0 : index
      %c0_13 = arith.constant 0 : index
      %14 = vector.load %arg7[%c0_12, %c0_13] : memref<32x4xf32, #tpu.memory_space<vmem>>, vector<32x4xf32>
      tpu.vector_store %arg7[%c0_12, %c0_13], %13 {strides = array<i32>} : memref<32x4xf32, #tpu.memory_space<vmem>>, vector<32x4xf32>,
    } else {
    }
    %c0 = arith.constant 0 : index
    %c0_1 = arith.constant 0 : index
    %3 = vector.load %arg7[%c0, %c0_1] : memref<32x4xf32, #tpu.memory_space<vmem>>, vector<32x4xf32>
    %c0_2 = arith.constant 0 : index
    %c0_3 = arith.constant 0 : index
    %4 = vector.load %arg3[%c0_2, %c0_3] : memref<32x64xbf16, #tpu.memory_space<vmem>>, vector<32x64xbf16>
    %c0_4 = arith.constant 0 : index
    %c0_5 = arith.constant 0 : index
    %c0_6 = arith.constant 0 : index
    %5 = vector.load %arg4[%c0_4, %c0_5, %c0_6] : memref<1x64x4xbf16, #tpu.memory_space<vmem>>, vector<1x64x4xbf16>
    %6 = vector.shape_cast %5 : vector<1x64x4xbf16> to vector<64x4xbf16>
    %cst = arith.constant dense<0.000000e+00> : vector<32x4xf32>
    %7 = tpu.matmul %4, %6, %cst {dimension_numbers = #tpu.dot_dimension_numbers<[1], [0], [0], [1], [0, 0, 1, 1], [], []>} : vector<32x64xbf16>, vector<64x4xbf16>, vector<32x4xf32> -> vector<32x4xf32>
    %8 = arith.addf %3, %7 : vector<32x4xf32>
    %c0_7 = arith.constant 0 : index
    %c0_8 = arith.constant 0 : index
    %9 = vector.load %arg7[%c0_7, %c0_8] : memref<32x4xf32, #tpu.memory_space<vmem>>, vector<32x4xf32>
    tpu.vector_store %arg7[%c0_7, %c0_8], %8 {strides = array<i32>} : memref<32x4xf32, #tpu.memory_space<vmem>>, vector<32x4xf32>,
    %c0_i32_9 = arith.constant 0 : i32
    %10 = arith.cmpi eq, %arg2, %c0_i32_9 : i32
    %11 = arith.extui %10 : i1 to i32
    %c0_i32_10 = arith.constant 0 : i32
    %12 = arith.cmpi ne, %11, %c0_i32_10 : i32
    scf.if %12 {
      %c0_11 = arith.constant 0 : index
      %c0_12 = arith.constant 0 : index
      %13 = vector.load %arg7[%c0_11, %c0_12] : memref<32x4xf32, #tpu.memory_space<vmem>>, vector<32x4xf32>
      %c0_13 = arith.constant 0 : index
      %c0_14 = arith.constant 0 : index
      %14 = vector.load %arg5[%c0_13, %c0_14] : memref<32x1xf32, #tpu.memory_space<vmem>>, vector<32x1xf32>
      %15 = vector.broadcast %14 : vector<32x1xf32> to vector<32x4xf32>
      %16 = arith.addf %13, %15 : vector<32x4xf32>
      %cst_15 = arith.constant 0.000000e+00 : f32
      %17 = vector.broadcast %cst_15 : f32 to vector<32x4xf32>
      %18 = arith.maximumf %16, %17 : vector<32x4xf32>
      %19 = arith.truncf %18 : vector<32x4xf32> to vector<32x4xbf16>
      %c0_16 = arith.constant 0 : index
      %c0_17 = arith.constant 0 : index
      %c0_18 = arith.constant 0 : index
      %20 = vector.load %arg6[%c0_16, %c0_17, %c0_18] : memref<1x32x4xbf16, #tpu.memory_space<vmem>>, vector<1x32x4xbf16>
      %21 = vector.shape_cast %20 : vector<1x32x4xbf16> to vector<32x4xbf16>
      %22 = vector.shape_cast %19 : vector<32x4xbf16> to vector<1x32x4xbf16>
      tpu.vector_store %arg6[%c0_16, %c0_17, %c0_18], %22 {strides = array<i32>} : memref<1x32x4xbf16, #tpu.memory_space<vmem>>, vector<1x32x4xbf16>,
    } else {
    }
    return
  }
  func.func @transform_0(%arg0: i32, %arg1: i32, %arg2: i32) -> (i32, i32) {
    %c0_i32 = arith.constant 0 : i32
    %c0_i32_0 = arith.constant 0 : i32
    return %c0_i32, %arg2 : i32, i32
  }
  func.func @transform_1(%arg0: i32, %arg1: i32, %arg2: i32) -> (i32, i32, i32) {
    %c0_i32 = arith.constant 0 : i32
    return %arg0, %arg2, %arg1 : i32, i32, i32
  }
  func.func @transform_2(%arg0: i32, %arg1: i32, %arg2: i32) -> (i32, i32) {
    %c0_i32 = arith.constant 0 : i32
    %c0_i32_0 = arith.constant 0 : i32
    %c0_i32_1 = arith.constant 0 : i32
    return %c0_i32, %c0_i32_0 : i32, i32
  }
  func.func @transform_3(%arg0: i32, %arg1: i32, %arg2: i32) -> (i32, i32, i32) {
    %c0_i32 = arith.constant 0 : i32
    %c0_i32_0 = arith.constant 0 : i32
    return %arg0, %c0_i32, %arg1 : i32, i32, i32
  }
}

module attributes {stable_mosaic.version = 11 : i64} {
  func.func @_bilerp_kernel(%arg0: i32, %arg1: memref<4x2xbf16, #tpu.memory_space<vmem>>, %arg2: memref<1x2x2xbf16, #tpu.memory_space<vmem>>, %arg3: memref<2x4xbf16, #tpu.memory_space<vmem>>, %arg4: memref<1x4x4xbf16, #tpu.memory_space<vmem>>) attributes {dimension_semantics = [#tpu.dimension_semantics<parallel>], iteration_bounds = array<i64: 64>, scalar_prefetch = 0 : i64, scratch_operands = 0 : i64, tpu.core_type = #tpu.core_type<tc>, window_params = [{pipeline_mode = #tpu.pipeline_mode<synchronous>, transform_indices = @transform_0, window_bounds = array<i64: 4, 2>}, {transform_indices = @transform_1, window_bounds = array<i64: 1, 2, 2>}, {pipeline_mode = #tpu.pipeline_mode<synchronous>, transform_indices = @transform_2, window_bounds = array<i64: 2, 4>}, {transform_indices = @transform_3, window_bounds = array<i64: 1, 4, 4>}]} {
    %c0 = arith.constant 0 : index
    %c0_0 = arith.constant 0 : index
    %0 = vector.load %arg1[%c0, %c0_0] : memref<4x2xbf16, #tpu.memory_space<vmem>>, vector<4x2xbf16>
    %c0_1 = arith.constant 0 : index
    %c0_2 = arith.constant 0 : index
    %c0_3 = arith.constant 0 : index
    %1 = vector.load %arg2[%c0_1, %c0_2, %c0_3] : memref<1x2x2xbf16, #tpu.memory_space<vmem>>, vector<1x2x2xbf16>
    %2 = vector.shape_cast %1 : vector<1x2x2xbf16> to vector<2x2xbf16>
    %cst = arith.constant dense<0.000000e+00> : vector<4x2xf32>
    %3 = tpu.matmul %0, %2, %cst {dimension_numbers = #tpu.dot_dimension_numbers<[1], [0], [0], [1], [0, 0, 1, 1], [], []>} : vector<4x2xbf16>, vector<2x2xbf16>, vector<4x2xf32> -> vector<4x2xf32>
    %4 = arith.truncf %3 : vector<4x2xf32> to vector<4x2xbf16>
    %c0_4 = arith.constant 0 : index
    %c0_5 = arith.constant 0 : index
    %5 = vector.load %arg3[%c0_4, %c0_5] : memref<2x4xbf16, #tpu.memory_space<vmem>>, vector<2x4xbf16>
    %cst_6 = arith.constant dense<0.000000e+00> : vector<4x4xf32>
    %6 = tpu.matmul %4, %5, %cst_6 {dimension_numbers = #tpu.dot_dimension_numbers<[1], [0], [0], [1], [0, 0, 1, 1], [], []>} : vector<4x2xbf16>, vector<2x4xbf16>, vector<4x4xf32> -> vector<4x4xf32>
    %7 = arith.truncf %6 : vector<4x4xf32> to vector<4x4xbf16>
    %c0_7 = arith.constant 0 : index
    %c0_8 = arith.constant 0 : index
    %c0_9 = arith.constant 0 : index
    %8 = vector.load %arg4[%c0_7, %c0_8, %c0_9] : memref<1x4x4xbf16, #tpu.memory_space<vmem>>, vector<1x4x4xbf16>
    %9 = vector.shape_cast %8 : vector<1x4x4xbf16> to vector<4x4xbf16>
    %10 = vector.shape_cast %7 : vector<4x4xbf16> to vector<1x4x4xbf16>
    tpu.vector_store %arg4[%c0_7, %c0_8, %c0_9], %10 {strides = array<i32>} : memref<1x4x4xbf16, #tpu.memory_space<vmem>>, vector<1x4x4xbf16>,
    return
  }
  func.func @transform_0(%arg0: i32) -> (i32, i32) {
    %c0_i32 = arith.constant 0 : i32
    %c0_i32_0 = arith.constant 0 : i32
    %c0_i32_1 = arith.constant 0 : i32
    return %c0_i32, %c0_i32_0 : i32, i32
  }
  func.func @transform_1(%arg0: i32) -> (i32, i32, i32) {
    %c0_i32 = arith.constant 0 : i32
    %c0_i32_0 = arith.constant 0 : i32
    %c0_i32_1 = arith.constant 0 : i32
    return %arg0, %c0_i32, %c0_i32_0 : i32, i32, i32
  }
  func.func @transform_2(%arg0: i32) -> (i32, i32) {
    %c0_i32 = arith.constant 0 : i32
    %c0_i32_0 = arith.constant 0 : i32
    %c0_i32_1 = arith.constant 0 : i32
    return %c0_i32, %c0_i32_0 : i32, i32
  }
  func.func @transform_3(%arg0: i32) -> (i32, i32, i32) {
    %c0_i32 = arith.constant 0 : i32
    %c0_i32_0 = arith.constant 0 : i32
    %c0_i32_1 = arith.constant 0 : i32
    return %arg0, %c0_i32, %c0_i32_0 : i32, i32, i32
  }
}

module attributes {stable_mosaic.version = 11 : i64} {
  func.func @_conv_gemm_kernel(%arg0: i32, %arg1: i32, %arg2: i32, %arg3: memref<16x512xbf16, #tpu.memory_space<vmem>>, %arg4: memref<1x512x16xbf16, #tpu.memory_space<vmem>>, %arg5: memref<16x1xf32, #tpu.memory_space<vmem>>, %arg6: memref<1x16x16xbf16, #tpu.memory_space<vmem>>, %arg7: memref<16x16xf32, #tpu.memory_space<vmem>>) attributes {dimension_semantics = [#tpu.dimension_semantics<parallel>, #tpu.dimension_semantics<parallel>, #tpu.dimension_semantics<arbitrary>], iteration_bounds = array<i64: 2, 1, 2>, scalar_prefetch = 0 : i64, scratch_operands = 1 : i64, tpu.core_type = #tpu.core_type<tc>, window_params = [{transform_indices = @transform_0, window_bounds = array<i64: 16, 512>}, {transform_indices = @transform_1, window_bounds = array<i64: 1, 512, 16>}, {pipeline_mode = #tpu.pipeline_mode<synchronous>, transform_indices = @transform_2, window_bounds = array<i64: 16, 1>}, {transform_indices = @transform_3, window_bounds = array<i64: 1, 16, 16>}]} {
    %c0_i32 = arith.constant 0 : i32
    %0 = arith.cmpi eq, %arg2, %c0_i32 : i32
    %1 = arith.extui %0 : i1 to i32
    %c0_i32_0 = arith.constant 0 : i32
    %2 = arith.cmpi ne, %1, %c0_i32_0 : i32
    scf.if %2 {
      %cst_10 = arith.constant 0.000000e+00 : f32
      %13 = vector.broadcast %cst_10 : f32 to vector<16x16xf32>
      %c0_11 = arith.constant 0 : index
      %c0_12 = arith.constant 0 : index
      %14 = vector.load %arg7[%c0_11, %c0_12] : memref<16x16xf32, #tpu.memory_space<vmem>>, vector<16x16xf32>
      tpu.vector_store %arg7[%c0_11, %c0_12], %13 {strides = array<i32>} : memref<16x16xf32, #tpu.memory_space<vmem>>, vector<16x16xf32>,
    } else {
    }
    %c0 = arith.constant 0 : index
    %c0_1 = arith.constant 0 : index
    %3 = vector.load %arg7[%c0, %c0_1] : memref<16x16xf32, #tpu.memory_space<vmem>>, vector<16x16xf32>
    %c0_2 = arith.constant 0 : index
    %c0_3 = arith.constant 0 : index
    %4 = vector.load %arg3[%c0_2, %c0_3] : memref<16x512xbf16, #tpu.memory_space<vmem>>, vector<16x512xbf16>
    %c0_4 = arith.constant 0 : index
    %c0_5 = arith.constant 0 : index
    %c0_6 = arith.constant 0 : index
    %5 = vector.load %arg4[%c0_4, %c0_5, %c0_6] : memref<1x512x16xbf16, #tpu.memory_space<vmem>>, vector<1x512x16xbf16>
    %6 = vector.shape_cast %5 : vector<1x512x16xbf16> to vector<512x16xbf16>
    %cst = arith.constant dense<0.000000e+00> : vector<16x16xf32>
    %7 = tpu.matmul %4, %6, %cst {dimension_numbers = #tpu.dot_dimension_numbers<[1], [0], [0], [1], [0, 0, 1, 1], [], []>} : vector<16x512xbf16>, vector<512x16xbf16>, vector<16x16xf32> -> vector<16x16xf32>
    %8 = arith.addf %3, %7 : vector<16x16xf32>
    %c0_7 = arith.constant 0 : index
    %c0_8 = arith.constant 0 : index
    %9 = vector.load %arg7[%c0_7, %c0_8] : memref<16x16xf32, #tpu.memory_space<vmem>>, vector<16x16xf32>
    tpu.vector_store %arg7[%c0_7, %c0_8], %8 {strides = array<i32>} : memref<16x16xf32, #tpu.memory_space<vmem>>, vector<16x16xf32>,
    %c1_i32 = arith.constant 1 : i32
    %10 = arith.cmpi eq, %arg2, %c1_i32 : i32
    %11 = arith.extui %10 : i1 to i32
    %c0_i32_9 = arith.constant 0 : i32
    %12 = arith.cmpi ne, %11, %c0_i32_9 : i32
    scf.if %12 {
      %c0_10 = arith.constant 0 : index
      %c0_11 = arith.constant 0 : index
      %13 = vector.load %arg7[%c0_10, %c0_11] : memref<16x16xf32, #tpu.memory_space<vmem>>, vector<16x16xf32>
      %c0_12 = arith.constant 0 : index
      %c0_13 = arith.constant 0 : index
      %14 = vector.load %arg5[%c0_12, %c0_13] : memref<16x1xf32, #tpu.memory_space<vmem>>, vector<16x1xf32>
      %15 = vector.broadcast %14 : vector<16x1xf32> to vector<16x16xf32>
      %16 = arith.addf %13, %15 : vector<16x16xf32>
      %cst_14 = arith.constant 0.000000e+00 : f32
      %17 = vector.broadcast %cst_14 : f32 to vector<16x16xf32>
      %18 = arith.maximumf %16, %17 : vector<16x16xf32>
      %19 = arith.truncf %18 : vector<16x16xf32> to vector<16x16xbf16>
      %c0_15 = arith.constant 0 : index
      %c0_16 = arith.constant 0 : index
      %c0_17 = arith.constant 0 : index
      %20 = vector.load %arg6[%c0_15, %c0_16, %c0_17] : memref<1x16x16xbf16, #tpu.memory_space<vmem>>, vector<1x16x16xbf16>
      %21 = vector.shape_cast %20 : vector<1x16x16xbf16> to vector<16x16xbf16>
      %22 = vector.shape_cast %19 : vector<16x16xbf16> to vector<1x16x16xbf16>
      tpu.vector_store %arg6[%c0_15, %c0_16, %c0_17], %22 {strides = array<i32>} : memref<1x16x16xbf16, #tpu.memory_space<vmem>>, vector<1x16x16xbf16>,
    } else {
    }
    return
  }
  func.func @transform_0(%arg0: i32, %arg1: i32, %arg2: i32) -> (i32, i32) {
    %c0_i32 = arith.constant 0 : i32
    %c0_i32_0 = arith.constant 0 : i32
    return %c0_i32, %arg2 : i32, i32
  }
  func.func @transform_1(%arg0: i32, %arg1: i32, %arg2: i32) -> (i32, i32, i32) {
    %c0_i32 = arith.constant 0 : i32
    return %arg0, %arg2, %arg1 : i32, i32, i32
  }
  func.func @transform_2(%arg0: i32, %arg1: i32, %arg2: i32) -> (i32, i32) {
    %c0_i32 = arith.constant 0 : i32
    %c0_i32_0 = arith.constant 0 : i32
    %c0_i32_1 = arith.constant 0 : i32
    return %c0_i32, %c0_i32_0 : i32, i32
  }
  func.func @transform_3(%arg0: i32, %arg1: i32, %arg2: i32) -> (i32, i32, i32) {
    %c0_i32 = arith.constant 0 : i32
    %c0_i32_0 = arith.constant 0 : i32
    return %arg0, %c0_i32, %arg1 : i32, i32, i32
  }
}

module attributes {stable_mosaic.version = 11 : i64} {
  func.func @_conv_gemm_kernel(%arg0: i32, %arg1: i32, %arg2: i32, %arg3: memref<16x512xbf16, #tpu.memory_space<vmem>>, %arg4: memref<1x512x16xbf16, #tpu.memory_space<vmem>>, %arg5: memref<16x1xf32, #tpu.memory_space<vmem>>, %arg6: memref<1x16x16xbf16, #tpu.memory_space<vmem>>, %arg7: memref<1x16x16xbf16, #tpu.memory_space<vmem>>, %arg8: memref<16x16xf32, #tpu.memory_space<vmem>>) attributes {dimension_semantics = [#tpu.dimension_semantics<parallel>, #tpu.dimension_semantics<parallel>, #tpu.dimension_semantics<arbitrary>], iteration_bounds = array<i64: 2, 1, 2>, scalar_prefetch = 0 : i64, scratch_operands = 1 : i64, tpu.core_type = #tpu.core_type<tc>, window_params = [{transform_indices = @transform_0, window_bounds = array<i64: 16, 512>}, {transform_indices = @transform_1, window_bounds = array<i64: 1, 512, 16>}, {pipeline_mode = #tpu.pipeline_mode<synchronous>, transform_indices = @transform_2, window_bounds = array<i64: 16, 1>}, {transform_indices = @transform_3, window_bounds = array<i64: 1, 16, 16>}, {transform_indices = @transform_4, window_bounds = array<i64: 1, 16, 16>}]} {
    %c0_i32 = arith.constant 0 : i32
    %0 = arith.cmpi eq, %arg2, %c0_i32 : i32
    %1 = arith.extui %0 : i1 to i32
    %c0_i32_0 = arith.constant 0 : i32
    %2 = arith.cmpi ne, %1, %c0_i32_0 : i32
    scf.if %2 {
      %cst_10 = arith.constant 0.000000e+00 : f32
      %13 = vector.broadcast %cst_10 : f32 to vector<16x16xf32>
      %c0_11 = arith.constant 0 : index
      %c0_12 = arith.constant 0 : index
      %14 = vector.load %arg8[%c0_11, %c0_12] : memref<16x16xf32, #tpu.memory_space<vmem>>, vector<16x16xf32>
      tpu.vector_store %arg8[%c0_11, %c0_12], %13 {strides = array<i32>} : memref<16x16xf32, #tpu.memory_space<vmem>>, vector<16x16xf32>,
    } else {
    }
    %c0 = arith.constant 0 : index
    %c0_1 = arith.constant 0 : index
    %3 = vector.load %arg8[%c0, %c0_1] : memref<16x16xf32, #tpu.memory_space<vmem>>, vector<16x16xf32>
    %c0_2 = arith.constant 0 : index
    %c0_3 = arith.constant 0 : index
    %4 = vector.load %arg3[%c0_2, %c0_3] : memref<16x512xbf16, #tpu.memory_space<vmem>>, vector<16x512xbf16>
    %c0_4 = arith.constant 0 : index
    %c0_5 = arith.constant 0 : index
    %c0_6 = arith.constant 0 : index
    %5 = vector.load %arg4[%c0_4, %c0_5, %c0_6] : memref<1x512x16xbf16, #tpu.memory_space<vmem>>, vector<1x512x16xbf16>
    %6 = vector.shape_cast %5 : vector<1x512x16xbf16> to vector<512x16xbf16>
    %cst = arith.constant dense<0.000000e+00> : vector<16x16xf32>
    %7 = tpu.matmul %4, %6, %cst {dimension_numbers = #tpu.dot_dimension_numbers<[1], [0], [0], [1], [0, 0, 1, 1], [], []>} : vector<16x512xbf16>, vector<512x16xbf16>, vector<16x16xf32> -> vector<16x16xf32>
    %8 = arith.addf %3, %7 : vector<16x16xf32>
    %c0_7 = arith.constant 0 : index
    %c0_8 = arith.constant 0 : index
    %9 = vector.load %arg8[%c0_7, %c0_8] : memref<16x16xf32, #tpu.memory_space<vmem>>, vector<16x16xf32>
    tpu.vector_store %arg8[%c0_7, %c0_8], %8 {strides = array<i32>} : memref<16x16xf32, #tpu.memory_space<vmem>>, vector<16x16xf32>,
    %c1_i32 = arith.constant 1 : i32
    %10 = arith.cmpi eq, %arg2, %c1_i32 : i32
    %11 = arith.extui %10 : i1 to i32
    %c0_i32_9 = arith.constant 0 : i32
    %12 = arith.cmpi ne, %11, %c0_i32_9 : i32
    scf.if %12 {
      %c0_10 = arith.constant 0 : index
      %c0_11 = arith.constant 0 : index
      %13 = vector.load %arg8[%c0_10, %c0_11] : memref<16x16xf32, #tpu.memory_space<vmem>>, vector<16x16xf32>
      %c0_12 = arith.constant 0 : index
      %c0_13 = arith.constant 0 : index
      %14 = vector.load %arg5[%c0_12, %c0_13] : memref<16x1xf32, #tpu.memory_space<vmem>>, vector<16x1xf32>
      %15 = vector.broadcast %14 : vector<16x1xf32> to vector<16x16xf32>
      %16 = arith.addf %13, %15 : vector<16x16xf32>
      %c0_14 = arith.constant 0 : index
      %c0_15 = arith.constant 0 : index
      %c0_16 = arith.constant 0 : index
      %17 = vector.load %arg6[%c0_14, %c0_15, %c0_16] : memref<1x16x16xbf16, #tpu.memory_space<vmem>>, vector<1x16x16xbf16>
      %18 = vector.shape_cast %17 : vector<1x16x16xbf16> to vector<16x16xbf16>
      %19 = arith.extf %18 : vector<16x16xbf16> to vector<16x16xf32>
      %20 = arith.addf %16, %19 : vector<16x16xf32>
      %cst_17 = arith.constant 0.000000e+00 : f32
      %21 = vector.broadcast %cst_17 : f32 to vector<16x16xf32>
      %22 = arith.maximumf %20, %21 : vector<16x16xf32>
      %23 = arith.truncf %22 : vector<16x16xf32> to vector<16x16xbf16>
      %c0_18 = arith.constant 0 : index
      %c0_19 = arith.constant 0 : index
      %c0_20 = arith.constant 0 : index
      %24 = vector.load %arg7[%c0_18, %c0_19, %c0_20] : memref<1x16x16xbf16, #tpu.memory_space<vmem>>, vector<1x16x16xbf16>
      %25 = vector.shape_cast %24 : vector<1x16x16xbf16> to vector<16x16xbf16>
      %26 = vector.shape_cast %23 : vector<16x16xbf16> to vector<1x16x16xbf16>
      tpu.vector_store %arg7[%c0_18, %c0_19, %c0_20], %26 {strides = array<i32>} : memref<1x16x16xbf16, #tpu.memory_space<vmem>>, vector<1x16x16xbf16>,
    } else {
    }
    return
  }
  func.func @transform_0(%arg0: i32, %arg1: i32, %arg2: i32) -> (i32, i32) {
    %c0_i32 = arith.constant 0 : i32
    %c0_i32_0 = arith.constant 0 : i32
    return %c0_i32, %arg2 : i32, i32
  }
  func.func @transform_1(%arg0: i32, %arg1: i32, %arg2: i32) -> (i32, i32, i32) {
    %c0_i32 = arith.constant 0 : i32
    return %arg0, %arg2, %arg1 : i32, i32, i32
  }
  func.func @transform_2(%arg0: i32, %arg1: i32, %arg2: i32) -> (i32, i32) {
    %c0_i32 = arith.constant 0 : i32
    %c0_i32_0 = arith.constant 0 : i32
    %c0_i32_1 = arith.constant 0 : i32
    return %c0_i32, %c0_i32_0 : i32, i32
  }
  func.func @transform_3(%arg0: i32, %arg1: i32, %arg2: i32) -> (i32, i32, i32) {
    %c0_i32 = arith.constant 0 : i32
    %c0_i32_0 = arith.constant 0 : i32
    return %arg0, %c0_i32, %arg1 : i32, i32, i32
  }
  func.func @transform_4(%arg0: i32, %arg1: i32, %arg2: i32) -> (i32, i32, i32) {
    %c0_i32 = arith.constant 0 : i32
    %c0_i32_0 = arith.constant 0 : i32
    return %arg0, %c0_i32, %arg1 : i32, i32, i32
  }
}

module attributes {stable_mosaic.version = 11 : i64} {
  func.func @_conv_gemm_kernel(%arg0: i32, %arg1: i32, %arg2: i32, %arg3: memref<16x144xbf16, #tpu.memory_space<vmem>>, %arg4: memref<1x144x16xbf16, #tpu.memory_space<vmem>>, %arg5: memref<16x1xf32, #tpu.memory_space<vmem>>, %arg6: memref<1x16x16xbf16, #tpu.memory_space<vmem>>, %arg7: memref<16x16xf32, #tpu.memory_space<vmem>>) attributes {dimension_semantics = [#tpu.dimension_semantics<parallel>, #tpu.dimension_semantics<parallel>, #tpu.dimension_semantics<arbitrary>], iteration_bounds = array<i64: 2, 1, 1>, scalar_prefetch = 0 : i64, scratch_operands = 1 : i64, tpu.core_type = #tpu.core_type<tc>, window_params = [{transform_indices = @transform_0, window_bounds = array<i64: 16, 144>}, {transform_indices = @transform_1, window_bounds = array<i64: 1, 144, 16>}, {pipeline_mode = #tpu.pipeline_mode<synchronous>, transform_indices = @transform_2, window_bounds = array<i64: 16, 1>}, {transform_indices = @transform_3, window_bounds = array<i64: 1, 16, 16>}]} {
    %c0_i32 = arith.constant 0 : i32
    %0 = arith.cmpi eq, %arg2, %c0_i32 : i32
    %1 = arith.extui %0 : i1 to i32
    %c0_i32_0 = arith.constant 0 : i32
    %2 = arith.cmpi ne, %1, %c0_i32_0 : i32
    scf.if %2 {
      %cst_11 = arith.constant 0.000000e+00 : f32
      %13 = vector.broadcast %cst_11 : f32 to vector<16x16xf32>
      %c0_12 = arith.constant 0 : index
      %c0_13 = arith.constant 0 : index
      %14 = vector.load %arg7[%c0_12, %c0_13] : memref<16x16xf32, #tpu.memory_space<vmem>>, vector<16x16xf32>
      tpu.vector_store %arg7[%c0_12, %c0_13], %13 {strides = array<i32>} : memref<16x16xf32, #tpu.memory_space<vmem>>, vector<16x16xf32>,
    } else {
    }
    %c0 = arith.constant 0 : index
    %c0_1 = arith.constant 0 : index
    %3 = vector.load %arg7[%c0, %c0_1] : memref<16x16xf32, #tpu.memory_space<vmem>>, vector<16x16xf32>
    %c0_2 = arith.constant 0 : index
    %c0_3 = arith.constant 0 : index
    %4 = vector.load %arg3[%c0_2, %c0_3] : memref<16x144xbf16, #tpu.memory_space<vmem>>, vector<16x144xbf16>
    %c0_4 = arith.constant 0 : index
    %c0_5 = arith.constant 0 : index
    %c0_6 = arith.constant 0 : index
    %5 = vector.load %arg4[%c0_4, %c0_5, %c0_6] : memref<1x144x16xbf16, #tpu.memory_space<vmem>>, vector<1x144x16xbf16>
    %6 = vector.shape_cast %5 : vector<1x144x16xbf16> to vector<144x16xbf16>
    %cst = arith.constant dense<0.000000e+00> : vector<16x16xf32>
    %7 = tpu.matmul %4, %6, %cst {dimension_numbers = #tpu.dot_dimension_numbers<[1], [0], [0], [1], [0, 0, 1, 1], [], []>} : vector<16x144xbf16>, vector<144x16xbf16>, vector<16x16xf32> -> vector<16x16xf32>
    %8 = arith.addf %3, %7 : vector<16x16xf32>
    %c0_7 = arith.constant 0 : index
    %c0_8 = arith.constant 0 : index
    %9 = vector.load %arg7[%c0_7, %c0_8] : memref<16x16xf32, #tpu.memory_space<vmem>>, vector<16x16xf32>
    tpu.vector_store %arg7[%c0_7, %c0_8], %8 {strides = array<i32>} : memref<16x16xf32, #tpu.memory_space<vmem>>, vector<16x16xf32>,
    %c0_i32_9 = arith.constant 0 : i32
    %10 = arith.cmpi eq, %arg2, %c0_i32_9 : i32
    %11 = arith.extui %10 : i1 to i32
    %c0_i32_10 = arith.constant 0 : i32
    %12 = arith.cmpi ne, %11, %c0_i32_10 : i32
    scf.if %12 {
      %c0_11 = arith.constant 0 : index
      %c0_12 = arith.constant 0 : index
      %13 = vector.load %arg7[%c0_11, %c0_12] : memref<16x16xf32, #tpu.memory_space<vmem>>, vector<16x16xf32>
      %c0_13 = arith.constant 0 : index
      %c0_14 = arith.constant 0 : index
      %14 = vector.load %arg5[%c0_13, %c0_14] : memref<16x1xf32, #tpu.memory_space<vmem>>, vector<16x1xf32>
      %15 = vector.broadcast %14 : vector<16x1xf32> to vector<16x16xf32>
      %16 = arith.addf %13, %15 : vector<16x16xf32>
      %17 = arith.truncf %16 : vector<16x16xf32> to vector<16x16xbf16>
      %c0_15 = arith.constant 0 : index
      %c0_16 = arith.constant 0 : index
      %c0_17 = arith.constant 0 : index
      %18 = vector.load %arg6[%c0_15, %c0_16, %c0_17] : memref<1x16x16xbf16, #tpu.memory_space<vmem>>, vector<1x16x16xbf16>
      %19 = vector.shape_cast %18 : vector<1x16x16xbf16> to vector<16x16xbf16>
      %20 = vector.shape_cast %17 : vector<16x16xbf16> to vector<1x16x16xbf16>
      tpu.vector_store %arg6[%c0_15, %c0_16, %c0_17], %20 {strides = array<i32>} : memref<1x16x16xbf16, #tpu.memory_space<vmem>>, vector<1x16x16xbf16>,
    } else {
    }
    return
  }
  func.func @transform_0(%arg0: i32, %arg1: i32, %arg2: i32) -> (i32, i32) {
    %c0_i32 = arith.constant 0 : i32
    %c0_i32_0 = arith.constant 0 : i32
    return %c0_i32, %arg2 : i32, i32
  }
  func.func @transform_1(%arg0: i32, %arg1: i32, %arg2: i32) -> (i32, i32, i32) {
    %c0_i32 = arith.constant 0 : i32
    return %arg0, %arg2, %arg1 : i32, i32, i32
  }
  func.func @transform_2(%arg0: i32, %arg1: i32, %arg2: i32) -> (i32, i32) {
    %c0_i32 = arith.constant 0 : i32
    %c0_i32_0 = arith.constant 0 : i32
    %c0_i32_1 = arith.constant 0 : i32
    return %c0_i32, %c0_i32_0 : i32, i32
  }
  func.func @transform_3(%arg0: i32, %arg1: i32, %arg2: i32) -> (i32, i32, i32) {
    %c0_i32 = arith.constant 0 : i32
    %c0_i32_0 = arith.constant 0 : i32
    return %arg0, %c0_i32, %arg1 : i32, i32, i32
  }
}

module attributes {stable_mosaic.version = 11 : i64} {
  func.func @_bilerp_kernel(%arg0: i32, %arg1: memref<8x4xbf16, #tpu.memory_space<vmem>>, %arg2: memref<1x4x4xbf16, #tpu.memory_space<vmem>>, %arg3: memref<4x8xbf16, #tpu.memory_space<vmem>>, %arg4: memref<1x8x8xbf16, #tpu.memory_space<vmem>>) attributes {dimension_semantics = [#tpu.dimension_semantics<parallel>], iteration_bounds = array<i64: 32>, scalar_prefetch = 0 : i64, scratch_operands = 0 : i64, tpu.core_type = #tpu.core_type<tc>, window_params = [{pipeline_mode = #tpu.pipeline_mode<synchronous>, transform_indices = @transform_0, window_bounds = array<i64: 8, 4>}, {transform_indices = @transform_1, window_bounds = array<i64: 1, 4, 4>}, {pipeline_mode = #tpu.pipeline_mode<synchronous>, transform_indices = @transform_2, window_bounds = array<i64: 4, 8>}, {transform_indices = @transform_3, window_bounds = array<i64: 1, 8, 8>}]} {
    %c0 = arith.constant 0 : index
    %c0_0 = arith.constant 0 : index
    %0 = vector.load %arg1[%c0, %c0_0] : memref<8x4xbf16, #tpu.memory_space<vmem>>, vector<8x4xbf16>
    %c0_1 = arith.constant 0 : index
    %c0_2 = arith.constant 0 : index
    %c0_3 = arith.constant 0 : index
    %1 = vector.load %arg2[%c0_1, %c0_2, %c0_3] : memref<1x4x4xbf16, #tpu.memory_space<vmem>>, vector<1x4x4xbf16>
    %2 = vector.shape_cast %1 : vector<1x4x4xbf16> to vector<4x4xbf16>
    %cst = arith.constant dense<0.000000e+00> : vector<8x4xf32>
    %3 = tpu.matmul %0, %2, %cst {dimension_numbers = #tpu.dot_dimension_numbers<[1], [0], [0], [1], [0, 0, 1, 1], [], []>} : vector<8x4xbf16>, vector<4x4xbf16>, vector<8x4xf32> -> vector<8x4xf32>
    %4 = arith.truncf %3 : vector<8x4xf32> to vector<8x4xbf16>
    %c0_4 = arith.constant 0 : index
    %c0_5 = arith.constant 0 : index
    %5 = vector.load %arg3[%c0_4, %c0_5] : memref<4x8xbf16, #tpu.memory_space<vmem>>, vector<4x8xbf16>
    %cst_6 = arith.constant dense<0.000000e+00> : vector<8x8xf32>
    %6 = tpu.matmul %4, %5, %cst_6 {dimension_numbers = #tpu.dot_dimension_numbers<[1], [0], [0], [1], [0, 0, 1, 1], [], []>} : vector<8x4xbf16>, vector<4x8xbf16>, vector<8x8xf32> -> vector<8x8xf32>
    %7 = arith.truncf %6 : vector<8x8xf32> to vector<8x8xbf16>
    %c0_7 = arith.constant 0 : index
    %c0_8 = arith.constant 0 : index
    %c0_9 = arith.constant 0 : index
    %8 = vector.load %arg4[%c0_7, %c0_8, %c0_9] : memref<1x8x8xbf16, #tpu.memory_space<vmem>>, vector<1x8x8xbf16>
    %9 = vector.shape_cast %8 : vector<1x8x8xbf16> to vector<8x8xbf16>
    %10 = vector.shape_cast %7 : vector<8x8xbf16> to vector<1x8x8xbf16>
    tpu.vector_store %arg4[%c0_7, %c0_8, %c0_9], %10 {strides = array<i32>} : memref<1x8x8xbf16, #tpu.memory_space<vmem>>, vector<1x8x8xbf16>,
    return
  }
  func.func @transform_0(%arg0: i32) -> (i32, i32) {
    %c0_i32 = arith.constant 0 : i32
    %c0_i32_0 = arith.constant 0 : i32
    %c0_i32_1 = arith.constant 0 : i32
    return %c0_i32, %c0_i32_0 : i32, i32
  }
  func.func @transform_1(%arg0: i32) -> (i32, i32, i32) {
    %c0_i32 = arith.constant 0 : i32
    %c0_i32_0 = arith.constant 0 : i32
    %c0_i32_1 = arith.constant 0 : i32
    return %arg0, %c0_i32, %c0_i32_0 : i32, i32, i32
  }
  func.func @transform_2(%arg0: i32) -> (i32, i32) {
    %c0_i32 = arith.constant 0 : i32
    %c0_i32_0 = arith.constant 0 : i32
    %c0_i32_1 = arith.constant 0 : i32
    return %c0_i32, %c0_i32_0 : i32, i32
  }
  func.func @transform_3(%arg0: i32) -> (i32, i32, i32) {
    %c0_i32 = arith.constant 0 : i32
    %c0_i32_0 = arith.constant 0 : i32
    %c0_i32_1 = arith.constant 0 : i32
    return %arg0, %c0_i32, %c0_i32_0 : i32, i32, i32
  }
}

module attributes {stable_mosaic.version = 11 : i64} {
  func.func @_conv_gemm_kernel(%arg0: i32, %arg1: i32, %arg2: i32, %arg3: memref<8x400xbf16, #tpu.memory_space<vmem>>, %arg4: memref<1x400x64xbf16, #tpu.memory_space<vmem>>, %arg5: memref<8x1xf32, #tpu.memory_space<vmem>>, %arg6: memref<1x8x64xbf16, #tpu.memory_space<vmem>>, %arg7: memref<8x64xf32, #tpu.memory_space<vmem>>) attributes {dimension_semantics = [#tpu.dimension_semantics<parallel>, #tpu.dimension_semantics<parallel>, #tpu.dimension_semantics<arbitrary>], iteration_bounds = array<i64: 2, 1, 1>, scalar_prefetch = 0 : i64, scratch_operands = 1 : i64, tpu.core_type = #tpu.core_type<tc>, window_params = [{transform_indices = @transform_0, window_bounds = array<i64: 8, 400>}, {transform_indices = @transform_1, window_bounds = array<i64: 1, 400, 64>}, {pipeline_mode = #tpu.pipeline_mode<synchronous>, transform_indices = @transform_2, window_bounds = array<i64: 8, 1>}, {transform_indices = @transform_3, window_bounds = array<i64: 1, 8, 64>}]} {
    %c0_i32 = arith.constant 0 : i32
    %0 = arith.cmpi eq, %arg2, %c0_i32 : i32
    %1 = arith.extui %0 : i1 to i32
    %c0_i32_0 = arith.constant 0 : i32
    %2 = arith.cmpi ne, %1, %c0_i32_0 : i32
    scf.if %2 {
      %cst_11 = arith.constant 0.000000e+00 : f32
      %13 = vector.broadcast %cst_11 : f32 to vector<8x64xf32>
      %c0_12 = arith.constant 0 : index
      %c0_13 = arith.constant 0 : index
      %14 = vector.load %arg7[%c0_12, %c0_13] : memref<8x64xf32, #tpu.memory_space<vmem>>, vector<8x64xf32>
      tpu.vector_store %arg7[%c0_12, %c0_13], %13 {strides = array<i32>} : memref<8x64xf32, #tpu.memory_space<vmem>>, vector<8x64xf32>,
    } else {
    }
    %c0 = arith.constant 0 : index
    %c0_1 = arith.constant 0 : index
    %3 = vector.load %arg7[%c0, %c0_1] : memref<8x64xf32, #tpu.memory_space<vmem>>, vector<8x64xf32>
    %c0_2 = arith.constant 0 : index
    %c0_3 = arith.constant 0 : index
    %4 = vector.load %arg3[%c0_2, %c0_3] : memref<8x400xbf16, #tpu.memory_space<vmem>>, vector<8x400xbf16>
    %c0_4 = arith.constant 0 : index
    %c0_5 = arith.constant 0 : index
    %c0_6 = arith.constant 0 : index
    %5 = vector.load %arg4[%c0_4, %c0_5, %c0_6] : memref<1x400x64xbf16, #tpu.memory_space<vmem>>, vector<1x400x64xbf16>
    %6 = vector.shape_cast %5 : vector<1x400x64xbf16> to vector<400x64xbf16>
    %cst = arith.constant dense<0.000000e+00> : vector<8x64xf32>
    %7 = tpu.matmul %4, %6, %cst {dimension_numbers = #tpu.dot_dimension_numbers<[1], [0], [0], [1], [0, 0, 1, 1], [], []>} : vector<8x400xbf16>, vector<400x64xbf16>, vector<8x64xf32> -> vector<8x64xf32>
    %8 = arith.addf %3, %7 : vector<8x64xf32>
    %c0_7 = arith.constant 0 : index
    %c0_8 = arith.constant 0 : index
    %9 = vector.load %arg7[%c0_7, %c0_8] : memref<8x64xf32, #tpu.memory_space<vmem>>, vector<8x64xf32>
    tpu.vector_store %arg7[%c0_7, %c0_8], %8 {strides = array<i32>} : memref<8x64xf32, #tpu.memory_space<vmem>>, vector<8x64xf32>,
    %c0_i32_9 = arith.constant 0 : i32
    %10 = arith.cmpi eq, %arg2, %c0_i32_9 : i32
    %11 = arith.extui %10 : i1 to i32
    %c0_i32_10 = arith.constant 0 : i32
    %12 = arith.cmpi ne, %11, %c0_i32_10 : i32
    scf.if %12 {
      %c0_11 = arith.constant 0 : index
      %c0_12 = arith.constant 0 : index
      %13 = vector.load %arg7[%c0_11, %c0_12] : memref<8x64xf32, #tpu.memory_space<vmem>>, vector<8x64xf32>
      %c0_13 = arith.constant 0 : index
      %c0_14 = arith.constant 0 : index
      %14 = vector.load %arg5[%c0_13, %c0_14] : memref<8x1xf32, #tpu.memory_space<vmem>>, vector<8x1xf32>
      %15 = vector.broadcast %14 : vector<8x1xf32> to vector<8x64xf32>
      %16 = arith.addf %13, %15 : vector<8x64xf32>
      %cst_15 = arith.constant 0.000000e+00 : f32
      %17 = vector.broadcast %cst_15 : f32 to vector<8x64xf32>
      %18 = arith.maximumf %16, %17 : vector<8x64xf32>
      %19 = arith.truncf %18 : vector<8x64xf32> to vector<8x64xbf16>
      %c0_16 = arith.constant 0 : index
      %c0_17 = arith.constant 0 : index
      %c0_18 = arith.constant 0 : index
      %20 = vector.load %arg6[%c0_16, %c0_17, %c0_18] : memref<1x8x64xbf16, #tpu.memory_space<vmem>>, vector<1x8x64xbf16>
      %21 = vector.shape_cast %20 : vector<1x8x64xbf16> to vector<8x64xbf16>
      %22 = vector.shape_cast %19 : vector<8x64xbf16> to vector<1x8x64xbf16>
      tpu.vector_store %arg6[%c0_16, %c0_17, %c0_18], %22 {strides = array<i32>} : memref<1x8x64xbf16, #tpu.memory_space<vmem>>, vector<1x8x64xbf16>,
    } else {
    }
    return
  }
  func.func @transform_0(%arg0: i32, %arg1: i32, %arg2: i32) -> (i32, i32) {
    %c0_i32 = arith.constant 0 : i32
    %c0_i32_0 = arith.constant 0 : i32
    return %c0_i32, %arg2 : i32, i32
  }
  func.func @transform_1(%arg0: i32, %arg1: i32, %arg2: i32) -> (i32, i32, i32) {
    %c0_i32 = arith.constant 0 : i32
    return %arg0, %arg2, %arg1 : i32, i32, i32
  }
  func.func @transform_2(%arg0: i32, %arg1: i32, %arg2: i32) -> (i32, i32) {
    %c0_i32 = arith.constant 0 : i32
    %c0_i32_0 = arith.constant 0 : i32
    %c0_i32_1 = arith.constant 0 : i32
    return %c0_i32, %c0_i32_0 : i32, i32
  }
  func.func @transform_3(%arg0: i32, %arg1: i32, %arg2: i32) -> (i32, i32, i32) {
    %c0_i32 = arith.constant 0 : i32
    %c0_i32_0 = arith.constant 0 : i32
    return %arg0, %c0_i32, %arg1 : i32, i32, i32
  }
}

module attributes {stable_mosaic.version = 11 : i64} {
  func.func @_conv_gemm_kernel(%arg0: i32, %arg1: i32, %arg2: i32, %arg3: memref<8x72xbf16, #tpu.memory_space<vmem>>, %arg4: memref<1x72x64xbf16, #tpu.memory_space<vmem>>, %arg5: memref<8x1xf32, #tpu.memory_space<vmem>>, %arg6: memref<1x8x64xbf16, #tpu.memory_space<vmem>>, %arg7: memref<8x64xf32, #tpu.memory_space<vmem>>) attributes {dimension_semantics = [#tpu.dimension_semantics<parallel>, #tpu.dimension_semantics<parallel>, #tpu.dimension_semantics<arbitrary>], iteration_bounds = array<i64: 2, 1, 1>, scalar_prefetch = 0 : i64, scratch_operands = 1 : i64, tpu.core_type = #tpu.core_type<tc>, window_params = [{transform_indices = @transform_0, window_bounds = array<i64: 8, 72>}, {transform_indices = @transform_1, window_bounds = array<i64: 1, 72, 64>}, {pipeline_mode = #tpu.pipeline_mode<synchronous>, transform_indices = @transform_2, window_bounds = array<i64: 8, 1>}, {transform_indices = @transform_3, window_bounds = array<i64: 1, 8, 64>}]} {
    %c0_i32 = arith.constant 0 : i32
    %0 = arith.cmpi eq, %arg2, %c0_i32 : i32
    %1 = arith.extui %0 : i1 to i32
    %c0_i32_0 = arith.constant 0 : i32
    %2 = arith.cmpi ne, %1, %c0_i32_0 : i32
    scf.if %2 {
      %cst_11 = arith.constant 0.000000e+00 : f32
      %13 = vector.broadcast %cst_11 : f32 to vector<8x64xf32>
      %c0_12 = arith.constant 0 : index
      %c0_13 = arith.constant 0 : index
      %14 = vector.load %arg7[%c0_12, %c0_13] : memref<8x64xf32, #tpu.memory_space<vmem>>, vector<8x64xf32>
      tpu.vector_store %arg7[%c0_12, %c0_13], %13 {strides = array<i32>} : memref<8x64xf32, #tpu.memory_space<vmem>>, vector<8x64xf32>,
    } else {
    }
    %c0 = arith.constant 0 : index
    %c0_1 = arith.constant 0 : index
    %3 = vector.load %arg7[%c0, %c0_1] : memref<8x64xf32, #tpu.memory_space<vmem>>, vector<8x64xf32>
    %c0_2 = arith.constant 0 : index
    %c0_3 = arith.constant 0 : index
    %4 = vector.load %arg3[%c0_2, %c0_3] : memref<8x72xbf16, #tpu.memory_space<vmem>>, vector<8x72xbf16>
    %c0_4 = arith.constant 0 : index
    %c0_5 = arith.constant 0 : index
    %c0_6 = arith.constant 0 : index
    %5 = vector.load %arg4[%c0_4, %c0_5, %c0_6] : memref<1x72x64xbf16, #tpu.memory_space<vmem>>, vector<1x72x64xbf16>
    %6 = vector.shape_cast %5 : vector<1x72x64xbf16> to vector<72x64xbf16>
    %cst = arith.constant dense<0.000000e+00> : vector<8x64xf32>
    %7 = tpu.matmul %4, %6, %cst {dimension_numbers = #tpu.dot_dimension_numbers<[1], [0], [0], [1], [0, 0, 1, 1], [], []>} : vector<8x72xbf16>, vector<72x64xbf16>, vector<8x64xf32> -> vector<8x64xf32>
    %8 = arith.addf %3, %7 : vector<8x64xf32>
    %c0_7 = arith.constant 0 : index
    %c0_8 = arith.constant 0 : index
    %9 = vector.load %arg7[%c0_7, %c0_8] : memref<8x64xf32, #tpu.memory_space<vmem>>, vector<8x64xf32>
    tpu.vector_store %arg7[%c0_7, %c0_8], %8 {strides = array<i32>} : memref<8x64xf32, #tpu.memory_space<vmem>>, vector<8x64xf32>,
    %c0_i32_9 = arith.constant 0 : i32
    %10 = arith.cmpi eq, %arg2, %c0_i32_9 : i32
    %11 = arith.extui %10 : i1 to i32
    %c0_i32_10 = arith.constant 0 : i32
    %12 = arith.cmpi ne, %11, %c0_i32_10 : i32
    scf.if %12 {
      %c0_11 = arith.constant 0 : index
      %c0_12 = arith.constant 0 : index
      %13 = vector.load %arg7[%c0_11, %c0_12] : memref<8x64xf32, #tpu.memory_space<vmem>>, vector<8x64xf32>
      %c0_13 = arith.constant 0 : index
      %c0_14 = arith.constant 0 : index
      %14 = vector.load %arg5[%c0_13, %c0_14] : memref<8x1xf32, #tpu.memory_space<vmem>>, vector<8x1xf32>
      %15 = vector.broadcast %14 : vector<8x1xf32> to vector<8x64xf32>
      %16 = arith.addf %13, %15 : vector<8x64xf32>
      %17 = arith.truncf %16 : vector<8x64xf32> to vector<8x64xbf16>
      %c0_15 = arith.constant 0 : index
      %c0_16 = arith.constant 0 : index
      %c0_17 = arith.constant 0 : index
      %18 = vector.load %arg6[%c0_15, %c0_16, %c0_17] : memref<1x8x64xbf16, #tpu.memory_space<vmem>>, vector<1x8x64xbf16>
      %19 = vector.shape_cast %18 : vector<1x8x64xbf16> to vector<8x64xbf16>
      %20 = vector.shape_cast %17 : vector<8x64xbf16> to vector<1x8x64xbf16>
      tpu.vector_store %arg6[%c0_15, %c0_16, %c0_17], %20 {strides = array<i32>} : memref<1x8x64xbf16, #tpu.memory_space<vmem>>, vector<1x8x64xbf16>,
    } else {
    }
    return
  }
  func.func @transform_0(%arg0: i32, %arg1: i32, %arg2: i32) -> (i32, i32) {
    %c0_i32 = arith.constant 0 : i32
    %c0_i32_0 = arith.constant 0 : i32
    return %c0_i32, %arg2 : i32, i32
  }
  func.func @transform_1(%arg0: i32, %arg1: i32, %arg2: i32) -> (i32, i32, i32) {
    %c0_i32 = arith.constant 0 : i32
    return %arg0, %arg2, %arg1 : i32, i32, i32
  }
  func.func @transform_2(%arg0: i32, %arg1: i32, %arg2: i32) -> (i32, i32) {
    %c0_i32 = arith.constant 0 : i32
    %c0_i32_0 = arith.constant 0 : i32
    %c0_i32_1 = arith.constant 0 : i32
    return %c0_i32, %c0_i32_0 : i32, i32
  }
  func.func @transform_3(%arg0: i32, %arg1: i32, %arg2: i32) -> (i32, i32, i32) {
    %c0_i32 = arith.constant 0 : i32
    %c0_i32_0 = arith.constant 0 : i32
    return %arg0, %c0_i32, %arg1 : i32, i32, i32
  }
}

module attributes {stable_mosaic.version = 11 : i64} {
  func.func @_conv_gemm_kernel(%arg0: i32, %arg1: i32, %arg2: i32, %arg3: memref<8x400xbf16, #tpu.memory_space<vmem>>, %arg4: memref<1x400x64xbf16, #tpu.memory_space<vmem>>, %arg5: memref<8x1xf32, #tpu.memory_space<vmem>>, %arg6: memref<1x8x64xbf16, #tpu.memory_space<vmem>>, %arg7: memref<1x8x64xbf16, #tpu.memory_space<vmem>>, %arg8: memref<8x64xf32, #tpu.memory_space<vmem>>) attributes {dimension_semantics = [#tpu.dimension_semantics<parallel>, #tpu.dimension_semantics<parallel>, #tpu.dimension_semantics<arbitrary>], iteration_bounds = array<i64: 2, 1, 1>, scalar_prefetch = 0 : i64, scratch_operands = 1 : i64, tpu.core_type = #tpu.core_type<tc>, window_params = [{transform_indices = @transform_0, window_bounds = array<i64: 8, 400>}, {transform_indices = @transform_1, window_bounds = array<i64: 1, 400, 64>}, {pipeline_mode = #tpu.pipeline_mode<synchronous>, transform_indices = @transform_2, window_bounds = array<i64: 8, 1>}, {transform_indices = @transform_3, window_bounds = array<i64: 1, 8, 64>}, {transform_indices = @transform_4, window_bounds = array<i64: 1, 8, 64>}]} {
    %c0_i32 = arith.constant 0 : i32
    %0 = arith.cmpi eq, %arg2, %c0_i32 : i32
    %1 = arith.extui %0 : i1 to i32
    %c0_i32_0 = arith.constant 0 : i32
    %2 = arith.cmpi ne, %1, %c0_i32_0 : i32
    scf.if %2 {
      %cst_11 = arith.constant 0.000000e+00 : f32
      %13 = vector.broadcast %cst_11 : f32 to vector<8x64xf32>
      %c0_12 = arith.constant 0 : index
      %c0_13 = arith.constant 0 : index
      %14 = vector.load %arg8[%c0_12, %c0_13] : memref<8x64xf32, #tpu.memory_space<vmem>>, vector<8x64xf32>
      tpu.vector_store %arg8[%c0_12, %c0_13], %13 {strides = array<i32>} : memref<8x64xf32, #tpu.memory_space<vmem>>, vector<8x64xf32>,
    } else {
    }
    %c0 = arith.constant 0 : index
    %c0_1 = arith.constant 0 : index
    %3 = vector.load %arg8[%c0, %c0_1] : memref<8x64xf32, #tpu.memory_space<vmem>>, vector<8x64xf32>
    %c0_2 = arith.constant 0 : index
    %c0_3 = arith.constant 0 : index
    %4 = vector.load %arg3[%c0_2, %c0_3] : memref<8x400xbf16, #tpu.memory_space<vmem>>, vector<8x400xbf16>
    %c0_4 = arith.constant 0 : index
    %c0_5 = arith.constant 0 : index
    %c0_6 = arith.constant 0 : index
    %5 = vector.load %arg4[%c0_4, %c0_5, %c0_6] : memref<1x400x64xbf16, #tpu.memory_space<vmem>>, vector<1x400x64xbf16>
    %6 = vector.shape_cast %5 : vector<1x400x64xbf16> to vector<400x64xbf16>
    %cst = arith.constant dense<0.000000e+00> : vector<8x64xf32>
    %7 = tpu.matmul %4, %6, %cst {dimension_numbers = #tpu.dot_dimension_numbers<[1], [0], [0], [1], [0, 0, 1, 1], [], []>} : vector<8x400xbf16>, vector<400x64xbf16>, vector<8x64xf32> -> vector<8x64xf32>
    %8 = arith.addf %3, %7 : vector<8x64xf32>
    %c0_7 = arith.constant 0 : index
    %c0_8 = arith.constant 0 : index
    %9 = vector.load %arg8[%c0_7, %c0_8] : memref<8x64xf32, #tpu.memory_space<vmem>>, vector<8x64xf32>
    tpu.vector_store %arg8[%c0_7, %c0_8], %8 {strides = array<i32>} : memref<8x64xf32, #tpu.memory_space<vmem>>, vector<8x64xf32>,
    %c0_i32_9 = arith.constant 0 : i32
    %10 = arith.cmpi eq, %arg2, %c0_i32_9 : i32
    %11 = arith.extui %10 : i1 to i32
    %c0_i32_10 = arith.constant 0 : i32
    %12 = arith.cmpi ne, %11, %c0_i32_10 : i32
    scf.if %12 {
      %c0_11 = arith.constant 0 : index
      %c0_12 = arith.constant 0 : index
      %13 = vector.load %arg8[%c0_11, %c0_12] : memref<8x64xf32, #tpu.memory_space<vmem>>, vector<8x64xf32>
      %c0_13 = arith.constant 0 : index
      %c0_14 = arith.constant 0 : index
      %14 = vector.load %arg5[%c0_13, %c0_14] : memref<8x1xf32, #tpu.memory_space<vmem>>, vector<8x1xf32>
      %15 = vector.broadcast %14 : vector<8x1xf32> to vector<8x64xf32>
      %16 = arith.addf %13, %15 : vector<8x64xf32>
      %c0_15 = arith.constant 0 : index
      %c0_16 = arith.constant 0 : index
      %c0_17 = arith.constant 0 : index
      %17 = vector.load %arg6[%c0_15, %c0_16, %c0_17] : memref<1x8x64xbf16, #tpu.memory_space<vmem>>, vector<1x8x64xbf16>
      %18 = vector.shape_cast %17 : vector<1x8x64xbf16> to vector<8x64xbf16>
      %19 = arith.extf %18 : vector<8x64xbf16> to vector<8x64xf32>
      %20 = arith.addf %16, %19 : vector<8x64xf32>
      %cst_18 = arith.constant 0.000000e+00 : f32
      %21 = vector.broadcast %cst_18 : f32 to vector<8x64xf32>
      %22 = arith.maximumf %20, %21 : vector<8x64xf32>
      %23 = arith.truncf %22 : vector<8x64xf32> to vector<8x64xbf16>
      %c0_19 = arith.constant 0 : index
      %c0_20 = arith.constant 0 : index
      %c0_21 = arith.constant 0 : index
      %24 = vector.load %arg7[%c0_19, %c0_20, %c0_21] : memref<1x8x64xbf16, #tpu.memory_space<vmem>>, vector<1x8x64xbf16>
      %25 = vector.shape_cast %24 : vector<1x8x64xbf16> to vector<8x64xbf16>
      %26 = vector.shape_cast %23 : vector<8x64xbf16> to vector<1x8x64xbf16>
      tpu.vector_store %arg7[%c0_19, %c0_20, %c0_21], %26 {strides = array<i32>} : memref<1x8x64xbf16, #tpu.memory_space<vmem>>, vector<1x8x64xbf16>,
    } else {
    }
    return
  }
  func.func @transform_0(%arg0: i32, %arg1: i32, %arg2: i32) -> (i32, i32) {
    %c0_i32 = arith.constant 0 : i32
    %c0_i32_0 = arith.constant 0 : i32
    return %c0_i32, %arg2 : i32, i32
  }
  func.func @transform_1(%arg0: i32, %arg1: i32, %arg2: i32) -> (i32, i32, i32) {
    %c0_i32 = arith.constant 0 : i32
    return %arg0, %arg2, %arg1 : i32, i32, i32
  }
  func.func @transform_2(%arg0: i32, %arg1: i32, %arg2: i32) -> (i32, i32) {
    %c0_i32 = arith.constant 0 : i32
    %c0_i32_0 = arith.constant 0 : i32
    %c0_i32_1 = arith.constant 0 : i32
    return %c0_i32, %c0_i32_0 : i32, i32
  }
  func.func @transform_3(%arg0: i32, %arg1: i32, %arg2: i32) -> (i32, i32, i32) {
    %c0_i32 = arith.constant 0 : i32
    %c0_i32_0 = arith.constant 0 : i32
    return %arg0, %c0_i32, %arg1 : i32, i32, i32
  }
  func.func @transform_4(%arg0: i32, %arg1: i32, %arg2: i32) -> (i32, i32, i32) {
    %c0_i32 = arith.constant 0 : i32
    %c0_i32_0 = arith.constant 0 : i32
    return %arg0, %c0_i32, %arg1 : i32, i32, i32
  }
}

module attributes {stable_mosaic.version = 11 : i64} {
  func.func @_bilerp_kernel(%arg0: i32, %arg1: memref<16x8xbf16, #tpu.memory_space<vmem>>, %arg2: memref<1x8x8xbf16, #tpu.memory_space<vmem>>, %arg3: memref<8x16xbf16, #tpu.memory_space<vmem>>, %arg4: memref<1x16x16xbf16, #tpu.memory_space<vmem>>) attributes {dimension_semantics = [#tpu.dimension_semantics<parallel>], iteration_bounds = array<i64: 16>, scalar_prefetch = 0 : i64, scratch_operands = 0 : i64, tpu.core_type = #tpu.core_type<tc>, window_params = [{pipeline_mode = #tpu.pipeline_mode<synchronous>, transform_indices = @transform_0, window_bounds = array<i64: 16, 8>}, {transform_indices = @transform_1, window_bounds = array<i64: 1, 8, 8>}, {pipeline_mode = #tpu.pipeline_mode<synchronous>, transform_indices = @transform_2, window_bounds = array<i64: 8, 16>}, {transform_indices = @transform_3, window_bounds = array<i64: 1, 16, 16>}]} {
    %c0 = arith.constant 0 : index
    %c0_0 = arith.constant 0 : index
    %0 = vector.load %arg1[%c0, %c0_0] : memref<16x8xbf16, #tpu.memory_space<vmem>>, vector<16x8xbf16>
    %c0_1 = arith.constant 0 : index
    %c0_2 = arith.constant 0 : index
    %c0_3 = arith.constant 0 : index
    %1 = vector.load %arg2[%c0_1, %c0_2, %c0_3] : memref<1x8x8xbf16, #tpu.memory_space<vmem>>, vector<1x8x8xbf16>
    %2 = vector.shape_cast %1 : vector<1x8x8xbf16> to vector<8x8xbf16>
    %cst = arith.constant dense<0.000000e+00> : vector<16x8xf32>
    %3 = tpu.matmul %0, %2, %cst {dimension_numbers = #tpu.dot_dimension_numbers<[1], [0], [0], [1], [0, 0, 1, 1], [], []>} : vector<16x8xbf16>, vector<8x8xbf16>, vector<16x8xf32> -> vector<16x8xf32>
    %4 = arith.truncf %3 : vector<16x8xf32> to vector<16x8xbf16>
    %c0_4 = arith.constant 0 : index
    %c0_5 = arith.constant 0 : index
    %5 = vector.load %arg3[%c0_4, %c0_5] : memref<8x16xbf16, #tpu.memory_space<vmem>>, vector<8x16xbf16>
    %cst_6 = arith.constant dense<0.000000e+00> : vector<16x16xf32>
    %6 = tpu.matmul %4, %5, %cst_6 {dimension_numbers = #tpu.dot_dimension_numbers<[1], [0], [0], [1], [0, 0, 1, 1], [], []>} : vector<16x8xbf16>, vector<8x16xbf16>, vector<16x16xf32> -> vector<16x16xf32>
    %7 = arith.truncf %6 : vector<16x16xf32> to vector<16x16xbf16>
    %c0_7 = arith.constant 0 : index
    %c0_8 = arith.constant 0 : index
    %c0_9 = arith.constant 0 : index
    %8 = vector.load %arg4[%c0_7, %c0_8, %c0_9] : memref<1x16x16xbf16, #tpu.memory_space<vmem>>, vector<1x16x16xbf16>
    %9 = vector.shape_cast %8 : vector<1x16x16xbf16> to vector<16x16xbf16>
    %10 = vector.shape_cast %7 : vector<16x16xbf16> to vector<1x16x16xbf16>
    tpu.vector_store %arg4[%c0_7, %c0_8, %c0_9], %10 {strides = array<i32>} : memref<1x16x16xbf16, #tpu.memory_space<vmem>>, vector<1x16x16xbf16>,
    return
  }
  func.func @transform_0(%arg0: i32) -> (i32, i32) {
    %c0_i32 = arith.constant 0 : i32
    %c0_i32_0 = arith.constant 0 : i32
    %c0_i32_1 = arith.constant 0 : i32
    return %c0_i32, %c0_i32_0 : i32, i32
  }
  func.func @transform_1(%arg0: i32) -> (i32, i32, i32) {
    %c0_i32 = arith.constant 0 : i32
    %c0_i32_0 = arith.constant 0 : i32
    %c0_i32_1 = arith.constant 0 : i32
    return %arg0, %c0_i32, %c0_i32_0 : i32, i32, i32
  }
  func.func @transform_2(%arg0: i32) -> (i32, i32) {
    %c0_i32 = arith.constant 0 : i32
    %c0_i32_0 = arith.constant 0 : i32
    %c0_i32_1 = arith.constant 0 : i32
    return %c0_i32, %c0_i32_0 : i32, i32
  }
  func.func @transform_3(%arg0: i32) -> (i32, i32, i32) {
    %c0_i32 = arith.constant 0 : i32
    %c0_i32_0 = arith.constant 0 : i32
    %c0_i32_1 = arith.constant 0 : i32
    return %arg0, %c0_i32, %c0_i32_0 : i32, i32, i32
  }
}

module attributes {stable_mosaic.version = 11 : i64} {
  func.func @_conv_gemm_kernel(%arg0: i32, %arg1: i32, %arg2: i32, %arg3: memref<4x200xbf16, #tpu.memory_space<vmem>>, %arg4: memref<1x200x256xbf16, #tpu.memory_space<vmem>>, %arg5: memref<4x1xf32, #tpu.memory_space<vmem>>, %arg6: memref<1x4x256xbf16, #tpu.memory_space<vmem>>, %arg7: memref<4x256xf32, #tpu.memory_space<vmem>>) attributes {dimension_semantics = [#tpu.dimension_semantics<parallel>, #tpu.dimension_semantics<parallel>, #tpu.dimension_semantics<arbitrary>], iteration_bounds = array<i64: 2, 1, 1>, scalar_prefetch = 0 : i64, scratch_operands = 1 : i64, tpu.core_type = #tpu.core_type<tc>, window_params = [{transform_indices = @transform_0, window_bounds = array<i64: 4, 200>}, {transform_indices = @transform_1, window_bounds = array<i64: 1, 200, 256>}, {pipeline_mode = #tpu.pipeline_mode<synchronous>, transform_indices = @transform_2, window_bounds = array<i64: 4, 1>}, {transform_indices = @transform_3, window_bounds = array<i64: 1, 4, 256>}]} {
    %c0_i32 = arith.constant 0 : i32
    %0 = arith.cmpi eq, %arg2, %c0_i32 : i32
    %1 = arith.extui %0 : i1 to i32
    %c0_i32_0 = arith.constant 0 : i32
    %2 = arith.cmpi ne, %1, %c0_i32_0 : i32
    scf.if %2 {
      %cst_11 = arith.constant 0.000000e+00 : f32
      %13 = vector.broadcast %cst_11 : f32 to vector<4x256xf32>
      %c0_12 = arith.constant 0 : index
      %c0_13 = arith.constant 0 : index
      %14 = vector.load %arg7[%c0_12, %c0_13] : memref<4x256xf32, #tpu.memory_space<vmem>>, vector<4x256xf32>
      tpu.vector_store %arg7[%c0_12, %c0_13], %13 {strides = array<i32>} : memref<4x256xf32, #tpu.memory_space<vmem>>, vector<4x256xf32>,
    } else {
    }
    %c0 = arith.constant 0 : index
    %c0_1 = arith.constant 0 : index
    %3 = vector.load %arg7[%c0, %c0_1] : memref<4x256xf32, #tpu.memory_space<vmem>>, vector<4x256xf32>
    %c0_2 = arith.constant 0 : index
    %c0_3 = arith.constant 0 : index
    %4 = vector.load %arg3[%c0_2, %c0_3] : memref<4x200xbf16, #tpu.memory_space<vmem>>, vector<4x200xbf16>
    %c0_4 = arith.constant 0 : index
    %c0_5 = arith.constant 0 : index
    %c0_6 = arith.constant 0 : index
    %5 = vector.load %arg4[%c0_4, %c0_5, %c0_6] : memref<1x200x256xbf16, #tpu.memory_space<vmem>>, vector<1x200x256xbf16>
    %6 = vector.shape_cast %5 : vector<1x200x256xbf16> to vector<200x256xbf16>
    %cst = arith.constant dense<0.000000e+00> : vector<4x256xf32>
    %7 = tpu.matmul %4, %6, %cst {dimension_numbers = #tpu.dot_dimension_numbers<[1], [0], [0], [1], [0, 0, 1, 1], [], []>} : vector<4x200xbf16>, vector<200x256xbf16>, vector<4x256xf32> -> vector<4x256xf32>
    %8 = arith.addf %3, %7 : vector<4x256xf32>
    %c0_7 = arith.constant 0 : index
    %c0_8 = arith.constant 0 : index
    %9 = vector.load %arg7[%c0_7, %c0_8] : memref<4x256xf32, #tpu.memory_space<vmem>>, vector<4x256xf32>
    tpu.vector_store %arg7[%c0_7, %c0_8], %8 {strides = array<i32>} : memref<4x256xf32, #tpu.memory_space<vmem>>, vector<4x256xf32>,
    %c0_i32_9 = arith.constant 0 : i32
    %10 = arith.cmpi eq, %arg2, %c0_i32_9 : i32
    %11 = arith.extui %10 : i1 to i32
    %c0_i32_10 = arith.constant 0 : i32
    %12 = arith.cmpi ne, %11, %c0_i32_10 : i32
    scf.if %12 {
      %c0_11 = arith.constant 0 : index
      %c0_12 = arith.constant 0 : index
      %13 = vector.load %arg7[%c0_11, %c0_12] : memref<4x256xf32, #tpu.memory_space<vmem>>, vector<4x256xf32>
      %c0_13 = arith.constant 0 : index
      %c0_14 = arith.constant 0 : index
      %14 = vector.load %arg5[%c0_13, %c0_14] : memref<4x1xf32, #tpu.memory_space<vmem>>, vector<4x1xf32>
      %15 = vector.broadcast %14 : vector<4x1xf32> to vector<4x256xf32>
      %16 = arith.addf %13, %15 : vector<4x256xf32>
      %cst_15 = arith.constant 0.000000e+00 : f32
      %17 = vector.broadcast %cst_15 : f32 to vector<4x256xf32>
      %18 = arith.maximumf %16, %17 : vector<4x256xf32>
      %19 = arith.truncf %18 : vector<4x256xf32> to vector<4x256xbf16>
      %c0_16 = arith.constant 0 : index
      %c0_17 = arith.constant 0 : index
      %c0_18 = arith.constant 0 : index
      %20 = vector.load %arg6[%c0_16, %c0_17, %c0_18] : memref<1x4x256xbf16, #tpu.memory_space<vmem>>, vector<1x4x256xbf16>
      %21 = vector.shape_cast %20 : vector<1x4x256xbf16> to vector<4x256xbf16>
      %22 = vector.shape_cast %19 : vector<4x256xbf16> to vector<1x4x256xbf16>
      tpu.vector_store %arg6[%c0_16, %c0_17, %c0_18], %22 {strides = array<i32>} : memref<1x4x256xbf16, #tpu.memory_space<vmem>>, vector<1x4x256xbf16>,
    } else {
    }
    return
  }
  func.func @transform_0(%arg0: i32, %arg1: i32, %arg2: i32) -> (i32, i32) {
    %c0_i32 = arith.constant 0 : i32
    %c0_i32_0 = arith.constant 0 : i32
    return %c0_i32, %arg2 : i32, i32
  }
  func.func @transform_1(%arg0: i32, %arg1: i32, %arg2: i32) -> (i32, i32, i32) {
    %c0_i32 = arith.constant 0 : i32
    return %arg0, %arg2, %arg1 : i32, i32, i32
  }
  func.func @transform_2(%arg0: i32, %arg1: i32, %arg2: i32) -> (i32, i32) {
    %c0_i32 = arith.constant 0 : i32
    %c0_i32_0 = arith.constant 0 : i32
    %c0_i32_1 = arith.constant 0 : i32
    return %c0_i32, %c0_i32_0 : i32, i32
  }
  func.func @transform_3(%arg0: i32, %arg1: i32, %arg2: i32) -> (i32, i32, i32) {
    %c0_i32 = arith.constant 0 : i32
    %c0_i32_0 = arith.constant 0 : i32
    return %arg0, %c0_i32, %arg1 : i32, i32, i32
  }
}

module attributes {stable_mosaic.version = 11 : i64} {
  func.func @_conv_gemm_kernel(%arg0: i32, %arg1: i32, %arg2: i32, %arg3: memref<4x36xbf16, #tpu.memory_space<vmem>>, %arg4: memref<1x36x256xbf16, #tpu.memory_space<vmem>>, %arg5: memref<4x1xf32, #tpu.memory_space<vmem>>, %arg6: memref<1x4x256xbf16, #tpu.memory_space<vmem>>, %arg7: memref<4x256xf32, #tpu.memory_space<vmem>>) attributes {dimension_semantics = [#tpu.dimension_semantics<parallel>, #tpu.dimension_semantics<parallel>, #tpu.dimension_semantics<arbitrary>], iteration_bounds = array<i64: 2, 1, 1>, scalar_prefetch = 0 : i64, scratch_operands = 1 : i64, tpu.core_type = #tpu.core_type<tc>, window_params = [{transform_indices = @transform_0, window_bounds = array<i64: 4, 36>}, {transform_indices = @transform_1, window_bounds = array<i64: 1, 36, 256>}, {pipeline_mode = #tpu.pipeline_mode<synchronous>, transform_indices = @transform_2, window_bounds = array<i64: 4, 1>}, {transform_indices = @transform_3, window_bounds = array<i64: 1, 4, 256>}]} {
    %c0_i32 = arith.constant 0 : i32
    %0 = arith.cmpi eq, %arg2, %c0_i32 : i32
    %1 = arith.extui %0 : i1 to i32
    %c0_i32_0 = arith.constant 0 : i32
    %2 = arith.cmpi ne, %1, %c0_i32_0 : i32
    scf.if %2 {
      %cst_11 = arith.constant 0.000000e+00 : f32
      %13 = vector.broadcast %cst_11 : f32 to vector<4x256xf32>
      %c0_12 = arith.constant 0 : index
      %c0_13 = arith.constant 0 : index
      %14 = vector.load %arg7[%c0_12, %c0_13] : memref<4x256xf32, #tpu.memory_space<vmem>>, vector<4x256xf32>
      tpu.vector_store %arg7[%c0_12, %c0_13], %13 {strides = array<i32>} : memref<4x256xf32, #tpu.memory_space<vmem>>, vector<4x256xf32>,
    } else {
    }
    %c0 = arith.constant 0 : index
    %c0_1 = arith.constant 0 : index
    %3 = vector.load %arg7[%c0, %c0_1] : memref<4x256xf32, #tpu.memory_space<vmem>>, vector<4x256xf32>
    %c0_2 = arith.constant 0 : index
    %c0_3 = arith.constant 0 : index
    %4 = vector.load %arg3[%c0_2, %c0_3] : memref<4x36xbf16, #tpu.memory_space<vmem>>, vector<4x36xbf16>
    %c0_4 = arith.constant 0 : index
    %c0_5 = arith.constant 0 : index
    %c0_6 = arith.constant 0 : index
    %5 = vector.load %arg4[%c0_4, %c0_5, %c0_6] : memref<1x36x256xbf16, #tpu.memory_space<vmem>>, vector<1x36x256xbf16>
    %6 = vector.shape_cast %5 : vector<1x36x256xbf16> to vector<36x256xbf16>
    %cst = arith.constant dense<0.000000e+00> : vector<4x256xf32>
    %7 = tpu.matmul %4, %6, %cst {dimension_numbers = #tpu.dot_dimension_numbers<[1], [0], [0], [1], [0, 0, 1, 1], [], []>} : vector<4x36xbf16>, vector<36x256xbf16>, vector<4x256xf32> -> vector<4x256xf32>
    %8 = arith.addf %3, %7 : vector<4x256xf32>
    %c0_7 = arith.constant 0 : index
    %c0_8 = arith.constant 0 : index
    %9 = vector.load %arg7[%c0_7, %c0_8] : memref<4x256xf32, #tpu.memory_space<vmem>>, vector<4x256xf32>
    tpu.vector_store %arg7[%c0_7, %c0_8], %8 {strides = array<i32>} : memref<4x256xf32, #tpu.memory_space<vmem>>, vector<4x256xf32>,
    %c0_i32_9 = arith.constant 0 : i32
    %10 = arith.cmpi eq, %arg2, %c0_i32_9 : i32
    %11 = arith.extui %10 : i1 to i32
    %c0_i32_10 = arith.constant 0 : i32
    %12 = arith.cmpi ne, %11, %c0_i32_10 : i32
    scf.if %12 {
      %c0_11 = arith.constant 0 : index
      %c0_12 = arith.constant 0 : index
      %13 = vector.load %arg7[%c0_11, %c0_12] : memref<4x256xf32, #tpu.memory_space<vmem>>, vector<4x256xf32>
      %c0_13 = arith.constant 0 : index
      %c0_14 = arith.constant 0 : index
      %14 = vector.load %arg5[%c0_13, %c0_14] : memref<4x1xf32, #tpu.memory_space<vmem>>, vector<4x1xf32>
      %15 = vector.broadcast %14 : vector<4x1xf32> to vector<4x256xf32>
      %16 = arith.addf %13, %15 : vector<4x256xf32>
      %17 = arith.truncf %16 : vector<4x256xf32> to vector<4x256xbf16>
      %c0_15 = arith.constant 0 : index
      %c0_16 = arith.constant 0 : index
      %c0_17 = arith.constant 0 : index
      %18 = vector.load %arg6[%c0_15, %c0_16, %c0_17] : memref<1x4x256xbf16, #tpu.memory_space<vmem>>, vector<1x4x256xbf16>
      %19 = vector.shape_cast %18 : vector<1x4x256xbf16> to vector<4x256xbf16>
      %20 = vector.shape_cast %17 : vector<4x256xbf16> to vector<1x4x256xbf16>
      tpu.vector_store %arg6[%c0_15, %c0_16, %c0_17], %20 {strides = array<i32>} : memref<1x4x256xbf16, #tpu.memory_space<vmem>>, vector<1x4x256xbf16>,
    } else {
    }
    return
  }
  func.func @transform_0(%arg0: i32, %arg1: i32, %arg2: i32) -> (i32, i32) {
    %c0_i32 = arith.constant 0 : i32
    %c0_i32_0 = arith.constant 0 : i32
    return %c0_i32, %arg2 : i32, i32
  }
  func.func @transform_1(%arg0: i32, %arg1: i32, %arg2: i32) -> (i32, i32, i32) {
    %c0_i32 = arith.constant 0 : i32
    return %arg0, %arg2, %arg1 : i32, i32, i32
  }
  func.func @transform_2(%arg0: i32, %arg1: i32, %arg2: i32) -> (i32, i32) {
    %c0_i32 = arith.constant 0 : i32
    %c0_i32_0 = arith.constant 0 : i32
    %c0_i32_1 = arith.constant 0 : i32
    return %c0_i32, %c0_i32_0 : i32, i32
  }
  func.func @transform_3(%arg0: i32, %arg1: i32, %arg2: i32) -> (i32, i32, i32) {
    %c0_i32 = arith.constant 0 : i32
    %c0_i32_0 = arith.constant 0 : i32
    return %arg0, %c0_i32, %arg1 : i32, i32, i32
  }
}

module attributes {stable_mosaic.version = 11 : i64} {
  func.func @_conv_gemm_kernel(%arg0: i32, %arg1: i32, %arg2: i32, %arg3: memref<4x200xbf16, #tpu.memory_space<vmem>>, %arg4: memref<1x200x256xbf16, #tpu.memory_space<vmem>>, %arg5: memref<4x1xf32, #tpu.memory_space<vmem>>, %arg6: memref<1x4x256xbf16, #tpu.memory_space<vmem>>, %arg7: memref<1x4x256xbf16, #tpu.memory_space<vmem>>, %arg8: memref<4x256xf32, #tpu.memory_space<vmem>>) attributes {dimension_semantics = [#tpu.dimension_semantics<parallel>, #tpu.dimension_semantics<parallel>, #tpu.dimension_semantics<arbitrary>], iteration_bounds = array<i64: 2, 1, 1>, scalar_prefetch = 0 : i64, scratch_operands = 1 : i64, tpu.core_type = #tpu.core_type<tc>, window_params = [{transform_indices = @transform_0, window_bounds = array<i64: 4, 200>}, {transform_indices = @transform_1, window_bounds = array<i64: 1, 200, 256>}, {pipeline_mode = #tpu.pipeline_mode<synchronous>, transform_indices = @transform_2, window_bounds = array<i64: 4, 1>}, {transform_indices = @transform_3, window_bounds = array<i64: 1, 4, 256>}, {transform_indices = @transform_4, window_bounds = array<i64: 1, 4, 256>}]} {
    %c0_i32 = arith.constant 0 : i32
    %0 = arith.cmpi eq, %arg2, %c0_i32 : i32
    %1 = arith.extui %0 : i1 to i32
    %c0_i32_0 = arith.constant 0 : i32
    %2 = arith.cmpi ne, %1, %c0_i32_0 : i32
    scf.if %2 {
      %cst_11 = arith.constant 0.000000e+00 : f32
      %13 = vector.broadcast %cst_11 : f32 to vector<4x256xf32>
      %c0_12 = arith.constant 0 : index
      %c0_13 = arith.constant 0 : index
      %14 = vector.load %arg8[%c0_12, %c0_13] : memref<4x256xf32, #tpu.memory_space<vmem>>, vector<4x256xf32>
      tpu.vector_store %arg8[%c0_12, %c0_13], %13 {strides = array<i32>} : memref<4x256xf32, #tpu.memory_space<vmem>>, vector<4x256xf32>,
    } else {
    }
    %c0 = arith.constant 0 : index
    %c0_1 = arith.constant 0 : index
    %3 = vector.load %arg8[%c0, %c0_1] : memref<4x256xf32, #tpu.memory_space<vmem>>, vector<4x256xf32>
    %c0_2 = arith.constant 0 : index
    %c0_3 = arith.constant 0 : index
    %4 = vector.load %arg3[%c0_2, %c0_3] : memref<4x200xbf16, #tpu.memory_space<vmem>>, vector<4x200xbf16>
    %c0_4 = arith.constant 0 : index
    %c0_5 = arith.constant 0 : index
    %c0_6 = arith.constant 0 : index
    %5 = vector.load %arg4[%c0_4, %c0_5, %c0_6] : memref<1x200x256xbf16, #tpu.memory_space<vmem>>, vector<1x200x256xbf16>
    %6 = vector.shape_cast %5 : vector<1x200x256xbf16> to vector<200x256xbf16>
    %cst = arith.constant dense<0.000000e+00> : vector<4x256xf32>
    %7 = tpu.matmul %4, %6, %cst {dimension_numbers = #tpu.dot_dimension_numbers<[1], [0], [0], [1], [0, 0, 1, 1], [], []>} : vector<4x200xbf16>, vector<200x256xbf16>, vector<4x256xf32> -> vector<4x256xf32>
    %8 = arith.addf %3, %7 : vector<4x256xf32>
    %c0_7 = arith.constant 0 : index
    %c0_8 = arith.constant 0 : index
    %9 = vector.load %arg8[%c0_7, %c0_8] : memref<4x256xf32, #tpu.memory_space<vmem>>, vector<4x256xf32>
    tpu.vector_store %arg8[%c0_7, %c0_8], %8 {strides = array<i32>} : memref<4x256xf32, #tpu.memory_space<vmem>>, vector<4x256xf32>,
    %c0_i32_9 = arith.constant 0 : i32
    %10 = arith.cmpi eq, %arg2, %c0_i32_9 : i32
    %11 = arith.extui %10 : i1 to i32
    %c0_i32_10 = arith.constant 0 : i32
    %12 = arith.cmpi ne, %11, %c0_i32_10 : i32
    scf.if %12 {
      %c0_11 = arith.constant 0 : index
      %c0_12 = arith.constant 0 : index
      %13 = vector.load %arg8[%c0_11, %c0_12] : memref<4x256xf32, #tpu.memory_space<vmem>>, vector<4x256xf32>
      %c0_13 = arith.constant 0 : index
      %c0_14 = arith.constant 0 : index
      %14 = vector.load %arg5[%c0_13, %c0_14] : memref<4x1xf32, #tpu.memory_space<vmem>>, vector<4x1xf32>
      %15 = vector.broadcast %14 : vector<4x1xf32> to vector<4x256xf32>
      %16 = arith.addf %13, %15 : vector<4x256xf32>
      %c0_15 = arith.constant 0 : index
      %c0_16 = arith.constant 0 : index
      %c0_17 = arith.constant 0 : index
      %17 = vector.load %arg6[%c0_15, %c0_16, %c0_17] : memref<1x4x256xbf16, #tpu.memory_space<vmem>>, vector<1x4x256xbf16>
      %18 = vector.shape_cast %17 : vector<1x4x256xbf16> to vector<4x256xbf16>
      %19 = arith.extf %18 : vector<4x256xbf16> to vector<4x256xf32>
      %20 = arith.addf %16, %19 : vector<4x256xf32>
      %cst_18 = arith.constant 0.000000e+00 : f32
      %21 = vector.broadcast %cst_18 : f32 to vector<4x256xf32>
      %22 = arith.maximumf %20, %21 : vector<4x256xf32>
      %23 = arith.truncf %22 : vector<4x256xf32> to vector<4x256xbf16>
      %c0_19 = arith.constant 0 : index
      %c0_20 = arith.constant 0 : index
      %c0_21 = arith.constant 0 : index
      %24 = vector.load %arg7[%c0_19, %c0_20, %c0_21] : memref<1x4x256xbf16, #tpu.memory_space<vmem>>, vector<1x4x256xbf16>
      %25 = vector.shape_cast %24 : vector<1x4x256xbf16> to vector<4x256xbf16>
      %26 = vector.shape_cast %23 : vector<4x256xbf16> to vector<1x4x256xbf16>
      tpu.vector_store %arg7[%c0_19, %c0_20, %c0_21], %26 {strides = array<i32>} : memref<1x4x256xbf16, #tpu.memory_space<vmem>>, vector<1x4x256xbf16>,
    } else {
    }
    return
  }
  func.func @transform_0(%arg0: i32, %arg1: i32, %arg2: i32) -> (i32, i32) {
    %c0_i32 = arith.constant 0 : i32
    %c0_i32_0 = arith.constant 0 : i32
    return %c0_i32, %arg2 : i32, i32
  }
  func.func @transform_1(%arg0: i32, %arg1: i32, %arg2: i32) -> (i32, i32, i32) {
    %c0_i32 = arith.constant 0 : i32
    return %arg0, %arg2, %arg1 : i32, i32, i32
  }
  func.func @transform_2(%arg0: i32, %arg1: i32, %arg2: i32) -> (i32, i32) {
    %c0_i32 = arith.constant 0 : i32
    %c0_i32_0 = arith.constant 0 : i32
    %c0_i32_1 = arith.constant 0 : i32
    return %c0_i32, %c0_i32_0 : i32, i32
  }
  func.func @transform_3(%arg0: i32, %arg1: i32, %arg2: i32) -> (i32, i32, i32) {
    %c0_i32 = arith.constant 0 : i32
    %c0_i32_0 = arith.constant 0 : i32
    return %arg0, %c0_i32, %arg1 : i32, i32, i32
  }
  func.func @transform_4(%arg0: i32, %arg1: i32, %arg2: i32) -> (i32, i32, i32) {
    %c0_i32 = arith.constant 0 : i32
    %c0_i32_0 = arith.constant 0 : i32
    return %arg0, %c0_i32, %arg1 : i32, i32, i32
  }
}

module attributes {stable_mosaic.version = 11 : i64} {
  func.func @_bilerp_kernel(%arg0: i32, %arg1: memref<32x16xbf16, #tpu.memory_space<vmem>>, %arg2: memref<1x16x16xbf16, #tpu.memory_space<vmem>>, %arg3: memref<16x32xbf16, #tpu.memory_space<vmem>>, %arg4: memref<1x32x32xbf16, #tpu.memory_space<vmem>>) attributes {dimension_semantics = [#tpu.dimension_semantics<parallel>], iteration_bounds = array<i64: 8>, scalar_prefetch = 0 : i64, scratch_operands = 0 : i64, tpu.core_type = #tpu.core_type<tc>, window_params = [{pipeline_mode = #tpu.pipeline_mode<synchronous>, transform_indices = @transform_0, window_bounds = array<i64: 32, 16>}, {transform_indices = @transform_1, window_bounds = array<i64: 1, 16, 16>}, {pipeline_mode = #tpu.pipeline_mode<synchronous>, transform_indices = @transform_2, window_bounds = array<i64: 16, 32>}, {transform_indices = @transform_3, window_bounds = array<i64: 1, 32, 32>}]} {
    %c0 = arith.constant 0 : index
    %c0_0 = arith.constant 0 : index
    %0 = vector.load %arg1[%c0, %c0_0] : memref<32x16xbf16, #tpu.memory_space<vmem>>, vector<32x16xbf16>
    %c0_1 = arith.constant 0 : index
    %c0_2 = arith.constant 0 : index
    %c0_3 = arith.constant 0 : index
    %1 = vector.load %arg2[%c0_1, %c0_2, %c0_3] : memref<1x16x16xbf16, #tpu.memory_space<vmem>>, vector<1x16x16xbf16>
    %2 = vector.shape_cast %1 : vector<1x16x16xbf16> to vector<16x16xbf16>
    %cst = arith.constant dense<0.000000e+00> : vector<32x16xf32>
    %3 = tpu.matmul %0, %2, %cst {dimension_numbers = #tpu.dot_dimension_numbers<[1], [0], [0], [1], [0, 0, 1, 1], [], []>} : vector<32x16xbf16>, vector<16x16xbf16>, vector<32x16xf32> -> vector<32x16xf32>
    %4 = arith.truncf %3 : vector<32x16xf32> to vector<32x16xbf16>
    %c0_4 = arith.constant 0 : index
    %c0_5 = arith.constant 0 : index
    %5 = vector.load %arg3[%c0_4, %c0_5] : memref<16x32xbf16, #tpu.memory_space<vmem>>, vector<16x32xbf16>
    %cst_6 = arith.constant dense<0.000000e+00> : vector<32x32xf32>
    %6 = tpu.matmul %4, %5, %cst_6 {dimension_numbers = #tpu.dot_dimension_numbers<[1], [0], [0], [1], [0, 0, 1, 1], [], []>} : vector<32x16xbf16>, vector<16x32xbf16>, vector<32x32xf32> -> vector<32x32xf32>
    %7 = arith.truncf %6 : vector<32x32xf32> to vector<32x32xbf16>
    %c0_7 = arith.constant 0 : index
    %c0_8 = arith.constant 0 : index
    %c0_9 = arith.constant 0 : index
    %8 = vector.load %arg4[%c0_7, %c0_8, %c0_9] : memref<1x32x32xbf16, #tpu.memory_space<vmem>>, vector<1x32x32xbf16>
    %9 = vector.shape_cast %8 : vector<1x32x32xbf16> to vector<32x32xbf16>
    %10 = vector.shape_cast %7 : vector<32x32xbf16> to vector<1x32x32xbf16>
    tpu.vector_store %arg4[%c0_7, %c0_8, %c0_9], %10 {strides = array<i32>} : memref<1x32x32xbf16, #tpu.memory_space<vmem>>, vector<1x32x32xbf16>,
    return
  }
  func.func @transform_0(%arg0: i32) -> (i32, i32) {
    %c0_i32 = arith.constant 0 : i32
    %c0_i32_0 = arith.constant 0 : i32
    %c0_i32_1 = arith.constant 0 : i32
    return %c0_i32, %c0_i32_0 : i32, i32
  }
  func.func @transform_1(%arg0: i32) -> (i32, i32, i32) {
    %c0_i32 = arith.constant 0 : i32
    %c0_i32_0 = arith.constant 0 : i32
    %c0_i32_1 = arith.constant 0 : i32
    return %arg0, %c0_i32, %c0_i32_0 : i32, i32, i32
  }
  func.func @transform_2(%arg0: i32) -> (i32, i32) {
    %c0_i32 = arith.constant 0 : i32
    %c0_i32_0 = arith.constant 0 : i32
    %c0_i32_1 = arith.constant 0 : i32
    return %c0_i32, %c0_i32_0 : i32, i32
  }
  func.func @transform_3(%arg0: i32) -> (i32, i32, i32) {
    %c0_i32 = arith.constant 0 : i32
    %c0_i32_0 = arith.constant 0 : i32
    %c0_i32_1 = arith.constant 0 : i32
    return %arg0, %c0_i32, %c0_i32_0 : i32, i32, i32
  }
}

module attributes {stable_mosaic.version = 11 : i64} {
  func.func @_conv_gemm_kernel(%arg0: i32, %arg1: i32, %arg2: i32, %arg3: memref<2x100xbf16, #tpu.memory_space<vmem>>, %arg4: memref<1x100x512xbf16, #tpu.memory_space<vmem>>, %arg5: memref<2x1xf32, #tpu.memory_space<vmem>>, %arg6: memref<1x2x512xbf16, #tpu.memory_space<vmem>>, %arg7: memref<2x512xf32, #tpu.memory_space<vmem>>) attributes {dimension_semantics = [#tpu.dimension_semantics<parallel>, #tpu.dimension_semantics<parallel>, #tpu.dimension_semantics<arbitrary>], iteration_bounds = array<i64: 2, 2, 1>, scalar_prefetch = 0 : i64, scratch_operands = 1 : i64, tpu.core_type = #tpu.core_type<tc>, window_params = [{transform_indices = @transform_0, window_bounds = array<i64: 2, 100>}, {transform_indices = @transform_1, window_bounds = array<i64: 1, 100, 512>}, {pipeline_mode = #tpu.pipeline_mode<synchronous>, transform_indices = @transform_2, window_bounds = array<i64: 2, 1>}, {transform_indices = @transform_3, window_bounds = array<i64: 1, 2, 512>}]} {
    %c0_i32 = arith.constant 0 : i32
    %0 = arith.cmpi eq, %arg2, %c0_i32 : i32
    %1 = arith.extui %0 : i1 to i32
    %c0_i32_0 = arith.constant 0 : i32
    %2 = arith.cmpi ne, %1, %c0_i32_0 : i32
    scf.if %2 {
      %cst_11 = arith.constant 0.000000e+00 : f32
      %13 = vector.broadcast %cst_11 : f32 to vector<2x512xf32>
      %c0_12 = arith.constant 0 : index
      %c0_13 = arith.constant 0 : index
      %14 = vector.load %arg7[%c0_12, %c0_13] : memref<2x512xf32, #tpu.memory_space<vmem>>, vector<2x512xf32>
      tpu.vector_store %arg7[%c0_12, %c0_13], %13 {strides = array<i32>} : memref<2x512xf32, #tpu.memory_space<vmem>>, vector<2x512xf32>,
    } else {
    }
    %c0 = arith.constant 0 : index
    %c0_1 = arith.constant 0 : index
    %3 = vector.load %arg7[%c0, %c0_1] : memref<2x512xf32, #tpu.memory_space<vmem>>, vector<2x512xf32>
    %c0_2 = arith.constant 0 : index
    %c0_3 = arith.constant 0 : index
    %4 = vector.load %arg3[%c0_2, %c0_3] : memref<2x100xbf16, #tpu.memory_space<vmem>>, vector<2x100xbf16>
    %c0_4 = arith.constant 0 : index
    %c0_5 = arith.constant 0 : index
    %c0_6 = arith.constant 0 : index
    %5 = vector.load %arg4[%c0_4, %c0_5, %c0_6] : memref<1x100x512xbf16, #tpu.memory_space<vmem>>, vector<1x100x512xbf16>
    %6 = vector.shape_cast %5 : vector<1x100x512xbf16> to vector<100x512xbf16>
    %cst = arith.constant dense<0.000000e+00> : vector<2x512xf32>
    %7 = tpu.matmul %4, %6, %cst {dimension_numbers = #tpu.dot_dimension_numbers<[1], [0], [0], [1], [0, 0, 1, 1], [], []>} : vector<2x100xbf16>, vector<100x512xbf16>, vector<2x512xf32> -> vector<2x512xf32>
    %8 = arith.addf %3, %7 : vector<2x512xf32>
    %c0_7 = arith.constant 0 : index
    %c0_8 = arith.constant 0 : index
    %9 = vector.load %arg7[%c0_7, %c0_8] : memref<2x512xf32, #tpu.memory_space<vmem>>, vector<2x512xf32>
    tpu.vector_store %arg7[%c0_7, %c0_8], %8 {strides = array<i32>} : memref<2x512xf32, #tpu.memory_space<vmem>>, vector<2x512xf32>,
    %c0_i32_9 = arith.constant 0 : i32
    %10 = arith.cmpi eq, %arg2, %c0_i32_9 : i32
    %11 = arith.extui %10 : i1 to i32
    %c0_i32_10 = arith.constant 0 : i32
    %12 = arith.cmpi ne, %11, %c0_i32_10 : i32
    scf.if %12 {
      %c0_11 = arith.constant 0 : index
      %c0_12 = arith.constant 0 : index
      %13 = vector.load %arg7[%c0_11, %c0_12] : memref<2x512xf32, #tpu.memory_space<vmem>>, vector<2x512xf32>
      %c0_13 = arith.constant 0 : index
      %c0_14 = arith.constant 0 : index
      %14 = vector.load %arg5[%c0_13, %c0_14] : memref<2x1xf32, #tpu.memory_space<vmem>>, vector<2x1xf32>
      %15 = vector.broadcast %14 : vector<2x1xf32> to vector<2x512xf32>
      %16 = arith.addf %13, %15 : vector<2x512xf32>
      %cst_15 = arith.constant 0.000000e+00 : f32
      %17 = vector.broadcast %cst_15 : f32 to vector<2x512xf32>
      %18 = arith.maximumf %16, %17 : vector<2x512xf32>
      %19 = arith.truncf %18 : vector<2x512xf32> to vector<2x512xbf16>
      %c0_16 = arith.constant 0 : index
      %c0_17 = arith.constant 0 : index
      %c0_18 = arith.constant 0 : index
      %20 = vector.load %arg6[%c0_16, %c0_17, %c0_18] : memref<1x2x512xbf16, #tpu.memory_space<vmem>>, vector<1x2x512xbf16>
      %21 = vector.shape_cast %20 : vector<1x2x512xbf16> to vector<2x512xbf16>
      %22 = vector.shape_cast %19 : vector<2x512xbf16> to vector<1x2x512xbf16>
      tpu.vector_store %arg6[%c0_16, %c0_17, %c0_18], %22 {strides = array<i32>} : memref<1x2x512xbf16, #tpu.memory_space<vmem>>, vector<1x2x512xbf16>,
    } else {
    }
    return
  }
  func.func @transform_0(%arg0: i32, %arg1: i32, %arg2: i32) -> (i32, i32) {
    %c0_i32 = arith.constant 0 : i32
    %c0_i32_0 = arith.constant 0 : i32
    return %c0_i32, %arg2 : i32, i32
  }
  func.func @transform_1(%arg0: i32, %arg1: i32, %arg2: i32) -> (i32, i32, i32) {
    %c0_i32 = arith.constant 0 : i32
    return %arg0, %arg2, %arg1 : i32, i32, i32
  }
  func.func @transform_2(%arg0: i32, %arg1: i32, %arg2: i32) -> (i32, i32) {
    %c0_i32 = arith.constant 0 : i32
    %c0_i32_0 = arith.constant 0 : i32
    %c0_i32_1 = arith.constant 0 : i32
    return %c0_i32, %c0_i32_0 : i32, i32
  }
  func.func @transform_3(%arg0: i32, %arg1: i32, %arg2: i32) -> (i32, i32, i32) {
    %c0_i32 = arith.constant 0 : i32
    %c0_i32_0 = arith.constant 0 : i32
    return %arg0, %c0_i32, %arg1 : i32, i32, i32
  }
}

module attributes {stable_mosaic.version = 11 : i64} {
  func.func @_conv_gemm_kernel(%arg0: i32, %arg1: i32, %arg2: i32, %arg3: memref<2x18xbf16, #tpu.memory_space<vmem>>, %arg4: memref<1x18x512xbf16, #tpu.memory_space<vmem>>, %arg5: memref<2x1xf32, #tpu.memory_space<vmem>>, %arg6: memref<1x2x512xbf16, #tpu.memory_space<vmem>>, %arg7: memref<2x512xf32, #tpu.memory_space<vmem>>) attributes {dimension_semantics = [#tpu.dimension_semantics<parallel>, #tpu.dimension_semantics<parallel>, #tpu.dimension_semantics<arbitrary>], iteration_bounds = array<i64: 2, 2, 1>, scalar_prefetch = 0 : i64, scratch_operands = 1 : i64, tpu.core_type = #tpu.core_type<tc>, window_params = [{transform_indices = @transform_0, window_bounds = array<i64: 2, 18>}, {transform_indices = @transform_1, window_bounds = array<i64: 1, 18, 512>}, {pipeline_mode = #tpu.pipeline_mode<synchronous>, transform_indices = @transform_2, window_bounds = array<i64: 2, 1>}, {transform_indices = @transform_3, window_bounds = array<i64: 1, 2, 512>}]} {
    %c0_i32 = arith.constant 0 : i32
    %0 = arith.cmpi eq, %arg2, %c0_i32 : i32
    %1 = arith.extui %0 : i1 to i32
    %c0_i32_0 = arith.constant 0 : i32
    %2 = arith.cmpi ne, %1, %c0_i32_0 : i32
    scf.if %2 {
      %cst_11 = arith.constant 0.000000e+00 : f32
      %13 = vector.broadcast %cst_11 : f32 to vector<2x512xf32>
      %c0_12 = arith.constant 0 : index
      %c0_13 = arith.constant 0 : index
      %14 = vector.load %arg7[%c0_12, %c0_13] : memref<2x512xf32, #tpu.memory_space<vmem>>, vector<2x512xf32>
      tpu.vector_store %arg7[%c0_12, %c0_13], %13 {strides = array<i32>} : memref<2x512xf32, #tpu.memory_space<vmem>>, vector<2x512xf32>,
    } else {
    }
    %c0 = arith.constant 0 : index
    %c0_1 = arith.constant 0 : index
    %3 = vector.load %arg7[%c0, %c0_1] : memref<2x512xf32, #tpu.memory_space<vmem>>, vector<2x512xf32>
    %c0_2 = arith.constant 0 : index
    %c0_3 = arith.constant 0 : index
    %4 = vector.load %arg3[%c0_2, %c0_3] : memref<2x18xbf16, #tpu.memory_space<vmem>>, vector<2x18xbf16>
    %c0_4 = arith.constant 0 : index
    %c0_5 = arith.constant 0 : index
    %c0_6 = arith.constant 0 : index
    %5 = vector.load %arg4[%c0_4, %c0_5, %c0_6] : memref<1x18x512xbf16, #tpu.memory_space<vmem>>, vector<1x18x512xbf16>
    %6 = vector.shape_cast %5 : vector<1x18x512xbf16> to vector<18x512xbf16>
    %cst = arith.constant dense<0.000000e+00> : vector<2x512xf32>
    %7 = tpu.matmul %4, %6, %cst {dimension_numbers = #tpu.dot_dimension_numbers<[1], [0], [0], [1], [0, 0, 1, 1], [], []>} : vector<2x18xbf16>, vector<18x512xbf16>, vector<2x512xf32> -> vector<2x512xf32>
    %8 = arith.addf %3, %7 : vector<2x512xf32>
    %c0_7 = arith.constant 0 : index
    %c0_8 = arith.constant 0 : index
    %9 = vector.load %arg7[%c0_7, %c0_8] : memref<2x512xf32, #tpu.memory_space<vmem>>, vector<2x512xf32>
    tpu.vector_store %arg7[%c0_7, %c0_8], %8 {strides = array<i32>} : memref<2x512xf32, #tpu.memory_space<vmem>>, vector<2x512xf32>,
    %c0_i32_9 = arith.constant 0 : i32
    %10 = arith.cmpi eq, %arg2, %c0_i32_9 : i32
    %11 = arith.extui %10 : i1 to i32
    %c0_i32_10 = arith.constant 0 : i32
    %12 = arith.cmpi ne, %11, %c0_i32_10 : i32
    scf.if %12 {
      %c0_11 = arith.constant 0 : index
      %c0_12 = arith.constant 0 : index
      %13 = vector.load %arg7[%c0_11, %c0_12] : memref<2x512xf32, #tpu.memory_space<vmem>>, vector<2x512xf32>
      %c0_13 = arith.constant 0 : index
      %c0_14 = arith.constant 0 : index
      %14 = vector.load %arg5[%c0_13, %c0_14] : memref<2x1xf32, #tpu.memory_space<vmem>>, vector<2x1xf32>
      %15 = vector.broadcast %14 : vector<2x1xf32> to vector<2x512xf32>
      %16 = arith.addf %13, %15 : vector<2x512xf32>
      %17 = arith.truncf %16 : vector<2x512xf32> to vector<2x512xbf16>
      %c0_15 = arith.constant 0 : index
      %c0_16 = arith.constant 0 : index
      %c0_17 = arith.constant 0 : index
      %18 = vector.load %arg6[%c0_15, %c0_16, %c0_17] : memref<1x2x512xbf16, #tpu.memory_space<vmem>>, vector<1x2x512xbf16>
      %19 = vector.shape_cast %18 : vector<1x2x512xbf16> to vector<2x512xbf16>
      %20 = vector.shape_cast %17 : vector<2x512xbf16> to vector<1x2x512xbf16>
      tpu.vector_store %arg6[%c0_15, %c0_16, %c0_17], %20 {strides = array<i32>} : memref<1x2x512xbf16, #tpu.memory_space<vmem>>, vector<1x2x512xbf16>,
    } else {
    }
    return
  }
  func.func @transform_0(%arg0: i32, %arg1: i32, %arg2: i32) -> (i32, i32) {
    %c0_i32 = arith.constant 0 : i32
    %c0_i32_0 = arith.constant 0 : i32
    return %c0_i32, %arg2 : i32, i32
  }
  func.func @transform_1(%arg0: i32, %arg1: i32, %arg2: i32) -> (i32, i32, i32) {
    %c0_i32 = arith.constant 0 : i32
    return %arg0, %arg2, %arg1 : i32, i32, i32
  }
  func.func @transform_2(%arg0: i32, %arg1: i32, %arg2: i32) -> (i32, i32) {
    %c0_i32 = arith.constant 0 : i32
    %c0_i32_0 = arith.constant 0 : i32
    %c0_i32_1 = arith.constant 0 : i32
    return %c0_i32, %c0_i32_0 : i32, i32
  }
  func.func @transform_3(%arg0: i32, %arg1: i32, %arg2: i32) -> (i32, i32, i32) {
    %c0_i32 = arith.constant 0 : i32
    %c0_i32_0 = arith.constant 0 : i32
    return %arg0, %c0_i32, %arg1 : i32, i32, i32
  }
}

module attributes {stable_mosaic.version = 11 : i64} {
  func.func @_conv_gemm_kernel(%arg0: i32, %arg1: i32, %arg2: i32, %arg3: memref<2x100xbf16, #tpu.memory_space<vmem>>, %arg4: memref<1x100x512xbf16, #tpu.memory_space<vmem>>, %arg5: memref<2x1xf32, #tpu.memory_space<vmem>>, %arg6: memref<1x2x512xbf16, #tpu.memory_space<vmem>>, %arg7: memref<1x2x512xbf16, #tpu.memory_space<vmem>>, %arg8: memref<2x512xf32, #tpu.memory_space<vmem>>) attributes {dimension_semantics = [#tpu.dimension_semantics<parallel>, #tpu.dimension_semantics<parallel>, #tpu.dimension_semantics<arbitrary>], iteration_bounds = array<i64: 2, 2, 1>, scalar_prefetch = 0 : i64, scratch_operands = 1 : i64, tpu.core_type = #tpu.core_type<tc>, window_params = [{transform_indices = @transform_0, window_bounds = array<i64: 2, 100>}, {transform_indices = @transform_1, window_bounds = array<i64: 1, 100, 512>}, {pipeline_mode = #tpu.pipeline_mode<synchronous>, transform_indices = @transform_2, window_bounds = array<i64: 2, 1>}, {transform_indices = @transform_3, window_bounds = array<i64: 1, 2, 512>}, {transform_indices = @transform_4, window_bounds = array<i64: 1, 2, 512>}]} {
    %c0_i32 = arith.constant 0 : i32
    %0 = arith.cmpi eq, %arg2, %c0_i32 : i32
    %1 = arith.extui %0 : i1 to i32
    %c0_i32_0 = arith.constant 0 : i32
    %2 = arith.cmpi ne, %1, %c0_i32_0 : i32
    scf.if %2 {
      %cst_11 = arith.constant 0.000000e+00 : f32
      %13 = vector.broadcast %cst_11 : f32 to vector<2x512xf32>
      %c0_12 = arith.constant 0 : index
      %c0_13 = arith.constant 0 : index
      %14 = vector.load %arg8[%c0_12, %c0_13] : memref<2x512xf32, #tpu.memory_space<vmem>>, vector<2x512xf32>
      tpu.vector_store %arg8[%c0_12, %c0_13], %13 {strides = array<i32>} : memref<2x512xf32, #tpu.memory_space<vmem>>, vector<2x512xf32>,
    } else {
    }
    %c0 = arith.constant 0 : index
    %c0_1 = arith.constant 0 : index
    %3 = vector.load %arg8[%c0, %c0_1] : memref<2x512xf32, #tpu.memory_space<vmem>>, vector<2x512xf32>
    %c0_2 = arith.constant 0 : index
    %c0_3 = arith.constant 0 : index
    %4 = vector.load %arg3[%c0_2, %c0_3] : memref<2x100xbf16, #tpu.memory_space<vmem>>, vector<2x100xbf16>
    %c0_4 = arith.constant 0 : index
    %c0_5 = arith.constant 0 : index
    %c0_6 = arith.constant 0 : index
    %5 = vector.load %arg4[%c0_4, %c0_5, %c0_6] : memref<1x100x512xbf16, #tpu.memory_space<vmem>>, vector<1x100x512xbf16>
    %6 = vector.shape_cast %5 : vector<1x100x512xbf16> to vector<100x512xbf16>
    %cst = arith.constant dense<0.000000e+00> : vector<2x512xf32>
    %7 = tpu.matmul %4, %6, %cst {dimension_numbers = #tpu.dot_dimension_numbers<[1], [0], [0], [1], [0, 0, 1, 1], [], []>} : vector<2x100xbf16>, vector<100x512xbf16>, vector<2x512xf32> -> vector<2x512xf32>
    %8 = arith.addf %3, %7 : vector<2x512xf32>
    %c0_7 = arith.constant 0 : index
    %c0_8 = arith.constant 0 : index
    %9 = vector.load %arg8[%c0_7, %c0_8] : memref<2x512xf32, #tpu.memory_space<vmem>>, vector<2x512xf32>
    tpu.vector_store %arg8[%c0_7, %c0_8], %8 {strides = array<i32>} : memref<2x512xf32, #tpu.memory_space<vmem>>, vector<2x512xf32>,
    %c0_i32_9 = arith.constant 0 : i32
    %10 = arith.cmpi eq, %arg2, %c0_i32_9 : i32
    %11 = arith.extui %10 : i1 to i32
    %c0_i32_10 = arith.constant 0 : i32
    %12 = arith.cmpi ne, %11, %c0_i32_10 : i32
    scf.if %12 {
      %c0_11 = arith.constant 0 : index
      %c0_12 = arith.constant 0 : index
      %13 = vector.load %arg8[%c0_11, %c0_12] : memref<2x512xf32, #tpu.memory_space<vmem>>, vector<2x512xf32>
      %c0_13 = arith.constant 0 : index
      %c0_14 = arith.constant 0 : index
      %14 = vector.load %arg5[%c0_13, %c0_14] : memref<2x1xf32, #tpu.memory_space<vmem>>, vector<2x1xf32>
      %15 = vector.broadcast %14 : vector<2x1xf32> to vector<2x512xf32>
      %16 = arith.addf %13, %15 : vector<2x512xf32>
      %c0_15 = arith.constant 0 : index
      %c0_16 = arith.constant 0 : index
      %c0_17 = arith.constant 0 : index
      %17 = vector.load %arg6[%c0_15, %c0_16, %c0_17] : memref<1x2x512xbf16, #tpu.memory_space<vmem>>, vector<1x2x512xbf16>
      %18 = vector.shape_cast %17 : vector<1x2x512xbf16> to vector<2x512xbf16>
      %19 = arith.extf %18 : vector<2x512xbf16> to vector<2x512xf32>
      %20 = arith.addf %16, %19 : vector<2x512xf32>
      %cst_18 = arith.constant 0.000000e+00 : f32
      %21 = vector.broadcast %cst_18 : f32 to vector<2x512xf32>
      %22 = arith.maximumf %20, %21 : vector<2x512xf32>
      %23 = arith.truncf %22 : vector<2x512xf32> to vector<2x512xbf16>
      %c0_19 = arith.constant 0 : index
      %c0_20 = arith.constant 0 : index
      %c0_21 = arith.constant 0 : index
      %24 = vector.load %arg7[%c0_19, %c0_20, %c0_21] : memref<1x2x512xbf16, #tpu.memory_space<vmem>>, vector<1x2x512xbf16>
      %25 = vector.shape_cast %24 : vector<1x2x512xbf16> to vector<2x512xbf16>
      %26 = vector.shape_cast %23 : vector<2x512xbf16> to vector<1x2x512xbf16>
      tpu.vector_store %arg7[%c0_19, %c0_20, %c0_21], %26 {strides = array<i32>} : memref<1x2x512xbf16, #tpu.memory_space<vmem>>, vector<1x2x512xbf16>,
    } else {
    }
    return
  }
  func.func @transform_0(%arg0: i32, %arg1: i32, %arg2: i32) -> (i32, i32) {
    %c0_i32 = arith.constant 0 : i32
    %c0_i32_0 = arith.constant 0 : i32
    return %c0_i32, %arg2 : i32, i32
  }
  func.func @transform_1(%arg0: i32, %arg1: i32, %arg2: i32) -> (i32, i32, i32) {
    %c0_i32 = arith.constant 0 : i32
    return %arg0, %arg2, %arg1 : i32, i32, i32
  }
  func.func @transform_2(%arg0: i32, %arg1: i32, %arg2: i32) -> (i32, i32) {
    %c0_i32 = arith.constant 0 : i32
    %c0_i32_0 = arith.constant 0 : i32
    %c0_i32_1 = arith.constant 0 : i32
    return %c0_i32, %c0_i32_0 : i32, i32
  }
  func.func @transform_3(%arg0: i32, %arg1: i32, %arg2: i32) -> (i32, i32, i32) {
    %c0_i32 = arith.constant 0 : i32
    %c0_i32_0 = arith.constant 0 : i32
    return %arg0, %c0_i32, %arg1 : i32, i32, i32
  }
  func.func @transform_4(%arg0: i32, %arg1: i32, %arg2: i32) -> (i32, i32, i32) {
    %c0_i32 = arith.constant 0 : i32
    %c0_i32_0 = arith.constant 0 : i32
    return %arg0, %c0_i32, %arg1 : i32, i32, i32
  }
}

</mosaic_0001>

<bundles_post_ra>
// kernel: d_forward.17
= control target key start
LH: loop header
LB: loop body
LE: loop exit
PB: predicated region body
PF: predicated region fallthrough
CT: control target
= control target key end

     0   :  { %8 = vsyncpa [#allocation4], 0  ;;  %s713_s12 = smov 0   ;;  %s715_s13 = smov 0   ;;  %s815_s0 = inlined_call_operand.hbm [shape: bf16[32,64], index: 0, kind: input, shape index: {}]   ;;  %s816_s1 = inlined_call_operand.vmem [shape: bf16[2,64,4], index: 1, kind: input, shape index: {}]   ;;  %s817_s2 = inlined_call_operand.vmem [shape: f32[32,1], index: 2, kind: input, shape index: {}]   ;;  %s818_s3 = inlined_call_operand.vmem [shape: bf16[2,32,4], index: 3, kind: output, shape index: {}]  }
   0x1   :  { %s717_s14 = smov 0  }
   0x2 LB: > { %s536_s15 = sadd.s32 4294967295, %s686_s14   ;;  %s33_s16 = sadd.s32 1, %s682_s13  ;;  %s686_s14 = sphi %s717_s14, %s14_s14   ;;  %s682_s13 = sphi %s715_s13, %s828_s13   ;;  %s678_s12 = sphi %s713_s12, %s827_s12  }
   0x3   : > { %p35_p0 = scmp.ge.s32.totalorder %s33_s16, 2  ;;  %p538_p1 = scmp.ge.s32.totalorder %s686_s14, 1 }
   0x4   : > { %p143_p2 = scmp.lt.s32.totalorder %s686_s14, 3  ;;  %p738_p4 = scmp.eq.s32.totalorder %s536_s15, 0 }
   0x5   : > { %s830_s16 = smov (%p35_p0, %s33_s16), 0  ;;  %s688_s19 = smov [#allocation3]  }
   0x6   : > { %p734_p3 = pnand %p538_p1, %p143_p2  ;;  %s157_s20 = sshll.u32 %s688_s19, 4  ;;  %s158_s20 = int_to_ptr.vmem [resolvable:$true] %s157_s20 }
   0x7   : > { %s823_s18 = scalar_select %p738_p4, 1, 0 }
   0x8   : > { %s822_s17 = scalar_select %p734_p3, 1, 0 }
   0x9   : > { %p589_p5 = pneg %p734_p3  ;;  %s632_s24 = scalar_lea.hbm %s815_s0, 256 }
   0xa   : > { %p633_p7 = scmp.ne.s32.totalorder %s815_s0, %s632_s24  ;;  %p639_p11 = scmp.lt.u32.totalorder %s632_s24, %s815_s0 }
   0xb   : > { %p746_p6 = pnand %p738_p4, %p589_p5 }
   0xd   : > { %p634_p8 = pneg %p746_p6 }
   0xf   : > { %p635_p9 = pnand %p634_p8, %p633_p7 }
  0x11   : > { %p636_p10 = pneg %p635_p9 }
  0x13   : > { %p641_p12 = pnand %p639_p11, %p636_p10 }
  0x15   : > { %644 = shalt.err (!%p641_p12)
}
  0x16   : > { %s645_s29 = scalar_lea.vmem %s158_s20, 256  ;;  %p653_p2 = scmp.lt.s32.totalorder %s158_s20, %s158_s20 }
  0x17   : > { %p646_p13 = scmp.ne.s32.totalorder %s158_s20, %s645_s29  ;;  %p654_p5 = scmp.lt.s32.totalorder %s645_s29, %s645_s29 }
  0x19   : > { %p648_p0 = pnand %p646_p13, %p634_p8  ;;  %p655_p4 = por %p654_p5, %p653_p2 }
  0x1b   : > { %p649_p1 = pneg %p648_p0 }
  0x1d   : > { %p656_p3 = pnand %p655_p4, %p649_p1 }
  0x1f   : > { %659 = shalt.err (!%p656_p3)
}
  0x20   : > { %s689_s30 = smov 64   ;;  %s690_s4 = smov 4  }
  0x21   : > { %592 = dma.hbm_to_vmem [thread:$0]  (!%p746_p6), %s815_s0, 256, %s158_s20, [#allocation4], %s689_s30, %s689_s30, %s690_s4  }
  0x22   : > { %p825_p7 = scmp.ne.s32.totalorder %s822_s17, 0 }
  0x23   : > { %p826_p9 = scmp.ne.s32.totalorder (!%p825_p7), %s823_s18, 0 }
  0x24   : > { %192 = sbr.rel (%p825_p7) target bundleno = 298 (0x12a), region = 32 }
  0x2b   : > { %673 = dma.done.wait (%p826_p9), [#allocation4], 256  }
  0x2c   : > { %675 = vsyncadd (%p826_p9), [#allocation4], 4294967040  ;;  %p227_p3 = scmp.lt.s32.totalorder %s678_s12, 1  ;;  %vm252_vm0 = vcmask 31744   ;;  %v691_v0 = vmov 0   ;;  %v692_v1 = vmov 0.0  }
  0x2d   : > { %625 = vset.pattern.permute.xlu1 %v691_v0  ;;  %624 = vset.pattern.permute.xlu0 %v691_v0  ;;  %255 = vst.msk [vmem:[#allocation2 + $0x10] sm:$0xff] %vm252_vm0, %v692_v1  ;;  %253 = vst.msk [vmem:[#allocation2] sm:$0xff] %vm252_vm0, %v692_v1  ;;  %vm307_vm1 = vcmask 523264   ;;  %v630_v5 = vld [vmem:[#allocation3] sm:$0xff]   ;;  %v381_v6 = vld [vmem:[%s817_s2 + $0x10] sm:$0xff]  ;;  %vm427_vm2 = vcmask 27648  }
  0x2e   : > { %s832_s12 = smov (!%p227_p3, %s678_s12), 1  ;;  %254 = vst.msk [vmem:[#allocation2 + $0x8] sm:$0xff] %vm252_vm0, %v692_v1  ;;  %256 = vst.msk [vmem:[#allocation2 + $0x18] sm:$0xff] %vm252_vm0, %v692_v1  ;;  %581 = vmatprep.mubr.msk.bf16.mxu0 %vm307_vm1, %v630_v5  ;;  %v379_v7 = vld [vmem:[%s817_s2] sm:$0xff]  ;;  %395 = vperm.xlu1 %625, %v381_v6   ;;  %v382_v9 = vld [vmem:[%s817_s2 + $0x18] sm:$0xff] }
  0x2f   : > { %s561_s7 = sshll.u32 %s832_s12, 5  ;;  %385 = vperm.xlu0 %624, %v379_v7   ;;  %v380_v10 = vld [vmem:[%s817_s2 + $0x8] sm:$0xff]  ;;  %s562_s23 = sshll.u32 %s832_s12, 4 }
  0x30   : > { %s237_s10 = scalar_lea.vmem %s816_s1, %s561_s7  ;;  %v631_v11 = vld [vmem:[#allocation3 + $0x8] sm:$0xff]   ;;  %s246_s26 = scalar_lea.vmem %s818_s3, %s562_s23 }
  0x31   : > { %v626_v2 = vld [vmem:[%s237_s10] sm:$0xff]   ;;  %v627_v3 = vld [vmem:[%s237_s10 + $0x8] sm:$0xff]   ;;  %v628_v4 = vld [vmem:[%s237_s10 + $0x10] sm:$0xff]  }
  0x32   : > { %573 = vmatprep.subr.bf16.mxu0 %v626_v2  ;;  %v629_v8 = vld [vmem:[%s237_s10 + $0x18] sm:$0xff]   ;;  %400 = vperm.xlu1 %625, %v382_v9  }
  0x33   : > { %574 = vmatpush3.bf16.msra.mxu0 %v626_v2  ;;  %390 = vperm.xlu0 %624, %v380_v10  }
  0x34   : > { %575 = vmatprep.subr.bf16.mxu0 %v627_v3  ;;  %v259_v12 = vld [vmem:[#allocation2 + $0x10] sm:$0xff]  ;;  %v257_v13 = vld [vmem:[#allocation2] sm:$0xff] }
  0x35   : > { %v260_v15 = vld [vmem:[#allocation2 + $0x18] sm:$0xff]  ;;  %v258_v18 = vld [vmem:[#allocation2 + $0x8] sm:$0xff] }
  0x37   : > { %576 = vmatpush3.bf16.msra.mxu0 %v627_v3 }
  0x38   : > { %577 = vmatprep.subr.bf16.mxu0 %v628_v4 }
  0x3b   : > { %578 = vmatpush3.bf16.msra.mxu0 %v628_v4 }
  0x3c   : > { %579 = vmatprep.subr.bf16.mxu0 %v629_v8 }
  0x3f   : > { %580 = vmatpush3.bf16.msra.mxu0 %v629_v8 }
  0x42   : > { %582 = vmatmul.mubr.msk.bf16.vlgmr.msra.gmra.mrb[0].mxu0 %vm307_vm1, %v631_v11 }
  0xad   : > { %v396_v24 = vpop.permute.xlu1 %395 }
  0xae   : > { %v386_v25 = vpop.permute.xlu0 %385 }
  0xb1   : > { %v401_v30 = vpop.permute.xlu1 %400 }
  0xb2   : > { %v391_v34 = vpop.permute.xlu0 %390 }
 0x115   : > { %v583_v14 = vpop.f32.mrb[0].mxu0 }
 0x116   : > { %v365_v16 = vadd.f32 %v583_v14, %v259_v12  ;;  %v348_v17 = vpop.f32.mrb[1].mxu0 }
 0x117   : > { %v363_v19 = vadd.f32 %v348_v17, %v257_v13  ;;  %v584_v20 = vpop.f32.mrb[2].mxu0 }
 0x118   : > { %370 = vst.msk [vmem:[#allocation2 + $0x10] sm:$0xff] %vm252_vm0, %v365_v16  ;;  %v366_v21 = vadd.f32 %v584_v20, %v260_v15  ;;  %v351_v22 = vpop.f32.mrb[3].mxu0 }
 0x119   : > { %368 = vst.msk [vmem:[#allocation2] sm:$0xff] %vm252_vm0, %v363_v19  ;;  %v364_v23 = vadd.f32 %v351_v22, %v258_v18 }
 0x11a   : > { %371 = vst.msk [vmem:[#allocation2 + $0x18] sm:$0xff] %vm252_vm0, %v366_v21 }
 0x11b   : > { %369 = vst.msk [vmem:[#allocation2 + $0x8] sm:$0xff] %vm252_vm0, %v364_v23 }
 0x11f   : > { %v377_v26 = vld [vmem:[#allocation2 + $0x10] sm:$0xff] }
 0x120   : > { %v405_v27 = vadd.f32 %v396_v24, %v377_v26  ;;  %v375_v28 = vld [vmem:[#allocation2] sm:$0xff] }
 0x121   : > { %v403_v29 = vadd.f32 %v386_v25, %v375_v28  ;;  %v378_v31 = vld [vmem:[#allocation2 + $0x18] sm:$0xff] }
 0x122   : > { %v409_v32 = vmax.f32 %v405_v27, 0.0  ;;  %v406_v33 = vadd.f32 %v401_v30, %v378_v31  ;;  %v376_v35 = vld [vmem:[#allocation2 + $0x8] sm:$0xff] }
 0x123   : > { %v407_v36 = vmax.f32 %v403_v29, 0.0  ;;  %v404_v37 = vadd.f32 %v391_v34, %v376_v35 }
 0x124   : > { %v565_v38 = vpack.c.bf16 %v409_v32, %v409_v32  ;;  %v410_v39 = vmax.f32 %v406_v33, 0.0 }
 0x125   : > { %v563_v40 = vpack.c.bf16 %v407_v36, %v407_v36  ;;  %v408_v41 = vmax.f32 %v404_v37, 0.0 }
 0x126   : > { %430 = vst.msk [vmem:[%s246_s26 + $0x8] sm:$0xf] %vm427_vm2, %v565_v38  ;;  %v566_v42 = vpack.c.bf16 %v410_v39, %v410_v39 }
 0x127   : > { %428 = vst.msk [vmem:[%s246_s26] sm:$0xf] %vm427_vm2, %v563_v40  ;;  %v564_v43 = vpack.c.bf16 %v408_v41, %v408_v41 }
 0x128   : > { %431 = vst.msk [vmem:[%s246_s26 + $0xc] sm:$0xf] %vm427_vm2, %v566_v42 }
 0x129   : > { %429 = vst.msk [vmem:[%s246_s26 + $0x4] sm:$0xf] %vm427_vm2, %v564_v43 }
 0x12a PF: > { %s14_s14 = sadd.s32 1, %s686_s14   ;;  %s827_s12 = smov %s682_s13 }
 0x12b   : > { %p11_p4 = scmp.ge.s32.totalorder %s14_s14, 4   ;;  %s828_s13 = smov %s830_s16 }
 0x12d   :  { %13 = sbr.rel (!%p11_p4) target bundleno = 2 (0x2), region = 76 }
 0x134   :  { %459 = vsyncpa [#allocation4], 1 }
 0x135   :  { %461 = vsyncpa [#allocation4 + $0x1], 1 }

// kernel: d_forward.18
= control target key start
LH: loop header
LB: loop body
LE: loop exit
PB: predicated region body
PF: predicated region fallthrough
CT: control target
= control target key end

     0   :  { %8 = vsyncpa [#allocation3], 0  ;;  %s614_s0 = inlined_call_operand.hbm [shape: bf16[4,2], index: 0, kind: input, shape index: {}]   ;;  %s615_s1 = inlined_call_operand.vmem [shape: bf16[64,2,2], index: 1, kind: input, shape index: {}]   ;;  %s616_s2 = inlined_call_operand.hbm [shape: bf16[2,4], index: 2, kind: input, shape index: {}]   ;;  %s617_s3 = inlined_call_operand.vmem [shape: bf16[64,4,4], index: 3, kind: output, shape index: {}]  }
   0x1   :  { %9 = vsyncpa [#allocation5], 0  ;;  %s520_s12 = smov 0  }
   0x2 LB: > { %s526_s13 = sadd.s32 4294967295, %s494_s12   ;;  %p365_p0 = scmp.ge.s32.totalorder %s494_s12, 1  ;;  %s494_s12 = sphi %s520_s12, %s15_s12  }
   0x3   : > { %p114_p1 = scmp.lt.s32.totalorder %s494_s12, 65  ;;  %p618_p2 = scmp.eq.s32.totalorder %s526_s13, 0 }
   0x4   : > { %s496_s15 = smov [#allocation2]   ;;  %s497_s17 = smov [#allocation4]  }
   0x5   : > { %p531_p3 = pnand %p365_p0, %p114_p1  ;;  %s127_s16 = sshll.u32 %s496_s15, 4  ;;  %s128_s16 = int_to_ptr.vmem [resolvable:$true] %s127_s16 }
   0x6   : > { %s138_s18 = sshll.u32 %s497_s17, 4  ;;  %s424_s22 = scalar_lea.hbm %s614_s0, 32  ;;  %s543_s18 = int_to_ptr.vmem [resolvable:$true] %s138_s18 }
   0x7   : > { %s620_s14 = scalar_select %p531_p3, 1, 0 }
   0x8   : > { %p401_p4 = pneg %p531_p3  ;;  %p425_p6 = scmp.ne.s32.totalorder %s614_s0, %s424_s22 }
   0x9   : > { %p431_p10 = scmp.lt.u32.totalorder %s424_s22, %s614_s0 }
   0xa   : > { %p539_p5 = pnand %p618_p2, %p401_p4 }
   0xc   : > { %p426_p7 = pneg %p539_p5 }
   0xe   : > { %p427_p8 = pnand %p426_p7, %p425_p6 }
  0x10   : > { %p428_p9 = pneg %p427_p8 }
  0x12   : > { %p433_p11 = pnand %p431_p10, %p428_p9 }
  0x14   : > { %436 = shalt.err (!%p433_p11)
}
  0x15   : > { %s437_s27 = scalar_lea.vmem %s128_s16, 32  ;;  %p445_p1 = scmp.lt.s32.totalorder %s128_s16, %s128_s16 }
  0x16   : > { %p438_p12 = scmp.ne.s32.totalorder %s128_s16, %s437_s27  ;;  %p446_p4 = scmp.lt.s32.totalorder %s437_s27, %s437_s27 }
  0x18   : > { %p440_p13 = pnand %p438_p12, %p426_p7  ;;  %p447_p2 = por %p446_p4, %p445_p1 }
  0x1a   : > { %p441_p0 = pneg %p440_p13 }
  0x1c   : > { %p448_p3 = pnand %p447_p2, %p441_p0 }
  0x1e   : > { %451 = shalt.err (!%p448_p3)
}
  0x1f   : > { %404 = dma.hbm_to_vmem [thread:$0]  (!%p539_p5), %s614_s0, 32, %s128_s16, [#allocation3]  }
  0x20   : > { %s452_s5 = scalar_lea.hbm %s616_s2, 16 }
  0x21   : > { %p453_p6 = scmp.ne.s32.totalorder %s616_s2, %s452_s5  ;;  %p459_p3 = scmp.lt.u32.totalorder %s452_s5, %s616_s2 }
  0x23   : > { %p455_p8 = pnand %p453_p6, %p426_p7 }
  0x25   : > { %p456_p2 = pneg %p455_p8 }
  0x27   : > { %p461_p9 = pnand %p459_p3, %p456_p2 }
  0x29   : > { %464 = shalt.err (!%p461_p9)
}
  0x2a   : > { %s465_s10 = scalar_lea.vmem %s543_s18, 16  ;;  %s472_s11 = scalar_lea.vmem %s543_s18, 32 }
  0x2b   : > { %p466_p10 = scmp.ne.s32.totalorder %s543_s18, %s465_s10  ;;  %p473_p13 = scmp.lt.s32.totalorder %s543_s18, %s543_s18 }
  0x2c   : > { %p474_p0 = scmp.lt.s32.totalorder %s472_s11, %s465_s10 }
  0x2d   : > { %p468_p11 = pnand %p466_p10, %p426_p7 }
  0x2e   : > { %p475_p1 = por %p474_p0, %p473_p13 }
  0x2f   : > { %p469_p12 = pneg %p468_p11 }
  0x31   : > { %p476_p4 = pnand %p475_p1, %p469_p12 }
  0x33   : > { %479 = shalt.err (!%p476_p4)
}
  0x34   : > { %407 = dma.hbm_to_vmem [thread:$0]  (!%p539_p5), %s616_s2, 16, %s543_s18, [#allocation5]  }
  0x35   : > { %p622_p6 = scmp.ne.s32.totalorder %s620_s14, 0 }
  0x36   : > { %p623_p7 = scmp.eq.s32.totalorder (!%p622_p6), %s526_s13, 0 }
  0x37   : > { %157 = sbr.rel (%p622_p6) target bundleno = 504 (0x1f8), region = 32 }
  0x3e   : > { %485 = dma.done.wait (%p623_p7), [#allocation3], 32   ;;  %p624_p8 = pmov %p623_p7 }
  0x3f   : > { %p625_p2 = pmov %p623_p7 }
  0x40   : > { %487 = vsyncadd (%p624_p8), [#allocation3], 4294967264 }
  0x41   : > { %489 = dma.done.wait (%p625_p2), [#allocation5], 16   ;;  %p626_p3 = pmov %p625_p2 }
  0x42   : > { %p182_p9 = scmp.lt.s32.totalorder %s526_s13, 63  ;;  %v498_v0 = vmov 0.0   ;;  %vm499_vm0 = vmmov 0   ;;  %vm196_vm1 = vcmask 1040384   ;;  %v190_v3 = vld [vmem:[#allocation2] sm:$0x3] }
  0x43   : > { %491 = vsyncadd (%p626_p3), [#allocation5], 4294967280  ;;  %381 = vmatprep.subr.bf16.mxu0 %v498_v0  ;;  %383 = vmatprep.mubr.msk.bf16.mxu0 %vm499_vm0, %v498_v0  ;;  %vm192_vm2 = vcmask 15360   ;;  %v241_v4 = vld [vmem:[#allocation4] sm:$0x1]  ;;  %vm289_vm3 = vcmask 25600  }
  0x44   : > { %s628_s13 = smov (!%p182_p9, %s526_s13), 63  ;;  %387 = vmatprep.subr.bf16.mxu1 %v498_v0  ;;  %389 = vmatprep.mubr.msk.bf16.mxu1 %vm499_vm0, %v498_v0  ;;  %v246_v5 = vsel %vm196_vm1, %v241_v4, 0 }
  0x45   : > { %s184_s18 = scalar_lea.vmem %s615_s1, %s628_s13  ;;  %388 = vmatpush3.bf16.msra.mxu1 %v246_v5  ;;  %s372_s19 = sshll.u32 %s628_s13, 1 }
  0x46   : > { %v191_v1 = vld [vmem:[%s184_s18] sm:$0x1]  ;;  %s188_s22 = scalar_lea.vmem %s617_s3, %s372_s19 }
  0x47   : > { %v198_v2 = vsel %vm196_vm1, %v191_v1, 0 }
  0x48   : > { %382 = vmatpush3.bf16.msra.mxu0 %v198_v2 }
  0x4b   : > { %384 = vmatmul.mubr.msk.bf16.vlgmr.msra.gmra.mrb[0].mxu0 %vm192_vm2, %v190_v3 }
 0x11e   : > { %v234_v6 = vpop.f32.mrb[0].mxu0 }
 0x11f   : > { %v240_v7 = vpack.c.bf16 %v234_v6, %v234_v6  ;;  %v385_v8 = vpop.f32.mrb[1].mxu0 }
 0x120   : > { %v237_v9 = vpop.f32.mrb[2].mxu0 }
 0x121   : > { %v386_v10 = vpop.f32.mrb[3].mxu0  ;;  %390 = vmatmul.mubr.msk.bf16.vlgmr.msra.gmra.mrb[0].mxu1 %vm192_vm2, %v240_v7 }
 0x1f4   : > { %v282_v11 = vpop.f32.mrb[0].mxu1 }
 0x1f5   : > { %v288_v12 = vpack.c.bf16 %v282_v11, %v282_v11  ;;  %v391_v13 = vpop.f32.mrb[1].mxu1 }
 0x1f6   : > { %v285_v14 = vpop.f32.mrb[2].mxu1 }
 0x1f7   : > { %290 = vst.msk [vmem:[%s188_s22] sm:$0x3] %vm289_vm3, %v288_v12  ;;  %v392_v15 = vpop.f32.mrb[3].mxu1 }
 0x1f8 PF: > { %s15_s12 = sadd.s32 1, %s494_s12  }
 0x1f9   : > { %p12_p5 = scmp.ge.s32.totalorder %s15_s12, 66  }
 0x1fb   :  { %14 = sbr.rel (!%p12_p5) target bundleno = 2 (0x2), region = 71 }
 0x202   :  { %310 = vsyncpa [#allocation3], 1 }
 0x203   :  { %312 = vsyncpa [#allocation3 + $0x1], 1 }
 0x204   :  { %313 = vsyncpa [#allocation5], 1 }

// kernel: d_forward.19
= control target key start
LH: loop header
LB: loop body
LE: loop exit
PB: predicated region body
PF: predicated region fallthrough
CT: control target
= control target key end

     0   :  { %s1071_s12 = smov 0   ;;  %s1073_s13 = smov 0   ;;  %s1213_s0 = inlined_call_operand.vmem [shape: bf16[16,1024], index: 0, kind: input, shape index: {}]   ;;  %s1214_s1 = inlined_call_operand.vmem [shape: bf16[2,1024,16], index: 1, kind: input, shape index: {}]   ;;  %s1215_s2 = inlined_call_operand.vmem [shape: f32[16,1], index: 2, kind: input, shape index: {}]   ;;  %s1216_s3 = inlined_call_operand.vmem [shape: bf16[2,16,16], index: 3, kind: output, shape index: {}]  }
   0x1   :  { %s1075_s14 = smov 0   ;;  %s1077_s15 = smov 0  }
   0x2   :  { %s1079_s16 = smov 0   ;;  %s1081_s17 = smov 0  }
   0x3   :  { %s1083_s18 = smov 0  }
   0x4 LB: > { %s25_s19 = sadd.s32 1, %s1039_s16  ;;  %s32_s20 = sadd.s32 1, %s1043_s17  ;;  %s1047_s18 = sphi %s1083_s18, %s13_s18   ;;  %s1043_s17 = sphi %s1081_s17, %s1222_s17   ;;  %s1039_s16 = sphi %s1079_s16, %s1221_s16   ;;  %s1035_s15 = sphi %s1077_s15, %s1220_s15   ;;  %s1031_s14 = sphi %s1075_s14, %s1219_s14   ;;  %s1027_s13 = sphi %s1073_s13, %s1218_s13   ;;  %s1023_s12 = sphi %s1071_s12, %s1217_s12  }
   0x5   : > { %p26_p0 = scmp.ge.s32.totalorder %s25_s19, 2  ;;  %s39_s21 = sadd.s32 1, %s1027_s13 }
   0x6   : > { %p46_p1 = scmp.ne.s32.totalorder %s1027_s13, %s1023_s12  ;;  %p47_p2 = scmp.eq.s32.totalorder %s1047_s18, 0 }
   0x7   : > { %s1224_s19 = smov (%p26_p0, %s25_s19), 0  ;;  %s1226_s20 = smov (!%p26_p0, %s32_s20), %s1043_s17 }
   0x8   : > { %s36_s22 = ssub.s32 %s1039_s16, %s1224_s19  ;;  %p48_p3 = por %p47_p2, %p46_p1 }
   0x9   : > { %p34_p4 = scmp.ge.s32.totalorder %s1226_s20, 2  ;;  %p37_p5 = scmp.eq.s32.totalorder %s36_s22, 0 }
   0xa   : > { %p795_p6 = scmp.ge.s32.totalorder %s1047_s18, 4 }
   0xb   : > { %s1228_s20 = smov (%p34_p4, %s1226_s20), 0 }
   0xc   : > { %s1120_s23 = scalar_select %p37_p5, %s1027_s13, %s39_s21  }
   0xd   : > { %154 = sbr.rel (%p795_p6) target bundleno = 27 (0x1b), region = 20 }
  0x14   : > { %157 = sbr.rel (!%p48_p3) target bundleno = 27 (0x1b), region = 24  ;;  %s159_s24 = sand.u32 (%p48_p3), 1, %s1027_s13  }
  0x15   : > { %s848_s25 = sshll.u32 (%p48_p3), %s1039_s16, 4  ;;  %s796_s26 = sshll.u32 (%p48_p3), %s159_s24, 5 }
  0x16   : > { %s164_s29 = scalar_lea.vmem (%p48_p3), %s1213_s0, %s848_s25  ;;  %s161_s30 = scalar_lea.vmem (%p48_p3), [#allocation3], %s796_s26 }
  0x17   : > { %v177_v0 = vld [vmem:[%s164_s29] sm:$0xff] (%p48_p3)  ;;  %v179_v1 = vld [vmem:[%s164_s29 + $0x8] sm:$0xff] (%p48_p3) }
  0x18   : > { %v181_v2 = vld [vmem:[%s164_s29 + $0x20] sm:$0xff] (%p48_p3)  ;;  %178 = vst [vmem:[%s161_s30] sm:$0xff] (%p48_p3), %v177_v0  ;;  %180 = vst [vmem:[%s161_s30 + $0x8] sm:$0xff] (%p48_p3), %v179_v1  ;;  %v183_v3 = vld [vmem:[%s164_s29 + $0x28] sm:$0xff] (%p48_p3) }
  0x19   : > { %182 = vst [vmem:[%s161_s30 + $0x10] sm:$0xff] (%p48_p3), %v181_v2  ;;  %184 = vst [vmem:[%s161_s30 + $0x18] sm:$0xff] (%p48_p3), %v183_v3 }
  0x1b PF: > { %p799_p7 = scmp.ge.s32.totalorder %s1047_s18, 1  ;;  %p205_p8 = scmp.lt.s32.totalorder %s1047_s18, 5 }
  0x1d   : > { %p206_p9 = pnand %p799_p7, %p205_p8 }
  0x1e   : > { %s212_s4 = sand.u32 (!%p206_p9), 1, %s1023_s12   ;;  %s801_s5 = sshll.u32 (!%p206_p9), %s1031_s14, 6 }
  0x1f   : > { %209 = sbr.rel (%p206_p9) target bundleno = 319 (0x13f), region = 51  ;;  %s800_s6 = sshll.u32 (!%p206_p9), %s212_s4, 5 }
  0x20   : > { %p252_p10 = scmp.lt.s32.totalorder (!%p206_p9), %s1035_s15, 1  ;;  %p254_p11 = scmp.lt.s32.totalorder (!%p206_p9), %s801_s5, 127 }
  0x21   : > { %s1144_s12 = scalar_lea.vmem (!%p206_p9), [#allocation3], %s800_s6  ;;  %p806_p12 = scmp.ne.s32.totalorder (!%p206_p9), %s1031_s14, 0 }
  0x26   : > { %s1230_s15 = smov (!%p252_p10, %s1035_s15), 1  ;;  %s1232_s5 = smov (!%p254_p11, %s801_s5), 127 }
  0x27   : > { %s802_s7 = sshll.u32 %s1230_s15, 7  ;;  %s849_s8 = sshll.u32 %s1230_s15, 3  ;;  %vm277_vm0 = vcmask (!%p806_p12), 130048   ;;  %v1049_v4 = vmov (!%p806_p12), 0.0  }
  0x28   : > { %s260_s9 = sadd.s32 %s802_s7, %s1232_s5  ;;  %s1137_s21 = scalar_lea.vmem %s1216_s3, %s849_s8  ;;  %278 = vst.msk [vmem:[#allocation2] sm:$0xff] (!%p806_p12), %vm277_vm0, %v1049_v4  ;;  %279 = vst.msk [vmem:[#allocation2 + $0x8] sm:$0xff] (!%p806_p12), %vm277_vm0, %v1049_v4 }
  0x29   : > { %s803_s22 = sshll.u32 %s260_s9, 2  ;;  %276 = sbr.rel (%p806_p12) target bundleno = 48 (0x30), region = 59 }
  0x2a   : > { %s1142_s26 = scalar_lea.vmem %s1214_s1, %s803_s22 }
  0x30 PF: > { %v954_v5 = vld [vmem:[%s1142_s26 + $0x40] sm:$0xff]   ;;  %v958_v9 = vld [vmem:[%s1142_s26 + $0x48] sm:$0xff]   ;;  %v962_v13 = vld [vmem:[%s1142_s26 + $0x50] sm:$0xff]   ;;  %vm646_vm1 = vcmask 130048   ;;  %p843_p13 = scmp.ne.s32.totalorder %s1031_s14, 1 }
  0x31   : > { %v955_v6 = vld [vmem:[%s1142_s26 + $0xc0] sm:$0xff]   ;;  %852 = vmatprep.subr.bf16.mxu0 %v954_v5  ;;  %v959_v10 = vld [vmem:[%s1142_s26 + $0xc8] sm:$0xff]   ;;  %v963_v14 = vld [vmem:[%s1142_s26 + $0xd0] sm:$0xff]   ;;  %v1050_v60 = vmov (!%p843_p13), 0   ;;  %vm679_vm2 = vcmask (!%p843_p13), 125952  }
  0x32   : > { %v956_v7 = vld [vmem:[%s1142_s26] sm:$0xff]   ;;  %874 = vmatprep.subr.bf16.mxu1 %v955_v6  ;;  %v960_v11 = vld [vmem:[%s1142_s26 + $0x8] sm:$0xff]   ;;  %v964_v15 = vld [vmem:[%s1142_s26 + $0x10] sm:$0xff]   ;;  %992 = vset.pattern.permute.xlu0 (!%p843_p13), %v1050_v60 }
  0x33   : > { %v957_v8 = vld [vmem:[%s1142_s26 + $0x80] sm:$0xff]   ;;  %853 = vmatpush3.bf16.msra.mxu0 %v956_v7  ;;  %v961_v12 = vld [vmem:[%s1142_s26 + $0x88] sm:$0xff]   ;;  %v965_v16 = vld [vmem:[%s1142_s26 + $0x90] sm:$0xff]  }
  0x34   : > { %875 = vmatpush3.bf16.msra.mxu1 %v957_v8  ;;  %854 = vmatprep.subr.bf16.mxu0 %v958_v9  ;;  %v966_v17 = vld [vmem:[%s1142_s26 + $0x58] sm:$0xff]   ;;  %v970_v21 = vld [vmem:[%s1142_s26 + $0x60] sm:$0xff]   ;;  %v974_v25 = vld [vmem:[%s1142_s26 + $0x68] sm:$0xff]  }
  0x35   : > { %876 = vmatprep.subr.bf16.mxu1 %v959_v10  ;;  %v967_v18 = vld [vmem:[%s1142_s26 + $0xd8] sm:$0xff]   ;;  %v971_v22 = vld [vmem:[%s1142_s26 + $0xe0] sm:$0xff]   ;;  %v975_v26 = vld [vmem:[%s1142_s26 + $0xe8] sm:$0xff]  }
  0x36   : > { %v968_v19 = vld [vmem:[%s1142_s26 + $0x18] sm:$0xff]   ;;  %v972_v23 = vld [vmem:[%s1142_s26 + $0x20] sm:$0xff]   ;;  %v976_v27 = vld [vmem:[%s1142_s26 + $0x28] sm:$0xff]  }
  0x37   : > { %855 = vmatpush3.bf16.msra.mxu0 %v960_v11  ;;  %v969_v20 = vld [vmem:[%s1142_s26 + $0x98] sm:$0xff]   ;;  %v973_v24 = vld [vmem:[%s1142_s26 + $0xa0] sm:$0xff]   ;;  %v977_v28 = vld [vmem:[%s1142_s26 + $0xa8] sm:$0xff]  }
  0x38   : > { %877 = vmatpush3.bf16.msra.mxu1 %v961_v12  ;;  %856 = vmatprep.subr.bf16.mxu0 %v962_v13  ;;  %v978_v29 = vld [vmem:[%s1142_s26 + $0x70] sm:$0xff]   ;;  %v982_v33 = vld [vmem:[%s1142_s26 + $0x78] sm:$0xff]   ;;  %v280_v50 = vld [vmem:[#allocation2] sm:$0xff] }
  0x39   : > { %878 = vmatprep.subr.bf16.mxu1 %v963_v14  ;;  %v979_v30 = vld [vmem:[%s1142_s26 + $0xf0] sm:$0xff]   ;;  %v983_v34 = vld [vmem:[%s1142_s26 + $0xf8] sm:$0xff]   ;;  %v281_v55 = vld [vmem:[#allocation2 + $0x8] sm:$0xff] }
  0x3a   : > { %v980_v31 = vld [vmem:[%s1142_s26 + $0x30] sm:$0xff]   ;;  %v984_v35 = vld [vmem:[%s1142_s26 + $0x38] sm:$0xff]   ;;  %v655_v59 = vld [vmem:[%s1215_s2] sm:$0xff] (!%p843_p13) }
  0x3b   : > { %857 = vmatpush3.bf16.msra.mxu0 %v964_v15  ;;  %v981_v32 = vld [vmem:[%s1142_s26 + $0xb0] sm:$0xff]   ;;  %v985_v36 = vld [vmem:[%s1142_s26 + $0xb8] sm:$0xff]   ;;  %659 = vperm.xlu0 (!%p843_p13), %992, %v655_v59   ;;  %v656_v61 = vld [vmem:[%s1215_s2 + $0x8] sm:$0xff] (!%p843_p13) }
  0x3c   : > { %879 = vmatpush3.bf16.msra.mxu1 %v965_v16  ;;  %858 = vmatprep.subr.bf16.mxu0 %v966_v17  ;;  %v986_v37 = vld [vmem:[%s1144_s12] ss:$16 sps:$4 sm:$0xff]   ;;  %v988_v38 = vld [vmem:[%s1144_s12 + $0x4] ss:$16 sps:$4 sm:$0xff]   ;;  %v989_v39 = vld [vmem:[%s1144_s12 + $0x8] ss:$16 sps:$4 sm:$0xff]  }
  0x3d   : > { %880 = vmatprep.subr.bf16.mxu1 %v967_v18  ;;  %v991_v40 = vld [vmem:[%s1144_s12 + $0xc] ss:$16 sps:$4 sm:$0xff]   ;;  %594 = vmatprep.mubr.bf16.mxu0 %v988_v38 }
  0x3e   : > { %635 = vmatprep.mubr.bf16.mxu1 %v991_v40 }
  0x3f   : > { %859 = vmatpush3.bf16.msra.mxu0 %v968_v19  ;;  %664 = vperm.xlu0 (!%p843_p13), %992, %v656_v61  }
  0x40   : > { %881 = vmatpush3.bf16.msra.mxu1 %v969_v20  ;;  %860 = vmatprep.subr.bf16.mxu0 %v970_v21 }
  0x41   : > { %882 = vmatprep.subr.bf16.mxu1 %v971_v22 }
  0x43   : > { %861 = vmatpush3.bf16.msra.mxu0 %v972_v23 }
  0x44   : > { %883 = vmatpush3.bf16.msra.mxu1 %v973_v24  ;;  %862 = vmatprep.subr.bf16.mxu0 %v974_v25 }
  0x45   : > { %884 = vmatprep.subr.bf16.mxu1 %v975_v26 }
  0x47   : > { %863 = vmatpush3.bf16.msra.mxu0 %v976_v27 }
  0x48   : > { %885 = vmatpush3.bf16.msra.mxu1 %v977_v28  ;;  %864 = vmatprep.subr.bf16.mxu0 %v978_v29 }
  0x49   : > { %886 = vmatprep.subr.bf16.mxu1 %v979_v30 }
  0x4b   : > { %865 = vmatpush3.bf16.msra.mxu0 %v980_v31 }
  0x4c   : > { %887 = vmatpush3.bf16.msra.mxu1 %v981_v32  ;;  %866 = vmatprep.subr.bf16.mxu0 %v982_v33 }
  0x4d   : > { %888 = vmatprep.subr.bf16.mxu1 %v983_v34 }
  0x4f   : > { %867 = vmatpush3.bf16.msra.mxu0 %v984_v35 }
  0x50   : > { %889 = vmatpush3.bf16.msra.mxu1 %v985_v36 }
  0x52   : > { %595 = vmatmul.mubr.bf16.vlgmr.msra.gmra.mrb[0].mxu0 %v986_v37 }
  0x53   : > { %636 = vmatmul.mubr.bf16.vlgmr.msra.gmra.mrb[0].mxu1 %v989_v39 }
  0xba   : > { %v660_v63 = vpop.permute.xlu0 (!%p843_p13), %659 }
  0xbe   : > { %v665_v3 = vpop.permute.xlu0 (!%p843_p13), %664 }
 0x125   : > { %v868_v41 = vpop.f32.mrb[0].mxu0 }
 0x126   : > { %v890_v42 = vpop.f32.mrb[0].mxu1  ;;  %v869_v43 = vpop.f32.mrb[1].mxu0 }
 0x127   : > { %v870_v44 = vadd.f32 %v869_v43, %v868_v41  ;;  %v891_v45 = vpop.f32.mrb[1].mxu1  ;;  %v871_v46 = vpop.f32.mrb[2].mxu0 }
 0x128   : > { %v892_v47 = vadd.f32 %v891_v45, %v890_v42  ;;  %v893_v48 = vpop.f32.mrb[2].mxu1  ;;  %v872_v49 = vpop.f32.mrb[3].mxu0 }
 0x129   : > { %v873_v51 = vadd.f32 %v872_v49, %v871_v46  ;;  %v894_v52 = vpop.f32.mrb[3].mxu1 }
 0x12a   : > { %v638_v53 = vadd.f32 %v892_v47, %v870_v44  ;;  %v895_v54 = vadd.f32 %v894_v52, %v893_v48  ;;  %652 = sbr.rel (%p843_p13) target bundleno = 319 (0x13f), region = 63 }
 0x12c   : > { %v644_v56 = vadd.f32 %v638_v53, %v280_v50  ;;  %v641_v57 = vadd.f32 %v895_v54, %v873_v51 }
 0x12e   : > { %647 = vst.msk [vmem:[#allocation2] sm:$0xff] %vm646_vm1, %v644_v56  ;;  %v645_v58 = vadd.f32 %v641_v57, %v281_v55 }
 0x130   : > { %648 = vst.msk [vmem:[#allocation2 + $0x8] sm:$0xff] %vm646_vm1, %v645_v58 }
 0x135   : > { %v653_v62 = vld [vmem:[#allocation2] sm:$0xff] }
 0x136   : > { %v667_v0 = vadd.f32 %v660_v63, %v653_v62 }
 0x137   : > { %v654_v1 = vld [vmem:[#allocation2 + $0x8] sm:$0xff] }
 0x138   : > { %v669_v2 = vmax.f32 %v667_v0, 0.0  ;;  %v668_v5 = vadd.f32 %v665_v3, %v654_v1 }
 0x13a   : > { %v850_v4 = vpack.c.bf16 %v669_v2, %v669_v2  ;;  %v670_v6 = vmax.f32 %v668_v5, 0.0 }
 0x13c   : > { %680 = vst.msk [vmem:[%s1137_s21] sm:$0xf] %vm679_vm2, %v850_v4  ;;  %v851_v7 = vpack.c.bf16 %v670_v6, %v670_v6 }
 0x13e   : > { %681 = vst.msk [vmem:[%s1137_s21 + $0x4] sm:$0xf] %vm679_vm2, %v851_v7 }
 0x13f PF: > { %s13_s18 = sadd.s32 1, %s1047_s18   ;;  %s1217_s12 = smov %s1027_s13 }
 0x140   : > { %p10_p0 = scmp.ge.s32.totalorder %s13_s18, 6   ;;  %s1218_s13 = smov %s1120_s23 }
 0x141   : > { %s1219_s14 = smov %s1039_s16  ;;  %s1220_s15 = smov %s1043_s17 }
 0x142   : > { %s1221_s16 = smov %s1224_s19  ;;  %s1222_s17 = smov %s1228_s20 }
 0x143   :  { %12 = sbr.rel (!%p10_p0) target bundleno = 4 (0x4), region = 101 }

// kernel: d_forward.20
= control target key start
LH: loop header
LB: loop body
LE: loop exit
PB: predicated region body
PF: predicated region fallthrough
CT: control target
= control target key end

     0   :  { %s638_s12 = smov 0   ;;  %s640_s13 = smov 0   ;;  %s692_s0 = inlined_call_operand.vmem [shape: bf16[16,144], index: 0, kind: input, shape index: {}]   ;;  %s693_s1 = inlined_call_operand.vmem [shape: bf16[2,144,16], index: 1, kind: input, shape index: {}]   ;;  %s694_s2 = inlined_call_operand.vmem [shape: f32[16,1], index: 2, kind: input, shape index: {}]   ;;  %s695_s3 = inlined_call_operand.vmem [shape: bf16[2,16,16], index: 3, kind: output, shape index: {}]  }
   0x1   :  { %s642_s14 = smov 0  }
   0x2 LB: > { %s32_s15 = sadd.s32 1, %s610_s13  ;;  %p529_p0 = scmp.ge.s32.totalorder %s614_s14, 1  ;;  %s614_s14 = sphi %s642_s14, %s13_s14   ;;  %s610_s13 = sphi %s640_s13, %s697_s13   ;;  %s606_s12 = sphi %s638_s12, %s696_s12  }
   0x3   : > { %p34_p1 = scmp.ge.s32.totalorder %s32_s15, 2  ;;  %p181_p2 = scmp.lt.s32.totalorder %s614_s14, 3 }
   0x5   : > { %s699_s15 = smov (%p34_p1, %s32_s15), 0  ;;  %p182_p3 = pnand %p529_p0, %p181_p2 }
   0x6   : > { %p227_p4 = scmp.lt.s32.totalorder (!%p182_p3), %s606_s12, 1  ;;  %vm252_vm0 = vcmask (!%p182_p3), 130048   ;;  %v394_v0 = vld [vmem:[%s694_s2] sm:$0xff] (!%p182_p3)  ;;  %v616_v1 = vmov (!%p182_p3), 0   ;;  %v617_v3 = vmov (!%p182_p3), 0.0   ;;  %v395_v4 = vld [vmem:[%s694_s2 + $0x8] sm:$0xff] (!%p182_p3) }
   0x7   : > { %185 = sbr.rel (%p182_p3) target bundleno = 283 (0x11b), region = 32  ;;  %344 = vmatprep.subr.bf16.mxu0 (!%p182_p3), %v616_v1  ;;  %v591_v2 = vld [vmem:[%s692_s0 + $0x4] ss:$8 sps:$4 sm:$0xff] (!%p182_p3)   ;;  %579 = vset.pattern.permute.xlu0 (!%p182_p3), %v616_v1  ;;  %253 = vst.msk [vmem:[#allocation2] sm:$0xff] (!%p182_p3), %vm252_vm0, %v617_v3  ;;  %254 = vst.msk [vmem:[#allocation2 + $0x8] sm:$0xff] (!%p182_p3), %vm252_vm0, %v617_v3  ;;  %vm416_vm1 = vcmask (!%p182_p3), 125952  }
   0x8   : > { %398 = vperm.xlu0 (!%p182_p3), %579, %v394_v0   ;;  %544 = vmatprep.mubr.msk.bf16.mxu0 (!%p182_p3), %vm252_vm0, %v591_v2  ;;  %v589_v14 = vld [vmem:[%s692_s0] ss:$8 sps:$4 sm:$0xff] (!%p182_p3)  }
   0xc   : > { %403 = vperm.xlu0 (!%p182_p3), %579, %v395_v4  }
   0xe   : > { %s701_s12 = smov (!%p227_p4, %s606_s12), 1  ;;  %v255_v15 = vld [vmem:[#allocation2] sm:$0xff]  ;;  %v256_v17 = vld [vmem:[#allocation2 + $0x8] sm:$0xff] }
   0xf   : > { %s552_s22 = smul.u32 72, %s701_s12  ;;  %s549_s28 = sshll.u32 %s701_s12, 3 }
  0x10   : > { %s246_s4 = scalar_lea.vmem %s695_s3, %s549_s28 }
  0x11   : > { %s237_s25 = scalar_lea.vmem %s693_s1, %s552_s22 }
  0x12   : > { %v580_v5 = vld [vmem:[%s237_s25] sm:$0xff]   ;;  %v581_v6 = vld [vmem:[%s237_s25 + $0x8] sm:$0xff]   ;;  %v582_v7 = vld [vmem:[%s237_s25 + $0x10] sm:$0xff]  }
  0x13   : > { %345 = vmatpush1.bf16.msra.mxu0 %v580_v5  ;;  %v583_v8 = vld [vmem:[%s237_s25 + $0x18] sm:$0xff]   ;;  %v584_v9 = vld [vmem:[%s237_s25 + $0x20] sm:$0xff]   ;;  %v585_v10 = vld [vmem:[%s237_s25 + $0x28] sm:$0xff]  }
  0x14   : > { %346 = vmatprep.subr.bf16.mxu0 %v616_v1  ;;  %v586_v11 = vld [vmem:[%s237_s25 + $0x30] sm:$0xff]   ;;  %v587_v12 = vld [vmem:[%s237_s25 + $0x38] sm:$0xff]   ;;  %v588_v13 = vld [vmem:[%s237_s25 + $0x40] sm:$0xff]  }
  0x17   : > { %347 = vmatpush1.bf16.msra.mxu0 %v581_v6 }
  0x18   : > { %348 = vmatprep.subr.bf16.mxu0 %v616_v1 }
  0x1b   : > { %349 = vmatpush1.bf16.msra.mxu0 %v582_v7 }
  0x1c   : > { %350 = vmatprep.subr.bf16.mxu0 %v616_v1 }
  0x1f   : > { %351 = vmatpush1.bf16.msra.mxu0 %v583_v8 }
  0x20   : > { %352 = vmatprep.subr.bf16.mxu0 %v616_v1 }
  0x23   : > { %353 = vmatpush1.bf16.msra.mxu0 %v584_v9 }
  0x24   : > { %354 = vmatprep.subr.bf16.mxu0 %v616_v1 }
  0x27   : > { %355 = vmatpush1.bf16.msra.mxu0 %v585_v10 }
  0x28   : > { %356 = vmatprep.subr.bf16.mxu0 %v616_v1 }
  0x2b   : > { %357 = vmatpush1.bf16.msra.mxu0 %v586_v11 }
  0x2c   : > { %358 = vmatprep.subr.bf16.mxu0 %v616_v1 }
  0x2f   : > { %359 = vmatpush1.bf16.msra.mxu0 %v587_v12 }
  0x30   : > { %360 = vmatprep.subr.bf16.mxu0 %v616_v1 }
  0x33   : > { %361 = vmatpush1.bf16.msra.mxu0 %v588_v13 }
  0x36   : > { %377 = vmatmul.mubr.bf16.vlgmr.msra.gmra.mrb[0].mxu0 %v589_v14 }
  0x87   : > { %v399_v23 = vpop.permute.xlu0 %398 }
  0x8b   : > { %v404_v26 = vpop.permute.xlu0 %403 }
 0x109   : > { %v378_v16 = vpop.f32.mrb[0].mxu0 }
 0x10a   : > { %v385_v18 = vadd.f32 %v378_v16, %v255_v15  ;;  %v380_v19 = vpop.f32.mrb[1].mxu0 }
 0x10b   : > { %v381_v20 = vpop.f32.mrb[2].mxu0 }
 0x10c   : > { %387 = vst.msk [vmem:[#allocation2] sm:$0xff] %vm252_vm0, %v385_v18  ;;  %v386_v21 = vadd.f32 %v381_v20, %v256_v17  ;;  %v383_v22 = vpop.f32.mrb[3].mxu0 }
 0x10e   : > { %388 = vst.msk [vmem:[#allocation2 + $0x8] sm:$0xff] %vm252_vm0, %v386_v21 }
 0x113   : > { %v392_v24 = vld [vmem:[#allocation2] sm:$0xff] }
 0x114   : > { %v406_v25 = vadd.f32 %v399_v23, %v392_v24 }
 0x115   : > { %v393_v27 = vld [vmem:[#allocation2 + $0x8] sm:$0xff] }
 0x116   : > { %v550_v28 = vpack.c.bf16 %v406_v25, %v406_v25  ;;  %v407_v29 = vadd.f32 %v404_v26, %v393_v27 }
 0x118   : > { %417 = vst.msk [vmem:[%s246_s4] sm:$0xf] %vm416_vm1, %v550_v28  ;;  %v551_v30 = vpack.c.bf16 %v407_v29, %v407_v29 }
 0x11a   : > { %418 = vst.msk [vmem:[%s246_s4 + $0x4] sm:$0xf] %vm416_vm1, %v551_v30 }
 0x11b PF: > { %s13_s14 = sadd.s32 1, %s614_s14   ;;  %s696_s12 = smov %s610_s13 }
 0x11c   : > { %p10_p5 = scmp.ge.s32.totalorder %s13_s14, 4   ;;  %s697_s13 = smov %s699_s15 }
 0x11e   :  { %12 = sbr.rel (!%p10_p5) target bundleno = 2 (0x2), region = 73 }

// kernel: d_forward.21
= control target key start
LH: loop header
LB: loop body
LE: loop exit
PB: predicated region body
PF: predicated region fallthrough
CT: control target
= control target key end

     0   :  { %s1165_s15 = smov 0   ;;  %s1167_s16 = smov 0   ;;  %s1313_s0 = inlined_call_operand.vmem [shape: bf16[16,1024], index: 0, kind: input, shape index: {}]   ;;  %s1314_s1 = inlined_call_operand.vmem [shape: bf16[2,1024,16], index: 1, kind: input, shape index: {}]   ;;  %s1315_s2 = inlined_call_operand.vmem [shape: f32[16,1], index: 2, kind: input, shape index: {}]   ;;  %s1316_s3 = inlined_call_operand.vmem [shape: bf16[2,16,16], index: 3, kind: input, shape index: {}]   ;;  %s1317_s4 = inlined_call_operand.vmem [shape: bf16[2,16,16], index: 4, kind: output, shape index: {}]  }
   0x1   :  { %s1169_s17 = smov 0   ;;  %s1171_s18 = smov 0  }
   0x2   :  { %s1173_s19 = smov 0   ;;  %s1175_s20 = smov 0  }
   0x3   :  { %s1177_s21 = smov 0  }
   0x4 LB: > { %s26_s22 = sadd.s32 1, %s1128_s19  ;;  %s33_s23 = sadd.s32 1, %s1132_s20  ;;  %s1136_s21 = sphi %s1177_s21, %s14_s21   ;;  %s1132_s20 = sphi %s1175_s20, %s1323_s20   ;;  %s1128_s19 = sphi %s1173_s19, %s1322_s19   ;;  %s1124_s18 = sphi %s1171_s18, %s1321_s18   ;;  %s1120_s17 = sphi %s1169_s17, %s1320_s17   ;;  %s1116_s16 = sphi %s1167_s16, %s1319_s16   ;;  %s1112_s15 = sphi %s1165_s15, %s1318_s15  }
   0x5   : > { %p27_p0 = scmp.ge.s32.totalorder %s26_s22, 2  ;;  %s40_s24 = sadd.s32 1, %s1116_s16 }
   0x6   : > { %p47_p1 = scmp.ne.s32.totalorder %s1116_s16, %s1112_s15  ;;  %p48_p2 = scmp.eq.s32.totalorder %s1136_s21, 0 }
   0x7   : > { %s1325_s22 = smov (%p27_p0, %s26_s22), 0  ;;  %s1327_s23 = smov (!%p27_p0, %s33_s23), %s1132_s20 }
   0x8   : > { %s37_s25 = ssub.s32 %s1128_s19, %s1325_s22  ;;  %p49_p3 = por %p48_p2, %p47_p1 }
   0x9   : > { %p35_p4 = scmp.ge.s32.totalorder %s1327_s23, 2  ;;  %p38_p5 = scmp.eq.s32.totalorder %s37_s25, 0 }
   0xa   : > { %p877_p6 = scmp.ge.s32.totalorder %s1136_s21, 4 }
   0xb   : > { %s1329_s23 = smov (%p35_p4, %s1327_s23), 0 }
   0xc   : > { %s1214_s26 = scalar_select %p38_p5, %s1116_s16, %s40_s24  }
   0xd   : > { %183 = sbr.rel (%p877_p6) target bundleno = 27 (0x1b), region = 20 }
  0x14   : > { %186 = sbr.rel (!%p49_p3) target bundleno = 27 (0x1b), region = 24  ;;  %s188_s27 = sand.u32 (%p49_p3), 1, %s1116_s16  }
  0x15   : > { %s932_s28 = sshll.u32 (%p49_p3), %s1128_s19, 4  ;;  %s878_s29 = sshll.u32 (%p49_p3), %s188_s27, 5 }
  0x16   : > { %s193_s6 = scalar_lea.vmem (%p49_p3), %s1313_s0, %s932_s28  ;;  %s190_s7 = scalar_lea.vmem (%p49_p3), [#allocation3], %s878_s29 }
  0x17   : > { %v206_v0 = vld [vmem:[%s193_s6] sm:$0xff] (%p49_p3)  ;;  %v208_v1 = vld [vmem:[%s193_s6 + $0x8] sm:$0xff] (%p49_p3) }
  0x18   : > { %v210_v2 = vld [vmem:[%s193_s6 + $0x20] sm:$0xff] (%p49_p3)  ;;  %207 = vst [vmem:[%s190_s7] sm:$0xff] (%p49_p3), %v206_v0  ;;  %209 = vst [vmem:[%s190_s7 + $0x8] sm:$0xff] (%p49_p3), %v208_v1  ;;  %v212_v3 = vld [vmem:[%s193_s6 + $0x28] sm:$0xff] (%p49_p3) }
  0x19   : > { %211 = vst [vmem:[%s190_s7 + $0x10] sm:$0xff] (%p49_p3), %v210_v2  ;;  %213 = vst [vmem:[%s190_s7 + $0x18] sm:$0xff] (%p49_p3), %v212_v3 }
  0x1b PF: > { %p881_p7 = scmp.ge.s32.totalorder %s1136_s21, 1  ;;  %p245_p8 = scmp.lt.s32.totalorder %s1136_s21, 5 }
  0x1d   : > { %p246_p9 = pnand %p881_p7, %p245_p8 }
  0x1e   : > { %s252_s8 = sand.u32 (!%p246_p9), 1, %s1112_s15   ;;  %s883_s9 = sshll.u32 (!%p246_p9), %s1120_s17, 6 }
  0x1f   : > { %249 = sbr.rel (%p246_p9) target bundleno = 322 (0x142), region = 55  ;;  %s882_s10 = sshll.u32 (!%p246_p9), %s252_s8, 5 }
  0x20   : > { %p302_p10 = scmp.lt.s32.totalorder (!%p246_p9), %s1124_s18, 1  ;;  %p304_p11 = scmp.lt.s32.totalorder (!%p246_p9), %s883_s9, 127 }
  0x21   : > { %s1243_s7 = scalar_lea.vmem (!%p246_p9), [#allocation3], %s882_s10  ;;  %p890_p12 = scmp.ne.s32.totalorder (!%p246_p9), %s1120_s17, 0 }
  0x26   : > { %s1331_s18 = smov (!%p302_p10, %s1124_s18), 1  ;;  %s1333_s9 = smov (!%p304_p11, %s883_s9), 127 }
  0x27   : > { %s884_s11 = sshll.u32 %s1331_s18, 7  ;;  %s933_s12 = sshll.u32 %s1331_s18, 3  ;;  %vm335_vm0 = vcmask (!%p890_p12), 130048   ;;  %v1138_v4 = vmov (!%p890_p12), 0.0  }
  0x28   : > { %s310_s13 = sadd.s32 %s884_s11, %s1333_s9  ;;  %s1231_s25 = scalar_lea.vmem %s1316_s3, %s933_s12  ;;  %336 = vst.msk [vmem:[#allocation2] sm:$0xff] (!%p890_p12), %vm335_vm0, %v1138_v4  ;;  %337 = vst.msk [vmem:[#allocation2 + $0x8] sm:$0xff] (!%p890_p12), %vm335_vm0, %v1138_v4 }
  0x29   : > { %s885_s27 = sshll.u32 %s310_s13, 2  ;;  %s1236_s30 = scalar_lea.vmem %s1317_s4, %s933_s12 }
  0x2a   : > { %s1241_s6 = scalar_lea.vmem %s1314_s1, %s885_s27  ;;  %334 = sbr.rel (%p890_p12) target bundleno = 49 (0x31), region = 63 }
  0x31 PF: > { %v1043_v5 = vld [vmem:[%s1241_s6 + $0x40] sm:$0xff]   ;;  %v1047_v9 = vld [vmem:[%s1241_s6 + $0x48] sm:$0xff]   ;;  %v1051_v13 = vld [vmem:[%s1241_s6 + $0x50] sm:$0xff]   ;;  %vm704_vm1 = vcmask 130048   ;;  %p927_p13 = scmp.ne.s32.totalorder %s1120_s17, 1 }
  0x32   : > { %v1044_v6 = vld [vmem:[%s1241_s6 + $0xc0] sm:$0xff]   ;;  %941 = vmatprep.subr.bf16.mxu0 %v1043_v5  ;;  %v1048_v10 = vld [vmem:[%s1241_s6 + $0xc8] sm:$0xff]   ;;  %v1052_v14 = vld [vmem:[%s1241_s6 + $0xd0] sm:$0xff]   ;;  %v1139_v60 = vmov (!%p927_p13), 0   ;;  %vm743_vm2 = vcmask (!%p927_p13), 125952  }
  0x33   : > { %v1045_v7 = vld [vmem:[%s1241_s6] sm:$0xff]   ;;  %963 = vmatprep.subr.bf16.mxu1 %v1044_v6  ;;  %v1049_v11 = vld [vmem:[%s1241_s6 + $0x8] sm:$0xff]   ;;  %v1053_v15 = vld [vmem:[%s1241_s6 + $0x10] sm:$0xff]   ;;  %1081 = vset.pattern.permute.xlu0 (!%p927_p13), %v1139_v60 }
  0x34   : > { %v1046_v8 = vld [vmem:[%s1241_s6 + $0x80] sm:$0xff]   ;;  %942 = vmatpush3.bf16.msra.mxu0 %v1045_v7  ;;  %v1050_v12 = vld [vmem:[%s1241_s6 + $0x88] sm:$0xff]   ;;  %v1054_v16 = vld [vmem:[%s1241_s6 + $0x90] sm:$0xff]  }
  0x35   : > { %964 = vmatpush3.bf16.msra.mxu1 %v1046_v8  ;;  %943 = vmatprep.subr.bf16.mxu0 %v1047_v9  ;;  %v1055_v17 = vld [vmem:[%s1241_s6 + $0x58] sm:$0xff]   ;;  %v1059_v21 = vld [vmem:[%s1241_s6 + $0x60] sm:$0xff]   ;;  %v1063_v25 = vld [vmem:[%s1241_s6 + $0x68] sm:$0xff]  }
  0x36   : > { %965 = vmatprep.subr.bf16.mxu1 %v1048_v10  ;;  %v1056_v18 = vld [vmem:[%s1241_s6 + $0xd8] sm:$0xff]   ;;  %v1060_v22 = vld [vmem:[%s1241_s6 + $0xe0] sm:$0xff]   ;;  %v1064_v26 = vld [vmem:[%s1241_s6 + $0xe8] sm:$0xff]  }
  0x37   : > { %v1057_v19 = vld [vmem:[%s1241_s6 + $0x18] sm:$0xff]   ;;  %v1061_v23 = vld [vmem:[%s1241_s6 + $0x20] sm:$0xff]   ;;  %v1065_v27 = vld [vmem:[%s1241_s6 + $0x28] sm:$0xff]  }
  0x38   : > { %944 = vmatpush3.bf16.msra.mxu0 %v1049_v11  ;;  %v1058_v20 = vld [vmem:[%s1241_s6 + $0x98] sm:$0xff]   ;;  %v1062_v24 = vld [vmem:[%s1241_s6 + $0xa0] sm:$0xff]   ;;  %v1066_v28 = vld [vmem:[%s1241_s6 + $0xa8] sm:$0xff]  }
  0x39   : > { %966 = vmatpush3.bf16.msra.mxu1 %v1050_v12  ;;  %945 = vmatprep.subr.bf16.mxu0 %v1051_v13  ;;  %v1067_v29 = vld [vmem:[%s1241_s6 + $0x70] sm:$0xff]   ;;  %v1071_v33 = vld [vmem:[%s1241_s6 + $0x78] sm:$0xff]   ;;  %v338_v50 = vld [vmem:[#allocation2] sm:$0xff] }
  0x3a   : > { %967 = vmatprep.subr.bf16.mxu1 %v1052_v14  ;;  %v1068_v30 = vld [vmem:[%s1241_s6 + $0xf0] sm:$0xff]   ;;  %v1072_v34 = vld [vmem:[%s1241_s6 + $0xf8] sm:$0xff]   ;;  %v339_v55 = vld [vmem:[#allocation2 + $0x8] sm:$0xff] }
  0x3b   : > { %v1069_v31 = vld [vmem:[%s1241_s6 + $0x30] sm:$0xff]   ;;  %v1073_v35 = vld [vmem:[%s1241_s6 + $0x38] sm:$0xff]   ;;  %v713_v59 = vld [vmem:[%s1315_s2] sm:$0xff] (!%p927_p13) }
  0x3c   : > { %946 = vmatpush3.bf16.msra.mxu0 %v1053_v15  ;;  %v1070_v32 = vld [vmem:[%s1241_s6 + $0xb0] sm:$0xff]   ;;  %v1074_v36 = vld [vmem:[%s1241_s6 + $0xb8] sm:$0xff]   ;;  %717 = vperm.xlu0 (!%p927_p13), %1081, %v713_v59   ;;  %v714_v61 = vld [vmem:[%s1315_s2 + $0x8] sm:$0xff] (!%p927_p13) }
  0x3d   : > { %968 = vmatpush3.bf16.msra.mxu1 %v1054_v16  ;;  %947 = vmatprep.subr.bf16.mxu0 %v1055_v17  ;;  %v1075_v37 = vld [vmem:[%s1243_s7] ss:$16 sps:$4 sm:$0xff]   ;;  %v1077_v38 = vld [vmem:[%s1243_s7 + $0x4] ss:$16 sps:$4 sm:$0xff]   ;;  %v1078_v39 = vld [vmem:[%s1243_s7 + $0x8] ss:$16 sps:$4 sm:$0xff]  }
  0x3e   : > { %969 = vmatprep.subr.bf16.mxu1 %v1056_v18  ;;  %v1080_v40 = vld [vmem:[%s1243_s7 + $0xc] ss:$16 sps:$4 sm:$0xff]   ;;  %652 = vmatprep.mubr.bf16.mxu0 %v1077_v38  ;;  %v938_v62 = vld [vmem:[%s1231_s25] sm:$0xff] (!%p927_p13)  }
  0x3f   : > { %693 = vmatprep.mubr.bf16.mxu1 %v1080_v40  ;;  %v939_v0 = vunpack.c.l.bf16 (!%p927_p13), %v938_v62  ;;  %v940_v5 = vunpack.c.h.bf16 (!%p927_p13), %v938_v62 }
  0x40   : > { %948 = vmatpush3.bf16.msra.mxu0 %v1057_v19  ;;  %722 = vperm.xlu0 (!%p927_p13), %1081, %v714_v61  }
  0x41   : > { %970 = vmatpush3.bf16.msra.mxu1 %v1058_v20  ;;  %949 = vmatprep.subr.bf16.mxu0 %v1059_v21 }
  0x42   : > { %971 = vmatprep.subr.bf16.mxu1 %v1060_v22 }
  0x44   : > { %950 = vmatpush3.bf16.msra.mxu0 %v1061_v23 }
  0x45   : > { %972 = vmatpush3.bf16.msra.mxu1 %v1062_v24  ;;  %951 = vmatprep.subr.bf16.mxu0 %v1063_v25 }
  0x46   : > { %973 = vmatprep.subr.bf16.mxu1 %v1064_v26 }
  0x48   : > { %952 = vmatpush3.bf16.msra.mxu0 %v1065_v27 }
  0x49   : > { %974 = vmatpush3.bf16.msra.mxu1 %v1066_v28  ;;  %953 = vmatprep.subr.bf16.mxu0 %v1067_v29 }
  0x4a   : > { %975 = vmatprep.subr.bf16.mxu1 %v1068_v30 }
  0x4c   : > { %954 = vmatpush3.bf16.msra.mxu0 %v1069_v31 }
  0x4d   : > { %976 = vmatpush3.bf16.msra.mxu1 %v1070_v32  ;;  %955 = vmatprep.subr.bf16.mxu0 %v1071_v33 }
  0x4e   : > { %977 = vmatprep.subr.bf16.mxu1 %v1072_v34 }
  0x50   : > { %956 = vmatpush3.bf16.msra.mxu0 %v1073_v35 }
  0x51   : > { %978 = vmatpush3.bf16.msra.mxu1 %v1074_v36 }
  0x53   : > { %653 = vmatmul.mubr.bf16.vlgmr.msra.gmra.mrb[0].mxu0 %v1075_v37 }
  0x54   : > { %694 = vmatmul.mubr.bf16.vlgmr.msra.gmra.mrb[0].mxu1 %v1078_v39 }
  0xbb   : > { %v718_v1 = vpop.permute.xlu0 (!%p927_p13), %717 }
  0xbf   : > { %v723_v6 = vpop.permute.xlu0 (!%p927_p13), %722 }
 0x126   : > { %v957_v41 = vpop.f32.mrb[0].mxu0 }
 0x127   : > { %v979_v42 = vpop.f32.mrb[0].mxu1  ;;  %v958_v43 = vpop.f32.mrb[1].mxu0 }
 0x128   : > { %v959_v44 = vadd.f32 %v958_v43, %v957_v41  ;;  %v980_v45 = vpop.f32.mrb[1].mxu1  ;;  %v960_v46 = vpop.f32.mrb[2].mxu0 }
 0x129   : > { %v981_v47 = vadd.f32 %v980_v45, %v979_v42  ;;  %v982_v48 = vpop.f32.mrb[2].mxu1  ;;  %v961_v49 = vpop.f32.mrb[3].mxu0 }
 0x12a   : > { %v962_v51 = vadd.f32 %v961_v49, %v960_v46  ;;  %v983_v52 = vpop.f32.mrb[3].mxu1 }
 0x12b   : > { %v696_v53 = vadd.f32 %v981_v47, %v959_v44  ;;  %v984_v54 = vadd.f32 %v983_v52, %v982_v48  ;;  %710 = sbr.rel (%p927_p13) target bundleno = 322 (0x142), region = 67 }
 0x12d   : > { %v702_v56 = vadd.f32 %v696_v53, %v338_v50  ;;  %v699_v57 = vadd.f32 %v984_v54, %v962_v51 }
 0x12f   : > { %705 = vst.msk [vmem:[#allocation2] sm:$0xff] %vm704_vm1, %v702_v56  ;;  %v703_v58 = vadd.f32 %v699_v57, %v339_v55 }
 0x131   : > { %706 = vst.msk [vmem:[#allocation2 + $0x8] sm:$0xff] %vm704_vm1, %v703_v58 }
 0x136   : > { %v711_v63 = vld [vmem:[#allocation2] sm:$0xff] }
 0x137   : > { %v725_v2 = vadd.f32 %v718_v1, %v711_v63 }
 0x138   : > { %v712_v3 = vld [vmem:[#allocation2 + $0x8] sm:$0xff] }
 0x139   : > { %v731_v4 = vadd.f32 %v939_v0, %v725_v2  ;;  %v726_v8 = vadd.f32 %v723_v6, %v712_v3 }
 0x13b   : > { %v733_v7 = vmax.f32 %v731_v4, 0.0  ;;  %v732_v10 = vadd.f32 %v940_v5, %v726_v8 }
 0x13d   : > { %v935_v9 = vpack.c.bf16 %v733_v7, %v733_v7  ;;  %v734_v11 = vmax.f32 %v732_v10, 0.0 }
 0x13f   : > { %744 = vst.msk [vmem:[%s1236_s30] sm:$0xf] %vm743_vm2, %v935_v9  ;;  %v936_v12 = vpack.c.bf16 %v734_v11, %v734_v11 }
 0x141   : > { %745 = vst.msk [vmem:[%s1236_s30 + $0x4] sm:$0xf] %vm743_vm2, %v936_v12 }
 0x142 PF: > { %s14_s21 = sadd.s32 1, %s1136_s21   ;;  %s1318_s15 = smov %s1116_s16 }
 0x143   : > { %p11_p0 = scmp.ge.s32.totalorder %s14_s21, 6   ;;  %s1319_s16 = smov %s1214_s26 }
 0x144   : > { %s1320_s17 = smov %s1128_s19  ;;  %s1321_s18 = smov %s1132_s20 }
 0x145   : > { %s1322_s19 = smov %s1325_s22  ;;  %s1323_s20 = smov %s1329_s23 }
 0x146   :  { %13 = sbr.rel (!%p11_p0) target bundleno = 4 (0x4), region = 108 }

// kernel: d_forward.22
= control target key start
LH: loop header
LB: loop body
LE: loop exit
PB: predicated region body
PF: predicated region fallthrough
CT: control target
= control target key end

     0   :  { %s388_s12 = smov 0   ;;  %s411_s0 = inlined_call_operand.vmem [shape: bf16[8,4], index: 0, kind: input, shape index: {}]   ;;  %s412_s1 = inlined_call_operand.vmem [shape: bf16[32,4,4], index: 1, kind: input, shape index: {}]   ;;  %s413_s2 = inlined_call_operand.vmem [shape: bf16[4,8], index: 2, kind: input, shape index: {}]   ;;  %s414_s3 = inlined_call_operand.vmem [shape: bf16[32,8,8], index: 3, kind: output, shape index: {}]  }
   0x1 LB: > { %s321_s13 = sadd.s32 4294967295, %s364_s12   ;;  %p325_p0 = scmp.ge.s32.totalorder %s364_s12, 1  ;;  %s364_s12 = sphi %s388_s12, %s13_s12  }
   0x2   : > { %p136_p1 = scmp.lt.s32.totalorder %s364_s12, 33 }
   0x4   : > { %p137_p2 = pnand %p325_p0, %p136_p1 }
   0x5   : > { %p158_p3 = scmp.lt.s32.totalorder (!%p137_p2), %s321_s13, 31  ;;  %v366_v0 = vmov (!%p137_p2), 0.0   ;;  %vm367_vm0 = vmmov (!%p137_p2), 0   ;;  %vm173_vm1 = vcmask (!%p137_p2), 1041408   ;;  %v167_v3 = vld [vmem:[%s411_s0] sm:$0xf] (!%p137_p2) }
   0x6   : > { %140 = sbr.rel (%p137_p2) target bundleno = 450 (0x1c2), region = 32  ;;  %336 = vmatprep.subr.bf16.mxu0 (!%p137_p2), %v366_v0  ;;  %338 = vmatprep.mubr.msk.bf16.mxu0 (!%p137_p2), %vm367_vm0, %v366_v0  ;;  %vm169_vm2 = vcmask (!%p137_p2), 31744   ;;  %v218_v4 = vld [vmem:[%s413_s2] sm:$0x3] (!%p137_p2)  ;;  %vm266_vm3 = vcmask (!%p137_p2), 60416  }
   0x7   : > { %342 = vmatprep.subr.bf16.mxu1 (!%p137_p2), %v366_v0  ;;  %344 = vmatprep.mubr.msk.bf16.mxu1 (!%p137_p2), %vm367_vm0, %v366_v0  ;;  %v223_v5 = vsel (!%p137_p2), %vm173_vm1, %v218_v4, 0 }
   0x8   : > { %343 = vmatpush3.bf16.msra.mxu1 (!%p137_p2), %v223_v5 }
   0xd   : > { %s416_s13 = smov (!%p158_p3, %s321_s13), 31 }
   0xe   : > { %s326_s14 = sshll.u32 %s416_s13, 1  ;;  %s327_s22 = sshll.u32 %s416_s13, 2 }
   0xf   : > { %s161_s17 = scalar_lea.vmem %s412_s1, %s326_s14  ;;  %s165_s25 = scalar_lea.vmem %s414_s3, %s327_s22 }
  0x10   : > { %v168_v1 = vld [vmem:[%s161_s17] sm:$0x3] }
  0x11   : > { %v175_v2 = vsel %vm173_vm1, %v168_v1, 0 }
  0x12   : > { %337 = vmatpush3.bf16.msra.mxu0 %v175_v2 }
  0x15   : > { %339 = vmatmul.mubr.msk.bf16.vlgmr.msra.gmra.mrb[0].mxu0 %vm169_vm2, %v167_v3 }
  0xe8   : > { %v211_v6 = vpop.f32.mrb[0].mxu0 }
  0xe9   : > { %v217_v7 = vpack.c.bf16 %v211_v6, %v211_v6  ;;  %v340_v8 = vpop.f32.mrb[1].mxu0 }
  0xea   : > { %v214_v9 = vpop.f32.mrb[2].mxu0 }
  0xeb   : > { %v341_v10 = vpop.f32.mrb[3].mxu0  ;;  %345 = vmatmul.mubr.msk.bf16.vlgmr.msra.gmra.mrb[0].mxu1 %vm169_vm2, %v217_v7 }
 0x1be   : > { %v259_v11 = vpop.f32.mrb[0].mxu1 }
 0x1bf   : > { %v265_v12 = vpack.c.bf16 %v259_v11, %v259_v11  ;;  %v346_v13 = vpop.f32.mrb[1].mxu1 }
 0x1c0   : > { %v262_v14 = vpop.f32.mrb[2].mxu1 }
 0x1c1   : > { %267 = vst.msk [vmem:[%s165_s25] sm:$0xf] %vm266_vm3, %v265_v12  ;;  %v347_v15 = vpop.f32.mrb[3].mxu1 }
 0x1c2 PF: > { %s13_s12 = sadd.s32 1, %s364_s12  }
 0x1c3   : > { %p10_p4 = scmp.ge.s32.totalorder %s13_s12, 34  }
 0x1c5   :  { %12 = sbr.rel (!%p10_p4) target bundleno = 1 (0x1), region = 62 }

// kernel: d_forward.23
= control target key start
LH: loop header
LB: loop body
LE: loop exit
PB: predicated region body
PF: predicated region fallthrough
CT: control target
= control target key end

     0   :  { %s834_s12 = smov 0   ;;  %s836_s13 = smov 0   ;;  %s929_s0 = inlined_call_operand.vmem [shape: bf16[8,400], index: 0, kind: input, shape index: {}]   ;;  %s930_s1 = inlined_call_operand.vmem [shape: bf16[2,400,64], index: 1, kind: input, shape index: {}]   ;;  %s931_s2 = inlined_call_operand.vmem [shape: f32[8,1], index: 2, kind: input, shape index: {}]   ;;  %s932_s3 = inlined_call_operand.vmem [shape: bf16[2,8,64], index: 3, kind: output, shape index: {}]  }
   0x1   :  { %s838_s14 = smov 0  }
   0x2 LB: > { %s32_s15 = sadd.s32 1, %s806_s13  ;;  %p674_p0 = scmp.ge.s32.totalorder %s810_s14, 1  ;;  %s810_s14 = sphi %s838_s14, %s13_s14   ;;  %s806_s13 = sphi %s836_s13, %s934_s13   ;;  %s802_s12 = sphi %s834_s12, %s933_s12  }
   0x3   : > { %p34_p1 = scmp.ge.s32.totalorder %s32_s15, 2  ;;  %p181_p2 = scmp.lt.s32.totalorder %s810_s14, 3 }
   0x5   : > { %s936_s15 = smov (%p34_p1, %s32_s15), 0  ;;  %p182_p3 = pnand %p674_p0, %p181_p2 }
   0x6   : > { %p226_p4 = scmp.lt.s32.totalorder (!%p182_p3), %s802_s12, 1  ;;  %v855_v0 = vld [vmem:[%s929_s0] sm:$0xff] (!%p182_p3)  ;;  %v860_v1 = vld [vmem:[%s929_s0 + $0x8] sm:$0xff] (!%p182_p3)  ;;  %vm468_vm0 = vcmask (!%p182_p3), 130048   ;;  %v812_v2 = vmov (!%p182_p3), 0   ;;  %vm250_vm1 = vcmask (!%p182_p3), 523264  }
   0x7   : > { %185 = sbr.rel (%p182_p3) target bundleno = 286 (0x11e), region = 32  ;;  %512 = vmatprep.subr.bf16.mxu1 (!%p182_p3), %v812_v2  ;;  %v678_v3 = vcombine.high (!%p182_p3), %v855_v0, %v855_v0  ;;  %v680_v4 = vcombine.high (!%p182_p3), %v860_v1, %v860_v1  ;;  %v559_v5 = vld [vmem:[%s931_s2] sm:$0xff] (!%p182_p3)  ;;  %758 = vset.pattern.permute.xlu0 (!%p182_p3), %v812_v2  ;;  %v677_v30 = vcombine.low (!%p182_p3), %v855_v0, %v855_v0  ;;  %v813_v33 = vmov (!%p182_p3), 0.0  }
   0x8   : > { %562 = vperm.xlu0 (!%p182_p3), %758, %v559_v5   ;;  %v679_v32 = vcombine.low (!%p182_p3), %v860_v1, %v860_v1  ;;  %251 = vst.msk [vmem:[#allocation2] sm:$0xff] (!%p182_p3), %vm250_vm1, %v813_v33  ;;  %vm568_vm2 = vcmask (!%p182_p3), 519168  }
   0x9   : > { %504 = vmatprep.mubr.bf16.mxu0 (!%p182_p3), %v678_v3  ;;  %706 = vmatprep.mubr.msk.bf16.mxu1 (!%p182_p3), %vm468_vm0, %v680_v4 }
   0xe   : > { %s938_s12 = smov (!%p226_p4, %s802_s12), 1 }
   0xf   : > { %s731_s22 = smul.u32 200, %s938_s12  ;;  %v252_v39 = vld [vmem:[#allocation2] sm:$0xff]  ;;  %s676_s26 = sshll.u32 %s938_s12, 2 }
  0x10   : > { %s244_s29 = scalar_lea.vmem %s932_s3, %s676_s26 }
  0x11   : > { %s877_s25 = scalar_lea.vmem %s930_s1, %s731_s22 }
  0x12   : > { %v759_v6 = vld [vmem:[%s877_s25 + $0x40] sm:$0xff]   ;;  %v762_v9 = vld [vmem:[%s877_s25 + $0x48] sm:$0xff]   ;;  %v765_v12 = vld [vmem:[%s877_s25 + $0x50] sm:$0xff]  }
  0x13   : > { %v760_v7 = vld [vmem:[%s877_s25 + $0x80] sm:$0xff]   ;;  %709 = vmatprep.subr.bf16.mxu0 %v759_v6  ;;  %v763_v10 = vld [vmem:[%s877_s25 + $0x88] sm:$0xff]   ;;  %v766_v13 = vld [vmem:[%s877_s25 + $0x90] sm:$0xff]  }
  0x14   : > { %v761_v8 = vld [vmem:[%s877_s25] sm:$0xff]   ;;  %513 = vmatpush1.bf16.msra.mxu1 %v760_v7  ;;  %v764_v11 = vld [vmem:[%s877_s25 + $0x8] sm:$0xff]   ;;  %v767_v14 = vld [vmem:[%s877_s25 + $0x10] sm:$0xff]  }
  0x15   : > { %710 = vmatpush3.bf16.msra.mxu0 %v761_v8  ;;  %514 = vmatprep.subr.bf16.mxu1 %v812_v2  ;;  %v768_v15 = vld [vmem:[%s877_s25 + $0x58] sm:$0xff]   ;;  %v771_v18 = vld [vmem:[%s877_s25 + $0x60] sm:$0xff]   ;;  %v774_v21 = vld [vmem:[%s877_s25 + $0x68] sm:$0xff]  }
  0x16   : > { %711 = vmatprep.subr.bf16.mxu0 %v762_v9  ;;  %v769_v16 = vld [vmem:[%s877_s25 + $0x98] sm:$0xff]   ;;  %v772_v19 = vld [vmem:[%s877_s25 + $0xa0] sm:$0xff]   ;;  %v775_v22 = vld [vmem:[%s877_s25 + $0xa8] sm:$0xff]  }
  0x17   : > { %v770_v17 = vld [vmem:[%s877_s25 + $0x18] sm:$0xff]   ;;  %v773_v20 = vld [vmem:[%s877_s25 + $0x20] sm:$0xff]   ;;  %v776_v23 = vld [vmem:[%s877_s25 + $0x28] sm:$0xff]  }
  0x18   : > { %515 = vmatpush1.bf16.msra.mxu1 %v763_v10  ;;  %v777_v24 = vld [vmem:[%s877_s25 + $0x70] sm:$0xff]   ;;  %v780_v27 = vld [vmem:[%s877_s25 + $0x78] sm:$0xff]   ;;  %v785_v31 = vld [vmem:[%s877_s25 + $0xc0] sm:$0xff]  }
  0x19   : > { %712 = vmatpush3.bf16.msra.mxu0 %v764_v11  ;;  %516 = vmatprep.subr.bf16.mxu1 %v812_v2  ;;  %v778_v25 = vld [vmem:[%s877_s25 + $0xb0] sm:$0xff]   ;;  %v781_v28 = vld [vmem:[%s877_s25 + $0xb8] sm:$0xff]  }
  0x1a   : > { %713 = vmatprep.subr.bf16.mxu0 %v765_v12  ;;  %v779_v26 = vld [vmem:[%s877_s25 + $0x30] sm:$0xff]   ;;  %v782_v29 = vld [vmem:[%s877_s25 + $0x38] sm:$0xff]  }
  0x1c   : > { %517 = vmatpush1.bf16.msra.mxu1 %v766_v13 }
  0x1d   : > { %714 = vmatpush3.bf16.msra.mxu0 %v767_v14  ;;  %518 = vmatprep.subr.bf16.mxu1 %v812_v2 }
  0x1e   : > { %715 = vmatprep.subr.bf16.mxu0 %v768_v15 }
  0x20   : > { %519 = vmatpush1.bf16.msra.mxu1 %v769_v16 }
  0x21   : > { %716 = vmatpush3.bf16.msra.mxu0 %v770_v17  ;;  %520 = vmatprep.subr.bf16.mxu1 %v812_v2 }
  0x22   : > { %717 = vmatprep.subr.bf16.mxu0 %v771_v18 }
  0x24   : > { %521 = vmatpush1.bf16.msra.mxu1 %v772_v19 }
  0x25   : > { %718 = vmatpush3.bf16.msra.mxu0 %v773_v20  ;;  %522 = vmatprep.subr.bf16.mxu1 %v812_v2 }
  0x26   : > { %719 = vmatprep.subr.bf16.mxu0 %v774_v21 }
  0x28   : > { %523 = vmatpush1.bf16.msra.mxu1 %v775_v22 }
  0x29   : > { %720 = vmatpush3.bf16.msra.mxu0 %v776_v23  ;;  %524 = vmatprep.subr.bf16.mxu1 %v812_v2 }
  0x2a   : > { %721 = vmatprep.subr.bf16.mxu0 %v777_v24 }
  0x2c   : > { %525 = vmatpush1.bf16.msra.mxu1 %v778_v25 }
  0x2d   : > { %722 = vmatpush3.bf16.msra.mxu0 %v779_v26  ;;  %526 = vmatprep.subr.bf16.mxu1 %v812_v2 }
  0x2e   : > { %723 = vmatprep.subr.bf16.mxu0 %v780_v27 }
  0x30   : > { %527 = vmatpush1.bf16.msra.mxu1 %v781_v28 }
  0x31   : > { %724 = vmatpush3.bf16.msra.mxu0 %v782_v29  ;;  %528 = vmatprep.subr.bf16.mxu1 %v812_v2 }
  0x34   : > { %505 = vmatmul.mubr.bf16.vlgmr.msra.gmra.mrb[0].mxu0 %v677_v30  ;;  %529 = vmatpush1.bf16.msra.mxu1 %v785_v31 }
  0x37   : > { %545 = vmatmul.mubr.bf16.vlgmr.msra.gmra.mrb[0].mxu1 %v679_v32 }
  0x87   : > { %v563_v46 = vpop.permute.xlu0 %562 }
 0x107   : > { %v725_v34 = vpop.f32.mrb[0].mxu0 }
 0x108   : > { %v726_v35 = vpop.f32.mrb[1].mxu0 }
 0x109   : > { %v727_v36 = vadd.f32 %v726_v35, %v725_v34  ;;  %v728_v37 = vpop.f32.mrb[2].mxu0 }
 0x10a   : > { %v729_v38 = vpop.f32.mrb[3].mxu0  ;;  %v546_v40 = vpop.f32.mrb[0].mxu1 }
 0x10b   : > { %v547_v41 = vadd.f32 %v727_v36, %v546_v40  ;;  %v548_v42 = vpop.f32.mrb[1].mxu1 }
 0x10c   : > { %v549_v43 = vpop.f32.mrb[2].mxu1 }
 0x10d   : > { %v552_v44 = vadd.f32 %v547_v41, %v252_v39  ;;  %v550_v45 = vpop.f32.mrb[3].mxu1 }
 0x10f   : > { %554 = vst.msk [vmem:[#allocation2] sm:$0xff] %vm250_vm1, %v552_v44 }
 0x116   : > { %v558_v47 = vld [vmem:[#allocation2] sm:$0xff] }
 0x117   : > { %v565_v48 = vadd.f32 %v563_v46, %v558_v47 }
 0x119   : > { %v566_v49 = vmax.f32 %v565_v48, 0.0 }
 0x11b   : > { %v567_v50 = vpack.c.bf16 %v566_v49, %v566_v49 }
 0x11d   : > { %569 = vst.msk [vmem:[%s244_s29] sm:$0xf] %vm568_vm2, %v567_v50 }
 0x11e PF: > { %s13_s14 = sadd.s32 1, %s810_s14   ;;  %s933_s12 = smov %s806_s13 }
 0x11f   : > { %p10_p5 = scmp.ge.s32.totalorder %s13_s14, 4   ;;  %s934_s13 = smov %s936_s15 }
 0x121   :  { %12 = sbr.rel (!%p10_p5) target bundleno = 2 (0x2), region = 73 }

// kernel: d_forward.24
= control target key start
LH: loop header
LB: loop body
LE: loop exit
PB: predicated region body
PF: predicated region fallthrough
CT: control target
= control target key end

     0   :  { %s566_s12 = smov 0   ;;  %s568_s13 = smov 0   ;;  %s611_s0 = inlined_call_operand.vmem [shape: bf16[8,72], index: 0, kind: input, shape index: {}]   ;;  %s612_s1 = inlined_call_operand.vmem [shape: bf16[2,72,64], index: 1, kind: input, shape index: {}]   ;;  %s613_s2 = inlined_call_operand.vmem [shape: f32[8,1], index: 2, kind: input, shape index: {}]   ;;  %s614_s3 = inlined_call_operand.vmem [shape: bf16[2,8,64], index: 3, kind: output, shape index: {}]  }
   0x1   :  { %s570_s14 = smov 0  }
   0x2 LB: > { %s32_s15 = sadd.s32 1, %s537_s13  ;;  %p454_p0 = scmp.ge.s32.totalorder %s541_s14, 1  ;;  %s541_s14 = sphi %s570_s14, %s13_s14   ;;  %s537_s13 = sphi %s568_s13, %s616_s13   ;;  %s533_s12 = sphi %s566_s12, %s615_s12  }
   0x3   : > { %p34_p1 = scmp.ge.s32.totalorder %s32_s15, 2  ;;  %p179_p2 = scmp.lt.s32.totalorder %s541_s14, 3 }
   0x5   : > { %s618_s15 = smov (%p34_p1, %s32_s15), 0  ;;  %p180_p3 = pnand %p454_p0, %p179_p2 }
   0x6   : > { %p221_p4 = scmp.lt.s32.totalorder (!%p180_p3), %s533_s12, 1  ;;  %v543_v0 = vmov (!%p180_p3), 0.0   ;;  %vm544_vm0 = vmmov (!%p180_p3), 0   ;;  %v340_v1 = vld [vmem:[%s613_s2] sm:$0xff] (!%p180_p3)  ;;  %vm245_vm1 = vcmask (!%p180_p3), 523264   ;;  %v545_v2 = vmov (!%p180_p3), 0  }
   0x7   : > { %183 = sbr.rel (%p180_p3) target bundleno = 265 (0x109), region = 32  ;;  %471 = vmatprep.subr.bf16.mxu0 (!%p180_p3), %v543_v0  ;;  %481 = vmatprep.mubr.msk.bf16.mxu0 (!%p180_p3), %vm544_vm0, %v543_v0  ;;  %246 = vst.msk [vmem:[#allocation2] sm:$0xff] (!%p180_p3), %vm245_vm1, %v543_v0  ;;  %vm289_vm2 = vcmask (!%p180_p3), 1043456   ;;  %v248_v9 = vld [vmem:[%s611_s0] sm:$0xf] (!%p180_p3)  ;;  %vm285_vm3 = vcmask (!%p180_p3), 588800  }
   0x8   : > { %513 = vset.pattern.permute.xlu0 (!%p180_p3), %v545_v2  ;;  %vm348_vm4 = vcmask (!%p180_p3), 519168  }
   0x9   : > { %343 = vperm.xlu0 (!%p180_p3), %513, %v340_v1  }
   0xe   : > { %s620_s12 = smov (!%p221_p4, %s533_s12), 1  ;;  %v247_v10 = vld [vmem:[#allocation2] sm:$0xff] }
   0xf   : > { %s485_s18 = smul.u32 36, %s620_s12  ;;  %s456_s24 = sshll.u32 %s620_s12, 2 }
  0x10   : > { %s239_s27 = scalar_lea.vmem %s614_s3, %s456_s24 }
  0x11   : > { %s231_s21 = scalar_lea.vmem %s612_s1, %s485_s18 }
  0x12   : > { %v514_v3 = vld [vmem:[%s231_s21] sm:$0xff]   ;;  %v515_v4 = vld [vmem:[%s231_s21 + $0x8] sm:$0xff]   ;;  %v516_v5 = vld [vmem:[%s231_s21 + $0x10] sm:$0xff]  }
  0x13   : > { %472 = vmatpush3.bf16.msra.mxu0 %v514_v3  ;;  %v517_v6 = vld [vmem:[%s231_s21 + $0x18] sm:$0xff]   ;;  %v518_v7 = vld [vmem:[%s231_s21 + $0x20] ss:$0 sps:$4 sm:$0xff]  }
  0x14   : > { %473 = vmatprep.subr.bf16.mxu0 %v543_v0  ;;  %v291_v8 = vsel %vm289_vm2, %v518_v7, 0 }
  0x17   : > { %474 = vmatpush3.bf16.msra.mxu0 %v515_v4 }
  0x18   : > { %475 = vmatprep.subr.bf16.mxu0 %v543_v0 }
  0x1b   : > { %476 = vmatpush3.bf16.msra.mxu0 %v516_v5 }
  0x1c   : > { %477 = vmatprep.subr.bf16.mxu0 %v543_v0 }
  0x1f   : > { %478 = vmatpush3.bf16.msra.mxu0 %v517_v6 }
  0x20   : > { %479 = vmatprep.subr.bf16.mxu0 %v543_v0 }
  0x23   : > { %480 = vmatpush3.bf16.msra.mxu0 %v291_v8 }
  0x26   : > { %482 = vmatmul.mubr.msk.bf16.vlgmr.msra.gmra.mrb[0].mxu0 %vm285_vm3, %v248_v9 }
  0x88   : > { %v344_v16 = vpop.permute.xlu0 %343 }
  0xf9   : > { %v327_v11 = vpop.f32.mrb[0].mxu0 }
  0xfa   : > { %v333_v12 = vadd.f32 %v327_v11, %v247_v10  ;;  %v483_v13 = vpop.f32.mrb[1].mxu0 }
  0xfb   : > { %v330_v14 = vpop.f32.mrb[2].mxu0 }
  0xfc   : > { %335 = vst.msk [vmem:[#allocation2] sm:$0xff] %vm245_vm1, %v333_v12  ;;  %v484_v15 = vpop.f32.mrb[3].mxu0 }
 0x103   : > { %v339_v17 = vld [vmem:[#allocation2] sm:$0xff] }
 0x104   : > { %v346_v18 = vadd.f32 %v344_v16, %v339_v17 }
 0x106   : > { %v347_v19 = vpack.c.bf16 %v346_v18, %v346_v18 }
 0x108   : > { %349 = vst.msk [vmem:[%s239_s27] sm:$0xf] %vm348_vm4, %v347_v19 }
 0x109 PF: > { %s13_s14 = sadd.s32 1, %s541_s14   ;;  %s615_s12 = smov %s537_s13 }
 0x10a   : > { %p10_p5 = scmp.ge.s32.totalorder %s13_s14, 4   ;;  %s616_s13 = smov %s618_s15 }
 0x10c   :  { %12 = sbr.rel (!%p10_p5) target bundleno = 2 (0x2), region = 73 }

// kernel: d_forward.25
= control target key start
LH: loop header
LB: loop body
LE: loop exit
PB: predicated region body
PF: predicated region fallthrough
CT: control target
= control target key end

     0   :  { %s913_s15 = smov 0   ;;  %s915_s16 = smov 0   ;;  %s1013_s0 = inlined_call_operand.vmem [shape: bf16[8,400], index: 0, kind: input, shape index: {}]   ;;  %s1014_s1 = inlined_call_operand.vmem [shape: bf16[2,400,64], index: 1, kind: input, shape index: {}]   ;;  %s1015_s2 = inlined_call_operand.vmem [shape: f32[8,1], index: 2, kind: input, shape index: {}]   ;;  %s1016_s3 = inlined_call_operand.vmem [shape: bf16[2,8,64], index: 3, kind: input, shape index: {}]   ;;  %s1017_s4 = inlined_call_operand.vmem [shape: bf16[2,8,64], index: 4, kind: output, shape index: {}]  }
   0x1   :  { %s917_s17 = smov 0  }
   0x2 LB: > { %s33_s18 = sadd.s32 1, %s880_s16  ;;  %p747_p0 = scmp.ge.s32.totalorder %s884_s17, 1  ;;  %s884_s17 = sphi %s917_s17, %s14_s17   ;;  %s880_s16 = sphi %s915_s16, %s1019_s16   ;;  %s876_s15 = sphi %s913_s15, %s1018_s15  }
   0x3   : > { %p35_p1 = scmp.ge.s32.totalorder %s33_s18, 2  ;;  %p220_p2 = scmp.lt.s32.totalorder %s884_s17, 3 }
   0x5   : > { %s1021_s18 = smov (%p35_p1, %s33_s18), 0  ;;  %p221_p3 = pnand %p747_p0, %p220_p2 }
   0x6   : > { %p274_p4 = scmp.lt.s32.totalorder (!%p221_p3), %s876_s15, 1  ;;  %v934_v0 = vld [vmem:[%s1013_s0] sm:$0xff] (!%p221_p3)  ;;  %v939_v1 = vld [vmem:[%s1013_s0 + $0x8] sm:$0xff] (!%p221_p3)  ;;  %vm523_vm0 = vcmask (!%p221_p3), 130048   ;;  %v886_v2 = vmov (!%p221_p3), 0   ;;  %vm305_vm1 = vcmask (!%p221_p3), 523264  }
   0x7   : > { %224 = sbr.rel (%p221_p3) target bundleno = 288 (0x120), region = 36  ;;  %567 = vmatprep.subr.bf16.mxu1 (!%p221_p3), %v886_v2  ;;  %v752_v3 = vcombine.high (!%p221_p3), %v934_v0, %v934_v0  ;;  %v754_v4 = vcombine.high (!%p221_p3), %v939_v1, %v939_v1  ;;  %v614_v5 = vld [vmem:[%s1015_s2] sm:$0xff] (!%p221_p3)  ;;  %832 = vset.pattern.permute.xlu0 (!%p221_p3), %v886_v2  ;;  %v751_v30 = vcombine.low (!%p221_p3), %v934_v0, %v934_v0  ;;  %v887_v33 = vmov (!%p221_p3), 0.0  }
   0x8   : > { %617 = vperm.xlu0 (!%p221_p3), %832, %v614_v5   ;;  %v753_v32 = vcombine.low (!%p221_p3), %v939_v1, %v939_v1  ;;  %306 = vst.msk [vmem:[#allocation2] sm:$0xff] (!%p221_p3), %vm305_vm1, %v887_v33  ;;  %vm626_vm2 = vcmask (!%p221_p3), 519168  }
   0x9   : > { %559 = vmatprep.mubr.bf16.mxu0 (!%p221_p3), %v752_v3  ;;  %780 = vmatprep.mubr.msk.bf16.mxu1 (!%p221_p3), %vm523_vm0, %v754_v4 }
   0xe   : > { %s1023_s15 = smov (!%p274_p4, %s876_s15), 1 }
   0xf   : > { %s805_s25 = smul.u32 200, %s1023_s15  ;;  %v307_v39 = vld [vmem:[#allocation2] sm:$0xff]  ;;  %s749_s29 = sshll.u32 %s1023_s15, 2 }
  0x10   : > { %s292_s6 = scalar_lea.vmem %s1016_s3, %s749_s29  ;;  %s299_s9 = scalar_lea.vmem %s1017_s4, %s749_s29 }
  0x11   : > { %s956_s28 = scalar_lea.vmem %s1014_s1, %s805_s25  ;;  %v621_v46 = vld [vmem:[%s292_s6] sm:$0xf] }
  0x12   : > { %v833_v6 = vld [vmem:[%s956_s28 + $0x40] sm:$0xff]   ;;  %v836_v9 = vld [vmem:[%s956_s28 + $0x48] sm:$0xff]   ;;  %v839_v12 = vld [vmem:[%s956_s28 + $0x50] sm:$0xff]   ;;  %v622_v48 = vunpack.c.l.bf16 %v621_v46 }
  0x13   : > { %v834_v7 = vld [vmem:[%s956_s28 + $0x80] sm:$0xff]   ;;  %783 = vmatprep.subr.bf16.mxu0 %v833_v6  ;;  %v837_v10 = vld [vmem:[%s956_s28 + $0x88] sm:$0xff]   ;;  %v840_v13 = vld [vmem:[%s956_s28 + $0x90] sm:$0xff]  }
  0x14   : > { %v835_v8 = vld [vmem:[%s956_s28] sm:$0xff]   ;;  %568 = vmatpush1.bf16.msra.mxu1 %v834_v7  ;;  %v838_v11 = vld [vmem:[%s956_s28 + $0x8] sm:$0xff]   ;;  %v841_v14 = vld [vmem:[%s956_s28 + $0x10] sm:$0xff]  }
  0x15   : > { %784 = vmatpush3.bf16.msra.mxu0 %v835_v8  ;;  %569 = vmatprep.subr.bf16.mxu1 %v886_v2  ;;  %v842_v15 = vld [vmem:[%s956_s28 + $0x58] sm:$0xff]   ;;  %v845_v18 = vld [vmem:[%s956_s28 + $0x60] sm:$0xff]   ;;  %v848_v21 = vld [vmem:[%s956_s28 + $0x68] sm:$0xff]  }
  0x16   : > { %785 = vmatprep.subr.bf16.mxu0 %v836_v9  ;;  %v843_v16 = vld [vmem:[%s956_s28 + $0x98] sm:$0xff]   ;;  %v846_v19 = vld [vmem:[%s956_s28 + $0xa0] sm:$0xff]   ;;  %v849_v22 = vld [vmem:[%s956_s28 + $0xa8] sm:$0xff]  }
  0x17   : > { %v844_v17 = vld [vmem:[%s956_s28 + $0x18] sm:$0xff]   ;;  %v847_v20 = vld [vmem:[%s956_s28 + $0x20] sm:$0xff]   ;;  %v850_v23 = vld [vmem:[%s956_s28 + $0x28] sm:$0xff]  }
  0x18   : > { %570 = vmatpush1.bf16.msra.mxu1 %v837_v10  ;;  %v851_v24 = vld [vmem:[%s956_s28 + $0x70] sm:$0xff]   ;;  %v854_v27 = vld [vmem:[%s956_s28 + $0x78] sm:$0xff]   ;;  %v859_v31 = vld [vmem:[%s956_s28 + $0xc0] sm:$0xff]  }
  0x19   : > { %786 = vmatpush3.bf16.msra.mxu0 %v838_v11  ;;  %571 = vmatprep.subr.bf16.mxu1 %v886_v2  ;;  %v852_v25 = vld [vmem:[%s956_s28 + $0xb0] sm:$0xff]   ;;  %v855_v28 = vld [vmem:[%s956_s28 + $0xb8] sm:$0xff]  }
  0x1a   : > { %787 = vmatprep.subr.bf16.mxu0 %v839_v12  ;;  %v853_v26 = vld [vmem:[%s956_s28 + $0x30] sm:$0xff]   ;;  %v856_v29 = vld [vmem:[%s956_s28 + $0x38] sm:$0xff]  }
  0x1c   : > { %572 = vmatpush1.bf16.msra.mxu1 %v840_v13 }
  0x1d   : > { %788 = vmatpush3.bf16.msra.mxu0 %v841_v14  ;;  %573 = vmatprep.subr.bf16.mxu1 %v886_v2 }
  0x1e   : > { %789 = vmatprep.subr.bf16.mxu0 %v842_v15 }
  0x20   : > { %574 = vmatpush1.bf16.msra.mxu1 %v843_v16 }
  0x21   : > { %790 = vmatpush3.bf16.msra.mxu0 %v844_v17  ;;  %575 = vmatprep.subr.bf16.mxu1 %v886_v2 }
  0x22   : > { %791 = vmatprep.subr.bf16.mxu0 %v845_v18 }
  0x24   : > { %576 = vmatpush1.bf16.msra.mxu1 %v846_v19 }
  0x25   : > { %792 = vmatpush3.bf16.msra.mxu0 %v847_v20  ;;  %577 = vmatprep.subr.bf16.mxu1 %v886_v2 }
  0x26   : > { %793 = vmatprep.subr.bf16.mxu0 %v848_v21 }
  0x28   : > { %578 = vmatpush1.bf16.msra.mxu1 %v849_v22 }
  0x29   : > { %794 = vmatpush3.bf16.msra.mxu0 %v850_v23  ;;  %579 = vmatprep.subr.bf16.mxu1 %v886_v2 }
  0x2a   : > { %795 = vmatprep.subr.bf16.mxu0 %v851_v24 }
  0x2c   : > { %580 = vmatpush1.bf16.msra.mxu1 %v852_v25 }
  0x2d   : > { %796 = vmatpush3.bf16.msra.mxu0 %v853_v26  ;;  %581 = vmatprep.subr.bf16.mxu1 %v886_v2 }
  0x2e   : > { %797 = vmatprep.subr.bf16.mxu0 %v854_v27 }
  0x30   : > { %582 = vmatpush1.bf16.msra.mxu1 %v855_v28 }
  0x31   : > { %798 = vmatpush3.bf16.msra.mxu0 %v856_v29  ;;  %583 = vmatprep.subr.bf16.mxu1 %v886_v2 }
  0x34   : > { %560 = vmatmul.mubr.bf16.vlgmr.msra.gmra.mrb[0].mxu0 %v751_v30  ;;  %584 = vmatpush1.bf16.msra.mxu1 %v859_v31 }
  0x37   : > { %600 = vmatmul.mubr.bf16.vlgmr.msra.gmra.mrb[0].mxu1 %v753_v32 }
  0x87   : > { %v618_v47 = vpop.permute.xlu0 %617 }
 0x107   : > { %v799_v34 = vpop.f32.mrb[0].mxu0 }
 0x108   : > { %v800_v35 = vpop.f32.mrb[1].mxu0 }
 0x109   : > { %v801_v36 = vadd.f32 %v800_v35, %v799_v34  ;;  %v802_v37 = vpop.f32.mrb[2].mxu0 }
 0x10a   : > { %v803_v38 = vpop.f32.mrb[3].mxu0  ;;  %v601_v40 = vpop.f32.mrb[0].mxu1 }
 0x10b   : > { %v602_v41 = vadd.f32 %v801_v36, %v601_v40  ;;  %v603_v42 = vpop.f32.mrb[1].mxu1 }
 0x10c   : > { %v604_v43 = vpop.f32.mrb[2].mxu1 }
 0x10d   : > { %v607_v44 = vadd.f32 %v602_v41, %v307_v39  ;;  %v605_v45 = vpop.f32.mrb[3].mxu1 }
 0x10f   : > { %609 = vst.msk [vmem:[#allocation2] sm:$0xff] %vm305_vm1, %v607_v44 }
 0x116   : > { %v613_v49 = vld [vmem:[#allocation2] sm:$0xff] }
 0x117   : > { %v620_v50 = vadd.f32 %v618_v47, %v613_v49 }
 0x119   : > { %v623_v51 = vadd.f32 %v622_v48, %v620_v50 }
 0x11b   : > { %v624_v52 = vmax.f32 %v623_v51, 0.0 }
 0x11d   : > { %v625_v53 = vpack.c.bf16 %v624_v52, %v624_v52 }
 0x11f   : > { %627 = vst.msk [vmem:[%s299_s9] sm:$0xf] %vm626_vm2, %v625_v53 }
 0x120 PF: > { %s14_s17 = sadd.s32 1, %s884_s17   ;;  %s1018_s15 = smov %s880_s16 }
 0x121   : > { %p11_p5 = scmp.ge.s32.totalorder %s14_s17, 4   ;;  %s1019_s16 = smov %s1021_s18 }
 0x123   :  { %13 = sbr.rel (!%p11_p5) target bundleno = 2 (0x2), region = 80 }

// kernel: d_forward.26
= control target key start
LH: loop header
LB: loop body
LE: loop exit
PB: predicated region body
PF: predicated region fallthrough
CT: control target
= control target key end

     0   :  { %s416_s12 = smov 0   ;;  %s439_s0 = inlined_call_operand.vmem [shape: bf16[16,8], index: 0, kind: input, shape index: {}]   ;;  %s440_s1 = inlined_call_operand.vmem [shape: bf16[16,8,8], index: 1, kind: input, shape index: {}]   ;;  %s441_s2 = inlined_call_operand.vmem [shape: bf16[8,16], index: 2, kind: input, shape index: {}]   ;;  %s442_s3 = inlined_call_operand.vmem [shape: bf16[16,16,16], index: 3, kind: output, shape index: {}]  }
   0x1 LB: > { %s341_s13 = sadd.s32 4294967295, %s392_s12   ;;  %p345_p0 = scmp.ge.s32.totalorder %s392_s12, 1  ;;  %s392_s12 = sphi %s416_s12, %s13_s12  }
   0x2   : > { %p136_p1 = scmp.lt.s32.totalorder %s392_s12, 17 }
   0x4   : > { %p137_p2 = pnand %p345_p0, %p136_p1 }
   0x5   : > { %p159_p3 = scmp.lt.s32.totalorder (!%p137_p2), %s341_s13, 15  ;;  %v394_v0 = vmov (!%p137_p2), 0.0   ;;  %vm395_vm0 = vmmov (!%p137_p2), 0   ;;  %vm181_vm1 = vcmask (!%p137_p2), 1043456   ;;  %v385_v3 = vld [vmem:[%s439_s0] sm:$0xff] (!%p137_p2)   ;;  %vm177_vm2 = vcmask (!%p137_p2), 64512  }
   0x6   : > { %140 = sbr.rel (%p137_p2) target bundleno = 454 (0x1c6), region = 32  ;;  %363 = vmatprep.subr.bf16.mxu0 (!%p137_p2), %v394_v0  ;;  %365 = vmatprep.mubr.msk.bf16.mxu0 (!%p137_p2), %vm395_vm0, %v394_v0  ;;  %v227_v4 = vld [vmem:[%s441_s2] sm:$0xf] (!%p137_p2)  ;;  %vm283_vm3 = vcmask (!%p137_p2), 125952  }
   0x7   : > { %369 = vmatprep.subr.bf16.mxu1 (!%p137_p2), %v394_v0  ;;  %371 = vmatprep.mubr.msk.bf16.mxu1 (!%p137_p2), %vm395_vm0, %v394_v0  ;;  %v232_v5 = vsel (!%p137_p2), %vm181_vm1, %v227_v4, 0 }
   0x8   : > { %370 = vmatpush3.bf16.msra.mxu1 (!%p137_p2), %v232_v5 }
   0xd   : > { %s444_s13 = smov (!%p159_p3, %s341_s13), 15 }
   0xe   : > { %s346_s14 = sshll.u32 %s444_s13, 2  ;;  %s356_s22 = sshll.u32 %s444_s13, 3 }
   0xf   : > { %s162_s17 = scalar_lea.vmem %s440_s1, %s346_s14  ;;  %s167_s25 = scalar_lea.vmem %s442_s3, %s356_s22 }
  0x10   : > { %v171_v1 = vld [vmem:[%s162_s17] sm:$0xf] }
  0x11   : > { %v183_v2 = vsel %vm181_vm1, %v171_v1, 0 }
  0x12   : > { %364 = vmatpush3.bf16.msra.mxu0 %v183_v2 }
  0x15   : > { %366 = vmatmul.mubr.msk.bf16.vlgmr.msra.gmra.mrb[0].mxu0 %vm177_vm2, %v385_v3 }
  0xe8   : > { %v219_v6 = vpop.f32.mrb[0].mxu0 }
  0xe9   : > { %v367_v7 = vpop.f32.mrb[1].mxu0 }
  0xea   : > { %v222_v8 = vpop.f32.mrb[2].mxu0 }
  0xeb   : > { %v226_v9 = vpack.c.bf16 %v222_v8, %v219_v6  ;;  %v368_v10 = vpop.f32.mrb[3].mxu0 }
  0xed   : > { %372 = vmatmul.mubr.msk.bf16.vlgmr.msra.gmra.mrb[0].mxu1 %vm177_vm2, %v226_v9 }
 0x1c0   : > { %v268_v11 = vpop.f32.mrb[0].mxu1 }
 0x1c1   : > { %v357_v12 = vpack.c.bf16 %v268_v11, %v268_v11  ;;  %v373_v13 = vpop.f32.mrb[1].mxu1 }
 0x1c2   : > { %v271_v14 = vpop.f32.mrb[2].mxu1 }
 0x1c3   : > { %284 = vst.msk [vmem:[%s167_s25] sm:$0xf] %vm283_vm3, %v357_v12  ;;  %v358_v15 = vpack.c.bf16 %v271_v14, %v271_v14  ;;  %v374_v16 = vpop.f32.mrb[3].mxu1 }
 0x1c5   : > { %285 = vst.msk [vmem:[%s167_s25 + $0x4] sm:$0xf] %vm283_vm3, %v358_v15 }
 0x1c6 PF: > { %s13_s12 = sadd.s32 1, %s392_s12  }
 0x1c7   : > { %p10_p4 = scmp.ge.s32.totalorder %s13_s12, 18  }
 0x1c9   :  { %12 = sbr.rel (!%p10_p4) target bundleno = 1 (0x1), region = 62 }

// kernel: d_forward.27
= control target key start
LH: loop header
LB: loop body
LE: loop exit
PB: predicated region body
PF: predicated region fallthrough
CT: control target
= control target key end

     0   :  { %s786_s12 = smov 0   ;;  %s788_s13 = smov 0   ;;  %s861_s0 = inlined_call_operand.vmem [shape: bf16[4,200], index: 0, kind: input, shape index: {}]   ;;  %s862_s1 = inlined_call_operand.vmem [shape: bf16[2,200,256], index: 1, kind: input, shape index: {}]   ;;  %s863_s2 = inlined_call_operand.vmem [shape: f32[4,1], index: 2, kind: input, shape index: {}]   ;;  %s864_s3 = inlined_call_operand.vmem [shape: bf16[2,4,256], index: 3, kind: output, shape index: {}]  }
   0x1   :  { %s790_s14 = smov 0  }
   0x2 LB: > { %s32_s15 = sadd.s32 1, %s758_s13  ;;  %p636_p0 = scmp.ge.s32.totalorder %s762_s14, 1  ;;  %s762_s14 = sphi %s790_s14, %s13_s14   ;;  %s758_s13 = sphi %s788_s13, %s866_s13   ;;  %s754_s12 = sphi %s786_s12, %s865_s12  }
   0x3   : > { %p34_p1 = scmp.ge.s32.totalorder %s32_s15, 2  ;;  %p184_p2 = scmp.lt.s32.totalorder %s762_s14, 3 }
   0x5   : > { %s868_s15 = smov (%p34_p1, %s32_s15), 0  ;;  %p185_p3 = pnand %p636_p0, %p184_p2 }
   0x6   : > { %p234_p4 = scmp.lt.s32.totalorder (!%p185_p3), %s754_s12, 1  ;;  %v807_v0 = vld.sshfl [vmem:[%s861_s0] sm:$0x33 pattern:$0x76325410] (!%p185_p3)  ;;  %vm426_vm0 = vcmask (!%p185_p3), 588800   ;;  %v496_v34 = vlaneseq (!%p185_p3) }
   0x7   : > { %188 = sbr.rel (%p185_p3) target bundleno = 295 (0x127), region = 32  ;;  %v299_v1 = vcombine.high (!%p185_p3), %v807_v0, %v807_v0  ;;  %v488_v2 = vld [vmem:[%s863_s2] sm:$0xf] (!%p185_p3)  ;;  %v764_v3 = vmov (!%p185_p3), 0   ;;  %vm430_vm1 = vcmask (!%p185_p3), 1043456  }
   0x8   : > { %701 = vset.pattern.permute.xlu0 (!%p185_p3), %v764_v3  ;;  %v765_v32 = vmov (!%p185_p3), 839922192   ;;  %v497_v36 = vshrl.u32 (!%p185_p3), %v496_v34, 7 }
   0x9   : > { %668 = vmatprep.mubr.msk.bf16.mxu0 (!%p185_p3), %vm426_vm0, %v299_v1  ;;  %491 = vperm.xlu0 (!%p185_p3), %701, %v488_v2   ;;  %v494_v33 = vunpack.c.l.s4 (!%p185_p3), %v765_v32 }
   0xb   : > { %v495_v35 = vunpack.c.0.s8 (!%p185_p3), %v494_v33 }
   0xd   : > { %v498_v37 = vsub.s32 (!%p185_p3), %v495_v35, %v497_v36 }
   0xe   : > { %s870_s12 = smov (!%p234_p4, %s754_s12), 1 }
   0xf   : > { %s674_s20 = smul.u32 200, %s870_s12  ;;  %s673_s24 = sshll.u32 %s870_s12, 2 }
  0x10   : > { %s256_s27 = scalar_lea.vmem %s864_s3, %s673_s24 }
  0x11   : > { %s820_s23 = scalar_lea.vmem %s862_s1, %s674_s20 }
  0x12   : > { %v702_v4 = vld [vmem:[%s820_s23 + $0x4] ss:$8 sps:$4 sm:$0xff]   ;;  %v704_v5 = vld [vmem:[%s820_s23] ss:$8 sps:$4 sm:$0xff]   ;;  %v705_v6 = vld [vmem:[%s820_s23 + $0x14] ss:$8 sps:$4 sm:$0xff]  }
  0x13   : > { %437 = vmatprep.subr.bf16.mxu0 %v702_v4  ;;  %v707_v7 = vld [vmem:[%s820_s23 + $0x10] ss:$8 sps:$4 sm:$0xff]   ;;  %v708_v8 = vld [vmem:[%s820_s23 + $0x24] ss:$8 sps:$4 sm:$0xff]   ;;  %v710_v9 = vld [vmem:[%s820_s23 + $0x20] ss:$8 sps:$4 sm:$0xff]  }
  0x14   : > { %438 = vmatpush1.bf16.msra.mxu0 %v704_v5  ;;  %v711_v10 = vld [vmem:[%s820_s23 + $0x34] ss:$8 sps:$4 sm:$0xff]   ;;  %v713_v11 = vld [vmem:[%s820_s23 + $0x30] ss:$8 sps:$4 sm:$0xff]   ;;  %v714_v12 = vld [vmem:[%s820_s23 + $0x44] ss:$8 sps:$4 sm:$0xff]  }
  0x15   : > { %439 = vmatprep.subr.bf16.mxu0 %v705_v6  ;;  %v716_v13 = vld [vmem:[%s820_s23 + $0x40] ss:$8 sps:$4 sm:$0xff]   ;;  %v717_v14 = vld [vmem:[%s820_s23 + $0x54] ss:$8 sps:$4 sm:$0xff]   ;;  %v719_v15 = vld [vmem:[%s820_s23 + $0x50] ss:$8 sps:$4 sm:$0xff]  }
  0x16   : > { %v720_v16 = vld [vmem:[%s820_s23 + $0x64] ss:$8 sps:$4 sm:$0xff]   ;;  %v722_v17 = vld [vmem:[%s820_s23 + $0x60] ss:$8 sps:$4 sm:$0xff]   ;;  %v723_v18 = vld [vmem:[%s820_s23 + $0x74] ss:$8 sps:$4 sm:$0xff]  }
  0x17   : > { %v725_v19 = vld [vmem:[%s820_s23 + $0x70] ss:$8 sps:$4 sm:$0xff]   ;;  %v726_v20 = vld [vmem:[%s820_s23 + $0x84] ss:$8 sps:$4 sm:$0xff]   ;;  %v728_v21 = vld [vmem:[%s820_s23 + $0x80] ss:$8 sps:$4 sm:$0xff]  }
  0x18   : > { %440 = vmatpush1.bf16.msra.mxu0 %v707_v7  ;;  %v729_v22 = vld [vmem:[%s820_s23 + $0x94] ss:$8 sps:$4 sm:$0xff]   ;;  %v731_v23 = vld [vmem:[%s820_s23 + $0x90] ss:$8 sps:$4 sm:$0xff]   ;;  %v732_v24 = vld [vmem:[%s820_s23 + $0xa4] ss:$8 sps:$4 sm:$0xff]  }
  0x19   : > { %441 = vmatprep.subr.bf16.mxu0 %v708_v8  ;;  %v734_v25 = vld [vmem:[%s820_s23 + $0xa0] ss:$8 sps:$4 sm:$0xff]   ;;  %v735_v26 = vld [vmem:[%s820_s23 + $0xb4] ss:$8 sps:$4 sm:$0xff]   ;;  %v737_v28 = vld [vmem:[%s820_s23 + $0xb0] ss:$8 sps:$4 sm:$0xff]  }
  0x1a   : > { %v290_v27 = vld [vmem:[%s820_s23 + $0xc0] sm:$0xff] }
  0x1b   : > { %v666_v29 = vcombine.high %v290_v27, %v290_v27  ;;  %v665_v30 = vcombine.low %v290_v27, %v290_v27 }
  0x1c   : > { %442 = vmatpush1.bf16.msra.mxu0 %v710_v9 }
  0x1d   : > { %443 = vmatprep.subr.bf16.mxu0 %v711_v10  ;;  %v432_v31 = vsel %vm430_vm1, %v665_v30, 0 }
  0x20   : > { %444 = vmatpush1.bf16.msra.mxu0 %v713_v11 }
  0x21   : > { %445 = vmatprep.subr.bf16.mxu0 %v714_v12 }
  0x24   : > { %446 = vmatpush1.bf16.msra.mxu0 %v716_v13 }
  0x25   : > { %447 = vmatprep.subr.bf16.mxu0 %v717_v14 }
  0x28   : > { %448 = vmatpush1.bf16.msra.mxu0 %v719_v15 }
  0x29   : > { %449 = vmatprep.subr.bf16.mxu0 %v720_v16 }
  0x2c   : > { %450 = vmatpush1.bf16.msra.mxu0 %v722_v17 }
  0x2d   : > { %451 = vmatprep.subr.bf16.mxu0 %v723_v18 }
  0x30   : > { %452 = vmatpush1.bf16.msra.mxu0 %v725_v19 }
  0x31   : > { %453 = vmatprep.subr.bf16.mxu0 %v726_v20 }
  0x34   : > { %454 = vmatpush1.bf16.msra.mxu0 %v728_v21 }
  0x35   : > { %455 = vmatprep.subr.bf16.mxu0 %v729_v22 }
  0x38   : > { %456 = vmatpush1.bf16.msra.mxu0 %v731_v23 }
  0x39   : > { %457 = vmatprep.subr.bf16.mxu0 %v732_v24 }
  0x3c   : > { %458 = vmatpush1.bf16.msra.mxu0 %v734_v25 }
  0x3d   : > { %459 = vmatprep.subr.bf16.mxu0 %v735_v26 }
  0x40   : > { %460 = vmatpush1.bf16.msra.mxu0 %v737_v28 }
  0x41   : > { %667 = vmatprep.subr.msk.bf16.mxu0 %vm430_vm1, %v666_v29 }
  0x44   : > { %462 = vmatpush1.bf16.msra.mxu0 %v432_v31 }
  0x47   : > { %470 = vmatmul.mubr.bf16.vlgmr.msra.gmra.mrb[0].mxu0 %v807_v0 }
  0x88   : > { %v492_v38 = vpop.permute.xlu0 %491 }
  0x89   : > { %v499_v40 = vrot.slane %v492_v38, %v498_v37 }
 0x11a   : > { %v471_v39 = vpop.f32.mrb[0].mxu0 }
 0x11b   : > { %v473_v41 = vpop.f32.mrb[1].mxu0 }
 0x11c   : > { %v480_v42 = vcombine.low %v471_v39, %v473_v41  ;;  %v475_v43 = vpop.f32.mrb[2].mxu0 }
 0x11d   : > { %v476_v44 = vpop.f32.mrb[3].mxu0 }
 0x11e   : > { %v501_v45 = vadd.f32 %v499_v40, %v480_v42 }
 0x120   : > { %v502_v46 = vmax.f32 %v501_v45, 0.0 }
 0x122   : > { %v504_v47 = vcombine.high %v502_v46, %v502_v46 }
 0x124   : > { %v669_v48 = vpack.c.bf16 %v504_v47, %v502_v46 }
 0x126   : > { %670 = vst.sshfl [vmem:[%s256_s27] sm:$0x33 pattern:$0x76325410] %v669_v48 }
 0x127 PF: > { %s13_s14 = sadd.s32 1, %s762_s14   ;;  %s865_s12 = smov %s758_s13 }
 0x128   : > { %p10_p5 = scmp.ge.s32.totalorder %s13_s14, 4   ;;  %s866_s13 = smov %s868_s15 }
 0x12a   :  { %12 = sbr.rel (!%p10_p5) target bundleno = 2 (0x2), region = 73 }

// kernel: d_forward.28
= control target key start
LH: loop header
LB: loop body
LE: loop exit
PB: predicated region body
PF: predicated region fallthrough
CT: control target
= control target key end

     0   :  { %s599_s12 = smov 0   ;;  %s601_s13 = smov 0   ;;  %s642_s0 = inlined_call_operand.vmem [shape: bf16[4,36], index: 0, kind: input, shape index: {}]   ;;  %s643_s1 = inlined_call_operand.vmem [shape: bf16[2,36,256], index: 1, kind: input, shape index: {}]   ;;  %s644_s2 = inlined_call_operand.vmem [shape: f32[4,1], index: 2, kind: input, shape index: {}]   ;;  %s645_s3 = inlined_call_operand.vmem [shape: bf16[2,4,256], index: 3, kind: output, shape index: {}]  }
   0x1   :  { %s603_s14 = smov 0  }
   0x2 LB: > { %s32_s15 = sadd.s32 1, %s571_s13  ;;  %p500_p0 = scmp.ge.s32.totalorder %s575_s14, 1  ;;  %s575_s14 = sphi %s603_s14, %s13_s14   ;;  %s571_s13 = sphi %s601_s13, %s647_s13   ;;  %s567_s12 = sphi %s599_s12, %s646_s12  }
   0x3   : > { %p34_p1 = scmp.ge.s32.totalorder %s32_s15, 2  ;;  %p182_p2 = scmp.lt.s32.totalorder %s575_s14, 3 }
   0x5   : > { %s649_s15 = smov (%p34_p1, %s32_s15), 0  ;;  %p183_p3 = pnand %p500_p0, %p182_p2 }
   0x6   : > { %p229_p4 = scmp.lt.s32.totalorder (!%p183_p3), %s567_s12, 1  ;;  %v577_v0 = vmov (!%p183_p3), 0   ;;  %v353_v1 = vld [vmem:[%s644_s2] sm:$0xf] (!%p183_p3)  ;;  %vm295_vm0 = vcmask (!%p183_p3), 1041408   ;;  %vm291_vm1 = vcmask (!%p183_p3), 293888   ;;  %v361_v13 = vlaneseq (!%p183_p3) }
   0x7   : > { %186 = sbr.rel (%p183_p3) target bundleno = 253 (0xfd), region = 32  ;;  %334 = vmatprep.mubr.bf16.mxu0 (!%p183_p3), %v577_v0  ;;  %544 = vset.pattern.permute.xlu0 (!%p183_p3), %v577_v0  ;;  %v260_v10 = vld [vmem:[%s642_s0] sm:$0x3] (!%p183_p3)  ;;  %v578_v11 = vmov (!%p183_p3), 839922192  }
   0x8   : > { %356 = vperm.xlu0 (!%p183_p3), %544, %v353_v1   ;;  %v359_v12 = vunpack.c.l.s4 (!%p183_p3), %v578_v11  ;;  %v362_v15 = vshrl.u32 (!%p183_p3), %v361_v13, 7 }
   0xa   : > { %v360_v14 = vunpack.c.0.s8 (!%p183_p3), %v359_v12 }
   0xc   : > { %v363_v16 = vsub.s32 (!%p183_p3), %v360_v14, %v362_v15 }
   0xe   : > { %s651_s12 = smov (!%p229_p4, %s567_s12), 1 }
   0xf   : > { %s517_s18 = smul.u32 40, %s651_s12  ;;  %s516_s24 = sshll.u32 %s651_s12, 2 }
  0x10   : > { %s251_s27 = scalar_lea.vmem %s645_s3, %s516_s24 }
  0x11   : > { %s240_s21 = scalar_lea.vmem %s643_s1, %s517_s18 }
  0x12   : > { %v545_v2 = vld [vmem:[%s240_s21 + $0x4] ss:$8 sps:$4 sm:$0xff]   ;;  %v547_v3 = vld [vmem:[%s240_s21] ss:$8 sps:$4 sm:$0xff]   ;;  %v548_v4 = vld [vmem:[%s240_s21 + $0x14] ss:$8 sps:$4 sm:$0xff]  }
  0x13   : > { %302 = vmatprep.subr.bf16.mxu0 %v545_v2  ;;  %v265_v5 = vld [vmem:[%s240_s21 + $0x20] sm:$0x33]  ;;  %v550_v6 = vld [vmem:[%s240_s21 + $0x10] ss:$8 sps:$4 sm:$0xff]  }
  0x14   : > { %303 = vmatpush1.bf16.msra.mxu0 %v547_v3  ;;  %v509_v7 = vcombine.high %v265_v5, %v265_v5  ;;  %v508_v8 = vcombine.low %v265_v5, %v265_v5 }
  0x15   : > { %304 = vmatprep.subr.bf16.mxu0 %v548_v4 }
  0x16   : > { %v297_v9 = vsel %vm295_vm0, %v508_v8, 0 }
  0x18   : > { %305 = vmatpush1.bf16.msra.mxu0 %v550_v6 }
  0x19   : > { %510 = vmatprep.subr.msk.bf16.mxu0 %vm295_vm0, %v509_v7 }
  0x1c   : > { %307 = vmatpush1.bf16.msra.mxu0 %v297_v9 }
  0x1f   : > { %511 = vmatmul.mubr.msk.bf16.vlgmr.msra.gmra.mrb[0].mxu0 %vm291_vm1, %v260_v10 }
  0x87   : > { %v357_v17 = vpop.permute.xlu0 %356 }
  0x88   : > { %v364_v19 = vrot.slane %v357_v17, %v363_v16 }
  0xf2   : > { %v336_v18 = vpop.f32.mrb[0].mxu0 }
  0xf3   : > { %v338_v20 = vpop.f32.mrb[1].mxu0 }
  0xf4   : > { %v345_v21 = vcombine.low %v336_v18, %v338_v20  ;;  %v340_v22 = vpop.f32.mrb[2].mxu0 }
  0xf5   : > { %v341_v23 = vpop.f32.mrb[3].mxu0 }
  0xf6   : > { %v366_v24 = vadd.f32 %v364_v19, %v345_v21 }
  0xf8   : > { %v368_v25 = vcombine.high %v366_v24, %v366_v24 }
  0xfa   : > { %v512_v26 = vpack.c.bf16 %v368_v25, %v366_v24 }
  0xfc   : > { %513 = vst.sshfl [vmem:[%s251_s27] sm:$0x33 pattern:$0x76325410] %v512_v26 }
  0xfd PF: > { %s13_s14 = sadd.s32 1, %s575_s14   ;;  %s646_s12 = smov %s571_s13 }
  0xfe   : > { %p10_p5 = scmp.ge.s32.totalorder %s13_s14, 4   ;;  %s647_s13 = smov %s649_s15 }
 0x100   :  { %12 = sbr.rel (!%p10_p5) target bundleno = 2 (0x2), region = 73 }

// kernel: d_forward.29
= control target key start
LH: loop header
LB: loop body
LE: loop exit
PB: predicated region body
PF: predicated region fallthrough
CT: control target
= control target key end

     0   :  { %s878_s15 = smov 0   ;;  %s880_s16 = smov 0   ;;  %s956_s0 = inlined_call_operand.vmem [shape: bf16[4,200], index: 0, kind: input, shape index: {}]   ;;  %s957_s1 = inlined_call_operand.vmem [shape: bf16[2,200,256], index: 1, kind: input, shape index: {}]   ;;  %s958_s2 = inlined_call_operand.vmem [shape: f32[4,1], index: 2, kind: input, shape index: {}]   ;;  %s959_s3 = inlined_call_operand.vmem [shape: bf16[2,4,256], index: 3, kind: input, shape index: {}]   ;;  %s960_s4 = inlined_call_operand.vmem [shape: bf16[2,4,256], index: 4, kind: output, shape index: {}]  }
   0x1   :  { %s882_s17 = smov 0  }
   0x2 LB: > { %s33_s18 = sadd.s32 1, %s845_s16  ;;  %p720_p0 = scmp.ge.s32.totalorder %s849_s17, 1  ;;  %s849_s17 = sphi %s882_s17, %s14_s17   ;;  %s845_s16 = sphi %s880_s16, %s962_s16   ;;  %s841_s15 = sphi %s878_s15, %s961_s15  }
   0x3   : > { %p35_p1 = scmp.ge.s32.totalorder %s33_s18, 2  ;;  %p226_p2 = scmp.lt.s32.totalorder %s849_s17, 3 }
   0x5   : > { %s964_s18 = smov (%p35_p1, %s33_s18), 0  ;;  %p227_p3 = pnand %p720_p0, %p226_p2 }
   0x6   : > { %p287_p4 = scmp.lt.s32.totalorder (!%p227_p3), %s841_s15, 1  ;;  %v899_v0 = vld.sshfl [vmem:[%s956_s0] sm:$0x33 pattern:$0x76325410] (!%p227_p3)  ;;  %vm489_vm0 = vcmask (!%p227_p3), 588800   ;;  %v559_v34 = vlaneseq (!%p227_p3) }
   0x7   : > { %230 = sbr.rel (%p227_p3) target bundleno = 297 (0x129), region = 36  ;;  %v362_v1 = vcombine.high (!%p227_p3), %v899_v0, %v899_v0  ;;  %v551_v2 = vld [vmem:[%s958_s2] sm:$0xf] (!%p227_p3)  ;;  %v851_v3 = vmov (!%p227_p3), 0   ;;  %vm493_vm1 = vcmask (!%p227_p3), 1043456  }
   0x8   : > { %788 = vset.pattern.permute.xlu0 (!%p227_p3), %v851_v3  ;;  %v852_v32 = vmov (!%p227_p3), 839922192   ;;  %v560_v36 = vshrl.u32 (!%p227_p3), %v559_v34, 7 }
   0x9   : > { %754 = vmatprep.mubr.msk.bf16.mxu0 (!%p227_p3), %vm489_vm0, %v362_v1  ;;  %554 = vperm.xlu0 (!%p227_p3), %788, %v551_v2   ;;  %v557_v33 = vunpack.c.l.s4 (!%p227_p3), %v852_v32 }
   0xb   : > { %v558_v35 = vunpack.c.0.s8 (!%p227_p3), %v557_v33 }
   0xd   : > { %v561_v37 = vsub.s32 (!%p227_p3), %v558_v35, %v560_v36 }
   0xe   : > { %s966_s15 = smov (!%p287_p4, %s841_s15), 1 }
   0xf   : > { %s761_s23 = smul.u32 200, %s966_s15  ;;  %s759_s27 = sshll.u32 %s966_s15, 2 }
  0x10   : > { %s309_s30 = scalar_lea.vmem %s959_s3, %s759_s27  ;;  %s319_s7 = scalar_lea.vmem %s960_s4, %s759_s27 }
  0x11   : > { %s912_s26 = scalar_lea.vmem %s957_s1, %s761_s23  ;;  %v565_v39 = vld [vmem:[%s309_s30] sm:$0xf] }
  0x12   : > { %v789_v4 = vld [vmem:[%s912_s26 + $0x4] ss:$8 sps:$4 sm:$0xff]   ;;  %v791_v5 = vld [vmem:[%s912_s26] ss:$8 sps:$4 sm:$0xff]   ;;  %v792_v6 = vld [vmem:[%s912_s26 + $0x14] ss:$8 sps:$4 sm:$0xff]   ;;  %v566_v44 = vunpack.c.l.bf16 %v565_v39 }
  0x13   : > { %500 = vmatprep.subr.bf16.mxu0 %v789_v4  ;;  %v794_v7 = vld [vmem:[%s912_s26 + $0x10] ss:$8 sps:$4 sm:$0xff]   ;;  %v795_v8 = vld [vmem:[%s912_s26 + $0x24] ss:$8 sps:$4 sm:$0xff]   ;;  %v797_v9 = vld [vmem:[%s912_s26 + $0x20] ss:$8 sps:$4 sm:$0xff]  }
  0x14   : > { %501 = vmatpush1.bf16.msra.mxu0 %v791_v5  ;;  %v798_v10 = vld [vmem:[%s912_s26 + $0x34] ss:$8 sps:$4 sm:$0xff]   ;;  %v800_v11 = vld [vmem:[%s912_s26 + $0x30] ss:$8 sps:$4 sm:$0xff]   ;;  %v801_v12 = vld [vmem:[%s912_s26 + $0x44] ss:$8 sps:$4 sm:$0xff]  }
  0x15   : > { %502 = vmatprep.subr.bf16.mxu0 %v792_v6  ;;  %v803_v13 = vld [vmem:[%s912_s26 + $0x40] ss:$8 sps:$4 sm:$0xff]   ;;  %v804_v14 = vld [vmem:[%s912_s26 + $0x54] ss:$8 sps:$4 sm:$0xff]   ;;  %v806_v15 = vld [vmem:[%s912_s26 + $0x50] ss:$8 sps:$4 sm:$0xff]  }
  0x16   : > { %v807_v16 = vld [vmem:[%s912_s26 + $0x64] ss:$8 sps:$4 sm:$0xff]   ;;  %v809_v17 = vld [vmem:[%s912_s26 + $0x60] ss:$8 sps:$4 sm:$0xff]   ;;  %v810_v18 = vld [vmem:[%s912_s26 + $0x74] ss:$8 sps:$4 sm:$0xff]  }
  0x17   : > { %v812_v19 = vld [vmem:[%s912_s26 + $0x70] ss:$8 sps:$4 sm:$0xff]   ;;  %v813_v20 = vld [vmem:[%s912_s26 + $0x84] ss:$8 sps:$4 sm:$0xff]   ;;  %v815_v21 = vld [vmem:[%s912_s26 + $0x80] ss:$8 sps:$4 sm:$0xff]  }
  0x18   : > { %503 = vmatpush1.bf16.msra.mxu0 %v794_v7  ;;  %v816_v22 = vld [vmem:[%s912_s26 + $0x94] ss:$8 sps:$4 sm:$0xff]   ;;  %v818_v23 = vld [vmem:[%s912_s26 + $0x90] ss:$8 sps:$4 sm:$0xff]   ;;  %v819_v24 = vld [vmem:[%s912_s26 + $0xa4] ss:$8 sps:$4 sm:$0xff]  }
  0x19   : > { %504 = vmatprep.subr.bf16.mxu0 %v795_v8  ;;  %v821_v25 = vld [vmem:[%s912_s26 + $0xa0] ss:$8 sps:$4 sm:$0xff]   ;;  %v822_v26 = vld [vmem:[%s912_s26 + $0xb4] ss:$8 sps:$4 sm:$0xff]   ;;  %v824_v28 = vld [vmem:[%s912_s26 + $0xb0] ss:$8 sps:$4 sm:$0xff]  }
  0x1a   : > { %v353_v27 = vld [vmem:[%s912_s26 + $0xc0] sm:$0xff] }
  0x1b   : > { %v752_v29 = vcombine.high %v353_v27, %v353_v27  ;;  %v751_v30 = vcombine.low %v353_v27, %v353_v27 }
  0x1c   : > { %505 = vmatpush1.bf16.msra.mxu0 %v797_v9 }
  0x1d   : > { %506 = vmatprep.subr.bf16.mxu0 %v798_v10  ;;  %v495_v31 = vsel %vm493_vm1, %v751_v30, 0 }
  0x20   : > { %507 = vmatpush1.bf16.msra.mxu0 %v800_v11 }
  0x21   : > { %508 = vmatprep.subr.bf16.mxu0 %v801_v12 }
  0x24   : > { %509 = vmatpush1.bf16.msra.mxu0 %v803_v13 }
  0x25   : > { %510 = vmatprep.subr.bf16.mxu0 %v804_v14 }
  0x28   : > { %511 = vmatpush1.bf16.msra.mxu0 %v806_v15 }
  0x29   : > { %512 = vmatprep.subr.bf16.mxu0 %v807_v16 }
  0x2c   : > { %513 = vmatpush1.bf16.msra.mxu0 %v809_v17 }
  0x2d   : > { %514 = vmatprep.subr.bf16.mxu0 %v810_v18 }
  0x30   : > { %515 = vmatpush1.bf16.msra.mxu0 %v812_v19 }
  0x31   : > { %516 = vmatprep.subr.bf16.mxu0 %v813_v20 }
  0x34   : > { %517 = vmatpush1.bf16.msra.mxu0 %v815_v21 }
  0x35   : > { %518 = vmatprep.subr.bf16.mxu0 %v816_v22 }
  0x38   : > { %519 = vmatpush1.bf16.msra.mxu0 %v818_v23 }
  0x39   : > { %520 = vmatprep.subr.bf16.mxu0 %v819_v24 }
  0x3c   : > { %521 = vmatpush1.bf16.msra.mxu0 %v821_v25 }
  0x3d   : > { %522 = vmatprep.subr.bf16.mxu0 %v822_v26 }
  0x40   : > { %523 = vmatpush1.bf16.msra.mxu0 %v824_v28 }
  0x41   : > { %753 = vmatprep.subr.msk.bf16.mxu0 %vm493_vm1, %v752_v29 }
  0x44   : > { %525 = vmatpush1.bf16.msra.mxu0 %v495_v31 }
  0x47   : > { %533 = vmatmul.mubr.bf16.vlgmr.msra.gmra.mrb[0].mxu0 %v899_v0 }
  0x88   : > { %v555_v38 = vpop.permute.xlu0 %554 }
  0x89   : > { %v562_v41 = vrot.slane %v555_v38, %v561_v37 }
 0x11a   : > { %v534_v40 = vpop.f32.mrb[0].mxu0 }
 0x11b   : > { %v536_v42 = vpop.f32.mrb[1].mxu0 }
 0x11c   : > { %v543_v43 = vcombine.low %v534_v40, %v536_v42  ;;  %v538_v45 = vpop.f32.mrb[2].mxu0 }
 0x11d   : > { %v539_v46 = vpop.f32.mrb[3].mxu0 }
 0x11e   : > { %v564_v47 = vadd.f32 %v562_v41, %v543_v43 }
 0x120   : > { %v567_v48 = vadd.f32 %v566_v44, %v564_v47 }
 0x122   : > { %v568_v49 = vmax.f32 %v567_v48, 0.0 }
 0x124   : > { %v570_v50 = vcombine.high %v568_v49, %v568_v49 }
 0x126   : > { %v755_v51 = vpack.c.bf16 %v570_v50, %v568_v49 }
 0x128   : > { %756 = vst.sshfl [vmem:[%s319_s7] sm:$0x33 pattern:$0x76325410] %v755_v51 }
 0x129 PF: > { %s14_s17 = sadd.s32 1, %s849_s17   ;;  %s961_s15 = smov %s845_s16 }
 0x12a   : > { %p11_p5 = scmp.ge.s32.totalorder %s14_s17, 4   ;;  %s962_s16 = smov %s964_s18 }
 0x12c   :  { %13 = sbr.rel (!%p11_p5) target bundleno = 2 (0x2), region = 80 }

// kernel: d_forward.30
= control target key start
LH: loop header
LB: loop body
LE: loop exit
PB: predicated region body
PF: predicated region fallthrough
CT: control target
= control target key end

     0   :  { %s478_s12 = smov 0   ;;  %s508_s0 = inlined_call_operand.vmem [shape: bf16[32,16], index: 0, kind: input, shape index: {}]   ;;  %s509_s1 = inlined_call_operand.vmem [shape: bf16[8,16,16], index: 1, kind: input, shape index: {}]   ;;  %s510_s2 = inlined_call_operand.vmem [shape: bf16[16,32], index: 2, kind: input, shape index: {}]   ;;  %s511_s3 = inlined_call_operand.vmem [shape: bf16[8,32,32], index: 3, kind: output, shape index: {}]  }
   0x1 LB: > { %s391_s13 = sadd.s32 4294967295, %s456_s12   ;;  %p395_p0 = scmp.ge.s32.totalorder %s456_s12, 1  ;;  %s456_s12 = sphi %s478_s12, %s13_s12  }
   0x2   : > { %p137_p1 = scmp.lt.s32.totalorder %s456_s12, 9 }
   0x4   : > { %p138_p2 = pnand %p395_p0, %p137_p1 }
   0x5   : > { %p161_p3 = scmp.lt.s32.totalorder (!%p138_p2), %s391_s13, 7  ;;  %v447_v0 = vld [vmem:[%s508_s0] sm:$0xff] (!%p138_p2)   ;;  %vm194_vm0 = vcmask (!%p138_p2), 130048   ;;  %v448_v2 = vld [vmem:[%s508_s0 + $0x8] sm:$0xff] (!%p138_p2)   ;;  %vm331_vm1 = vcmask (!%p138_p2), 257024  }
   0x6   : > { %141 = sbr.rel (%p138_p2) target bundleno = 457 (0x1c9), region = 32  ;;  %428 = vmatprep.mubr.msk.bf16.mxu0 (!%p138_p2), %vm194_vm0, %v447_v0  ;;  %v449_v3 = vld [vmem:[%s510_s2] sm:$0xff] (!%p138_p2)  }
   0x7   : > { %432 = vmatprep.subr.bf16.mxu1 (!%p138_p2), %v449_v3 }
   0x8   : > { %433 = vmatpush3.bf16.msra.mxu1 (!%p138_p2), %v449_v3 }
   0xd   : > { %s513_s13 = smov (!%p161_p3, %s391_s13), 7 }
   0xe   : > { %s414_s16 = sshll.u32 %s513_s13, 3  ;;  %s415_s24 = sshll.u32 %s513_s13, 4 }
   0xf   : > { %s165_s19 = scalar_lea.vmem %s509_s1, %s414_s16  ;;  %s170_s27 = scalar_lea.vmem %s511_s3, %s415_s24 }
  0x10   : > { %v446_v1 = vld [vmem:[%s165_s19] sm:$0xff]  }
  0x11   : > { %426 = vmatprep.subr.bf16.mxu0 %v446_v1 }
  0x12   : > { %427 = vmatpush3.bf16.msra.mxu0 %v446_v1 }
  0x15   : > { %429 = vmatmul.mubr.msk.bf16.vlgmr.msra.gmra.mrb[0].mxu0 %vm194_vm0, %v448_v2 }
  0xe8   : > { %v430_v4 = vpop.f32.mrb[0].mxu0 }
  0xe9   : > { %v235_v5 = vpop.f32.mrb[1].mxu0 }
  0xea   : > { %v431_v6 = vpop.f32.mrb[2].mxu0 }
  0xeb   : > { %v251_v7 = vpack.c.bf16 %v431_v6, %v430_v4  ;;  %v238_v8 = vpop.f32.mrb[3].mxu0 }
  0xec   : > { %v250_v9 = vpack.c.bf16 %v238_v8, %v235_v5 }
  0xee   : > { %434 = vmatprep.mubr.msk.bf16.mxu1 %vm194_vm0, %v250_v9 }
  0xef   : > { %435 = vmatmul.mubr.msk.bf16.vlgmr.msra.gmra.mrb[0].mxu1 %vm194_vm0, %v251_v7 }
 0x1c2   : > { %v436_v10 = vpop.f32.mrb[0].mxu1 }
 0x1c3   : > { %v418_v11 = vpack.c.bf16 %v436_v10, %v436_v10  ;;  %v300_v12 = vpop.f32.mrb[1].mxu1 }
 0x1c4   : > { %v416_v13 = vpack.c.bf16 %v300_v12, %v300_v12  ;;  %v437_v14 = vpop.f32.mrb[2].mxu1 }
 0x1c5   : > { %334 = vst.msk [vmem:[%s170_s27 + $0x8] sm:$0xf] %vm331_vm1, %v418_v11  ;;  %v419_v15 = vpack.c.bf16 %v437_v14, %v437_v14  ;;  %v303_v16 = vpop.f32.mrb[3].mxu1 }
 0x1c6   : > { %332 = vst.msk [vmem:[%s170_s27] sm:$0xf] %vm331_vm1, %v416_v13  ;;  %v417_v17 = vpack.c.bf16 %v303_v16, %v303_v16 }
 0x1c7   : > { %335 = vst.msk [vmem:[%s170_s27 + $0xc] sm:$0xf] %vm331_vm1, %v419_v15 }
 0x1c8   : > { %333 = vst.msk [vmem:[%s170_s27 + $0x4] sm:$0xf] %vm331_vm1, %v417_v17 }
 0x1c9 PF: > { %s13_s12 = sadd.s32 1, %s456_s12  }
 0x1ca   : > { %p10_p4 = scmp.ge.s32.totalorder %s13_s12, 10  }
 0x1cc   :  { %12 = sbr.rel (!%p10_p4) target bundleno = 1 (0x1), region = 62 }

// kernel: d_forward.31
= control target key start
LH: loop header
LB: loop body
LE: loop exit
PB: predicated region body
PF: predicated region fallthrough
CT: control target
= control target key end

     0   :  { %s991_s12 = smov 0   ;;  %s993_s13 = smov 0   ;;  %s1171_s0 = inlined_call_operand.vmem [shape: bf16[2,100], index: 0, kind: input, shape index: {}]   ;;  %s1172_s1 = inlined_call_operand.vmem [shape: bf16[2,100,1024], index: 1, kind: input, shape index: {}]   ;;  %s1173_s2 = inlined_call_operand.vmem [shape: f32[2,1], index: 2, kind: input, shape index: {}]   ;;  %s1174_s3 = inlined_call_operand.vmem [shape: bf16[2,2,1024], index: 3, kind: output, shape index: {}]  }
   0x1   :  { %s995_s14 = smov 0   ;;  %s997_s15 = smov 0  }
   0x2   :  { %s999_s16 = smov 0   ;;  %s1001_s17 = smov 0  }
   0x3   :  { %s1003_s18 = smov 0  }
   0x4 LB: > { %s28_s19 = sadd.s32 1, %s957_s16  ;;  %s32_s20 = sadd.s32 1, %s961_s17  ;;  %s965_s18 = sphi %s1003_s18, %s13_s18   ;;  %s961_s17 = sphi %s1001_s17, %s1180_s17   ;;  %s957_s16 = sphi %s999_s16, %s1179_s16   ;;  %s953_s15 = sphi %s997_s15, %s1178_s15   ;;  %s949_s14 = sphi %s995_s14, %s1177_s14   ;;  %s945_s13 = sphi %s993_s13, %s1176_s13   ;;  %s941_s12 = sphi %s991_s12, %s1175_s12  }
   0x5   : > { %p30_p0 = scmp.ge.s32.totalorder %s28_s19, 2  ;;  %p76_p1 = scmp.ne.s32.totalorder %s945_s13, %s941_s12 }
   0x6   : > { %p77_p2 = scmp.eq.s32.totalorder %s965_s18, 0  ;;  %s69_s24 = sadd.s32 1, %s945_s13 }
   0x7   : > { %s1182_s19 = smov (%p30_p0, %s28_s19), 0  ;;  %s1184_s20 = smov (!%p30_p0, %s32_s20), %s961_s17 }
   0x8   : > { %p78_p3 = por %p77_p2, %p76_p1  ;;  %p34_p4 = scmp.ge.s32.totalorder %s1184_s20, 2 }
   0x9   : > { %s65_s21 = ssub.s32 %s957_s16, %s1182_s19  ;;  %p764_p6 = scmp.ge.s32.totalorder %s965_s18, 4 }
   0xa   : > { %s1186_s20 = smov (%p34_p4, %s1184_s20), 0 }
   0xb   : > { %s62_s22 = ssub.s32 %s961_s17, %s1186_s20  ;;  %160 = sbr.rel (%p764_p6) target bundleno = 39 (0x27), region = 24 }
   0xc   : > { %s66_s23 = sor.u32 %s65_s21, %s62_s22 }
   0xd   : > { %p67_p5 = scmp.eq.s32.totalorder %s66_s23, 0 }
   0xf   : > { %s1042_s25 = scalar_select %p67_p5, %s945_s13, %s69_s24  }
  0x12   : > { %163 = sbr.rel (!%p78_p3) target bundleno = 39 (0x27), region = 28  ;;  %s165_s26 = sand.u32 (%p78_p3), 1, %s945_s13  }
  0x13   : > { %s807_s27 = smul.u32 (%p78_p3), 208, %s165_s26  ;;  %s765_s28 = sshll.u32 (%p78_p3), %s957_s16, 2 }
  0x14   : > { %s808_s29 = smul.u32 (%p78_p3), 104, %s961_s17 }
  0x15   : > { %s1056_s8 = scalar_lea.vmem (%p78_p3), [#allocation3], %s807_s27 }
  0x16   : > { %s173_s30 = sadd.s32 (%p78_p3), %s808_s29, %s765_s28 }
  0x17   : > { %s766_s4 = sshll.u32 (%p78_p3), %s173_s30, 2 }
  0x18   : > { %s1051_s7 = scalar_lea.vmem (%p78_p3), %s1172_s1, %s766_s4 }
  0x19   : > { %v188_v0 = vld [vmem:[%s1051_s7] sm:$0xff]  ;;  %v190_v1 = vld [vmem:[%s1051_s7 + $0x8] sm:$0xff] }
  0x1a   : > { %v192_v2 = vld [vmem:[%s1051_s7 + $0x20] sm:$0xff]  ;;  %189 = vst [vmem:[%s1056_s8] sm:$0xff] %v188_v0  ;;  %191 = vst [vmem:[%s1056_s8 + $0x8] sm:$0xff] %v190_v1  ;;  %v194_v3 = vld [vmem:[%s1051_s7 + $0x28] sm:$0xff] }
  0x1b   : > { %193 = vst [vmem:[%s1056_s8 + $0x10] sm:$0xff] %v192_v2  ;;  %v196_v4 = vld [vmem:[%s1051_s7 + $0x40] sm:$0xff]  ;;  %v198_v5 = vld [vmem:[%s1051_s7 + $0x48] sm:$0xff]  ;;  %195 = vst [vmem:[%s1056_s8 + $0x18] sm:$0xff] %v194_v3 }
  0x1c   : > { %197 = vst [vmem:[%s1056_s8 + $0x20] sm:$0xff] %v196_v4  ;;  %199 = vst [vmem:[%s1056_s8 + $0x28] sm:$0xff] %v198_v5  ;;  %v200_v6 = vld [vmem:[%s1051_s7 + $0x60] sm:$0xff]  ;;  %v202_v7 = vld [vmem:[%s1051_s7 + $0x68] sm:$0xff] }
  0x1d   : > { %v204_v8 = vld [vmem:[%s1051_s7 + $0x80] sm:$0xff]  ;;  %201 = vst [vmem:[%s1056_s8 + $0x30] sm:$0xff] %v200_v6  ;;  %203 = vst [vmem:[%s1056_s8 + $0x38] sm:$0xff] %v202_v7  ;;  %v206_v9 = vld [vmem:[%s1051_s7 + $0x88] sm:$0xff] }
  0x1e   : > { %205 = vst [vmem:[%s1056_s8 + $0x40] sm:$0xff] %v204_v8  ;;  %v208_v10 = vld [vmem:[%s1051_s7 + $0xa0] sm:$0xff]  ;;  %v210_v11 = vld [vmem:[%s1051_s7 + $0xa8] sm:$0xff]  ;;  %207 = vst [vmem:[%s1056_s8 + $0x48] sm:$0xff] %v206_v9 }
  0x1f   : > { %209 = vst [vmem:[%s1056_s8 + $0x50] sm:$0xff] %v208_v10  ;;  %211 = vst [vmem:[%s1056_s8 + $0x58] sm:$0xff] %v210_v11  ;;  %v212_v12 = vld [vmem:[%s1051_s7 + $0xc0] sm:$0xff]  ;;  %v214_v13 = vld [vmem:[%s1051_s7 + $0xc8] sm:$0xff] }
  0x20   : > { %v216_v14 = vld [vmem:[%s1051_s7 + $0xe0] sm:$0xff]  ;;  %213 = vst [vmem:[%s1056_s8 + $0x60] sm:$0xff] %v212_v12  ;;  %215 = vst [vmem:[%s1056_s8 + $0x68] sm:$0xff] %v214_v13  ;;  %v218_v15 = vld [vmem:[%s1051_s7 + $0xe8] sm:$0xff] }
  0x21   : > { %217 = vst [vmem:[%s1056_s8 + $0x70] sm:$0xff] %v216_v14  ;;  %v220_v16 = vld [vmem:[%s1051_s7 + $0x100] sm:$0xff]  ;;  %v222_v17 = vld [vmem:[%s1051_s7 + $0x108] sm:$0xff]  ;;  %219 = vst [vmem:[%s1056_s8 + $0x78] sm:$0xff] %v218_v15 }
  0x22   : > { %221 = vst [vmem:[%s1056_s8 + $0x80] sm:$0xff] %v220_v16  ;;  %223 = vst [vmem:[%s1056_s8 + $0x88] sm:$0xff] %v222_v17  ;;  %v224_v18 = vld [vmem:[%s1051_s7 + $0x120] sm:$0xff]  ;;  %v226_v19 = vld [vmem:[%s1051_s7 + $0x128] sm:$0xff] }
  0x23   : > { %v228_v20 = vld [vmem:[%s1051_s7 + $0x140] sm:$0xff]  ;;  %225 = vst [vmem:[%s1056_s8 + $0x90] sm:$0xff] %v224_v18  ;;  %227 = vst [vmem:[%s1056_s8 + $0x98] sm:$0xff] %v226_v19  ;;  %v230_v21 = vld [vmem:[%s1051_s7 + $0x148] sm:$0xff] }
  0x24   : > { %229 = vst [vmem:[%s1056_s8 + $0xa0] sm:$0xff] %v228_v20  ;;  %v232_v22 = vld [vmem:[%s1051_s7 + $0x160] sm:$0xff]  ;;  %v234_v23 = vld [vmem:[%s1051_s7 + $0x168] sm:$0xff]  ;;  %231 = vst [vmem:[%s1056_s8 + $0xa8] sm:$0xff] %v230_v21 }
  0x25   : > { %233 = vst [vmem:[%s1056_s8 + $0xb0] sm:$0xff] %v232_v22  ;;  %235 = vst [vmem:[%s1056_s8 + $0xb8] sm:$0xff] %v234_v23  ;;  %v236_v24 = vld [vmem:[%s1051_s7 + $0x180] sm:$0xff]  ;;  %v238_v25 = vld [vmem:[%s1051_s7 + $0x188] sm:$0xff] }
  0x26   : > { %237 = vst [vmem:[%s1056_s8 + $0xc0] sm:$0xff] %v236_v24  ;;  %239 = vst [vmem:[%s1056_s8 + $0xc8] sm:$0xff] %v238_v25 }
  0x27 PF: > { %p767_p7 = scmp.ge.s32.totalorder %s965_s18, 1  ;;  %p244_p8 = scmp.lt.s32.totalorder %s965_s18, 5 }
  0x29   : > { %p245_p9 = pnand %p767_p7, %p244_p8 }
  0x2a   : > { %s251_s9 = sand.u32 (!%p245_p9), 1, %s941_s12   ;;  %v967_v26 = vmov (!%p245_p9), 0   ;;  %v585_v27 = vld [vmem:[%s1173_s2] sm:$0x3] (!%p245_p9)  ;;  %vm462_vm0 = vcmask (!%p245_p9), 1041408   ;;  %vm458_vm1 = vcmask (!%p245_p9), 818176   ;;  %v566_v63 = vlaneseq (!%p245_p9) }
  0x2b   : > { %248 = sbr.rel (%p245_p9) target bundleno = 312 (0x138), region = 51  ;;  %507 = vmatprep.mubr.bf16.mxu0 (!%p245_p9), %v967_v26  ;;  %548 = vmatprep.mubr.bf16.mxu1 (!%p245_p9), %v967_v26  ;;  %v301_v60 = vld [vmem:[%s1171_s0] sm:$0x1] (!%p245_p9)  ;;  %v968_v61 = vmov (!%p245_p9), 1983009808   ;;  %s768_s24 = sshll.u32 (!%p245_p9), %s949_s14, 2 }
  0x2c   : > { %s809_s10 = smul.u32 (!%p245_p9), 208, %s251_s9  ;;  %870 = vset.pattern.permute.xlu0 (!%p245_p9), %v967_v26  ;;  %v564_v62 = vunpack.c.l.s4 (!%p245_p9), %v968_v61  ;;  %v969_v0 = vmov (!%p245_p9), 269488144   ;;  %v567_v3 = vshrl.u32 (!%p245_p9), %v566_v63, 7  ;;  %p286_p10 = scmp.lt.s32.totalorder (!%p245_p9), %s953_s15, 1 }
  0x2d   : > { %588 = vperm.xlu0 (!%p245_p9), %870, %v585_v27   ;;  %v591_v1 = vunpack.c.l.s4 (!%p245_p9), %v969_v0  ;;  %v970_v22 = vmov (!%p245_p9), 1966171168   ;;  %p288_p11 = scmp.lt.s32.totalorder (!%p245_p9), %s768_s24, 7 }
  0x2e   : > { %s1113_s22 = scalar_lea.vmem (!%p245_p9), [#allocation3], %s809_s10  ;;  %v565_v2 = vunpack.c.0.s8 (!%p245_p9), %v564_v62  ;;  %v633_v23 = vunpack.c.l.s4 (!%p245_p9), %v970_v22 }
  0x2f   : > { %v871_v28 = vld [vmem:[%s1113_s22 + $0x4] ss:$16 sps:$4 sm:$0xff] (!%p245_p9)   ;;  %v873_v29 = vld [vmem:[%s1113_s22 + $0xc] ss:$16 sps:$4 sm:$0xff] (!%p245_p9)   ;;  %v875_v30 = vld [vmem:[%s1113_s22] ss:$16 sps:$4 sm:$0xff] (!%p245_p9)   ;;  %v592_v4 = vunpack.c.0.s8 (!%p245_p9), %v591_v1 }
  0x30   : > { %475 = vmatprep.subr.bf16.mxu0 (!%p245_p9), %v871_v28  ;;  %v876_v31 = vld [vmem:[%s1113_s22 + $0x8] ss:$16 sps:$4 sm:$0xff] (!%p245_p9)   ;;  %516 = vmatprep.subr.bf16.mxu1 (!%p245_p9), %v873_v29  ;;  %v877_v32 = vld [vmem:[%s1113_s22 + $0x24] ss:$16 sps:$4 sm:$0xff] (!%p245_p9)   ;;  %v879_v33 = vld [vmem:[%s1113_s22 + $0x2c] ss:$16 sps:$4 sm:$0xff] (!%p245_p9)   ;;  %v568_v8 = vsub.s32 (!%p245_p9), %v565_v2, %v567_v3  ;;  %v634_v26 = vunpack.c.0.s8 (!%p245_p9), %v633_v23 }
  0x31   : > { %476 = vmatpush1.bf16.msra.mxu0 (!%p245_p9), %v875_v30  ;;  %517 = vmatpush1.bf16.msra.mxu1 (!%p245_p9), %v876_v31  ;;  %v881_v34 = vld [vmem:[%s1113_s22 + $0x20] ss:$16 sps:$4 sm:$0xff] (!%p245_p9)   ;;  %v882_v35 = vld [vmem:[%s1113_s22 + $0x28] ss:$16 sps:$4 sm:$0xff] (!%p245_p9)   ;;  %v883_v36 = vld [vmem:[%s1113_s22 + $0x44] ss:$16 sps:$4 sm:$0xff] (!%p245_p9)   ;;  %v595_v9 = vsub.s32 (!%p245_p9), %v592_v4, %v567_v3 }
  0x32   : > { %477 = vmatprep.subr.bf16.mxu0 %v877_v32  ;;  %518 = vmatprep.subr.bf16.mxu1 %v879_v33  ;;  %v885_v37 = vld [vmem:[%s1113_s22 + $0x4c] ss:$16 sps:$4 sm:$0xff]   ;;  %v887_v38 = vld [vmem:[%s1113_s22 + $0x40] ss:$16 sps:$4 sm:$0xff]   ;;  %v888_v39 = vld [vmem:[%s1113_s22 + $0x48] ss:$16 sps:$4 sm:$0xff]   ;;  %v637_v31 = vsub.s32 %v634_v26, %v567_v3 }
  0x33   : > { %v889_v40 = vld [vmem:[%s1113_s22 + $0x64] ss:$16 sps:$4 sm:$0xff]   ;;  %v891_v41 = vld [vmem:[%s1113_s22 + $0x6c] ss:$16 sps:$4 sm:$0xff]   ;;  %v893_v42 = vld [vmem:[%s1113_s22 + $0x60] ss:$16 sps:$4 sm:$0xff]  }
  0x34   : > { %v894_v43 = vld [vmem:[%s1113_s22 + $0x68] ss:$16 sps:$4 sm:$0xff]   ;;  %v895_v44 = vld [vmem:[%s1113_s22 + $0x84] ss:$16 sps:$4 sm:$0xff]   ;;  %v897_v45 = vld [vmem:[%s1113_s22 + $0x8c] ss:$16 sps:$4 sm:$0xff]  }
  0x35   : > { %478 = vmatpush1.bf16.msra.mxu0 %v881_v34  ;;  %519 = vmatpush1.bf16.msra.mxu1 %v882_v35  ;;  %v899_v46 = vld [vmem:[%s1113_s22 + $0x80] ss:$16 sps:$4 sm:$0xff]   ;;  %v900_v47 = vld [vmem:[%s1113_s22 + $0x88] ss:$16 sps:$4 sm:$0xff]   ;;  %v901_v48 = vld [vmem:[%s1113_s22 + $0xa4] ss:$16 sps:$4 sm:$0xff]  }
  0x36   : > { %479 = vmatprep.subr.bf16.mxu0 %v883_v36  ;;  %520 = vmatprep.subr.bf16.mxu1 %v885_v37  ;;  %v903_v49 = vld [vmem:[%s1113_s22 + $0xac] ss:$16 sps:$4 sm:$0xff]   ;;  %v326_v50 = vld [vmem:[%s1113_s22 + $0xc0] sm:$0x33]  ;;  %v906_v53 = vld [vmem:[%s1113_s22 + $0xa8] ss:$16 sps:$4 sm:$0xff]  }
  0x37   : > { %v327_v51 = vld [vmem:[%s1113_s22 + $0xc8] sm:$0x33]  ;;  %v905_v52 = vld [vmem:[%s1113_s22 + $0xa0] ss:$16 sps:$4 sm:$0xff]   ;;  %v795_v54 = vcombine.high %v326_v50, %v326_v50  ;;  %v794_v56 = vcombine.low %v326_v50, %v326_v50  ;;  %s1188_s15 = smov (!%p286_p10, %s953_s15), 1  ;;  %s1190_s24 = smov (!%p288_p11, %s768_s24), 7 }
  0x38   : > { %v797_v55 = vcombine.high %v327_v51, %v327_v51  ;;  %v796_v57 = vcombine.low %v327_v51, %v327_v51  ;;  %s769_s26 = sshll.u32 %s1188_s15, 3 }
  0x39   : > { %480 = vmatpush1.bf16.msra.mxu0 %v887_v38  ;;  %521 = vmatpush1.bf16.msra.mxu1 %v888_v39  ;;  %v464_v58 = vsel %vm462_vm0, %v794_v56, 0  ;;  %s291_s27 = sadd.s32 %s769_s26, %s1190_s24 }
  0x3a   : > { %481 = vmatprep.subr.bf16.mxu0 %v889_v40  ;;  %522 = vmatprep.subr.bf16.mxu1 %v891_v41  ;;  %v470_v59 = vsel %vm462_vm0, %v796_v57, 0  ;;  %s292_s29 = scalar_lea.vmem %s1174_s3, %s291_s27 }
  0x3d   : > { %482 = vmatpush1.bf16.msra.mxu0 %v893_v42  ;;  %523 = vmatpush1.bf16.msra.mxu1 %v894_v43 }
  0x3e   : > { %483 = vmatprep.subr.bf16.mxu0 %v895_v44  ;;  %524 = vmatprep.subr.bf16.mxu1 %v897_v45 }
  0x41   : > { %484 = vmatpush1.bf16.msra.mxu0 %v899_v46  ;;  %525 = vmatpush1.bf16.msra.mxu1 %v900_v47 }
  0x42   : > { %485 = vmatprep.subr.bf16.mxu0 %v901_v48  ;;  %526 = vmatprep.subr.bf16.mxu1 %v903_v49 }
  0x45   : > { %486 = vmatpush1.bf16.msra.mxu0 %v905_v52  ;;  %527 = vmatpush1.bf16.msra.mxu1 %v906_v53 }
  0x46   : > { %798 = vmatprep.subr.msk.bf16.mxu0 %vm462_vm0, %v795_v54  ;;  %800 = vmatprep.subr.msk.bf16.mxu1 %vm462_vm0, %v797_v55 }
  0x49   : > { %488 = vmatpush1.bf16.msra.mxu0 %v464_v58  ;;  %529 = vmatpush1.bf16.msra.mxu1 %v470_v59 }
  0x4c   : > { %799 = vmatmul.mubr.msk.bf16.vlgmr.msra.gmra.mrb[0].mxu0 %vm458_vm1, %v301_v60  ;;  %801 = vmatmul.mubr.msk.bf16.vlgmr.msra.gmra.mrb[0].mxu1 %vm458_vm1, %v301_v60 }
  0xac   : > { %v589_v5 = vpop.permute.xlu0 %588 }
  0xad   : > { %v596_v20 = vrot.slane %v589_v5, %v595_v9 }
 0x11f   : > { %v509_v6 = vpop.f32.mrb[0].mxu0  ;;  %v550_v7 = vpop.f32.mrb[0].mxu1 }
 0x120   : > { %v511_v10 = vpop.f32.mrb[1].mxu0  ;;  %v552_v11 = vpop.f32.mrb[1].mxu1 }
 0x121   : > { %v561_v12 = vcombine.low %v509_v6, %v511_v10  ;;  %v562_v13 = vcombine.low %v550_v7, %v552_v11  ;;  %v513_v14 = vpop.f32.mrb[2].mxu0  ;;  %v554_v15 = vpop.f32.mrb[2].mxu1 }
 0x122   : > { %v514_v16 = vpop.f32.mrb[3].mxu0  ;;  %v555_v17 = vpop.f32.mrb[3].mxu1 }
 0x123   : > { %v569_v18 = vrot.slane %v561_v12, %v568_v8  ;;  %v576_v19 = vrot.slane %v562_v13, %v568_v8 }
 0x125   : > { %v577_v21 = vcombine.low %v569_v18, %v576_v19 }
 0x127   : > { %v598_v24 = vadd.f32 %v596_v20, %v577_v21 }
 0x129   : > { %v599_v25 = vmax.f32 %v598_v24, 0.0 }
 0x12b   : > { %v601_v27 = vcombine.high %v599_v25, %v599_v25  ;;  %v608_v28 = vrot.slane %v599_v25, %v568_v8 }
 0x12d   : > { %v615_v29 = vrot.slane %v601_v27, %v568_v8  ;;  %v616_v30 = vcombine.high %v608_v28, %v608_v28 }
 0x12f   : > { %v617_v32 = vcombine.high %v615_v29, %v615_v29  ;;  %v802_v33 = vpack.c.bf16 %v616_v30, %v608_v28 }
 0x131   : > { %v803_v34 = vpack.c.bf16 %v617_v32, %v615_v29  ;;  %v638_v35 = vrot.slane %v802_v33, %v637_v31 }
 0x133   : > { %v645_v36 = vrot.slane %v803_v34, %v637_v31 }
 0x135   : > { %v646_v37 = vcombine.low %v638_v35, %v645_v36 }
 0x137   : > { %804 = vst.sshfl [vmem:[%s292_s29] sm:$0x55 pattern:$0x73625140] %v646_v37 }
 0x138 PF: > { %s13_s18 = sadd.s32 1, %s965_s18   ;;  %s1175_s12 = smov %s945_s13 }
 0x139   : > { %p10_p12 = scmp.ge.s32.totalorder %s13_s18, 6   ;;  %s1176_s13 = smov %s1042_s25 }
 0x13a   : > { %s1177_s14 = smov %s957_s16  ;;  %s1178_s15 = smov %s961_s17 }
 0x13b   : > { %s1179_s16 = smov %s1182_s19  ;;  %s1180_s17 = smov %s1186_s20 }
 0x13c   :  { %12 = sbr.rel (!%p10_p12) target bundleno = 4 (0x4), region = 101 }

// kernel: d_forward.32
= control target key start
LH: loop header
LB: loop body
LE: loop exit
PB: predicated region body
PF: predicated region fallthrough
CT: control target
= control target key end

     0   :  { %s780_s12 = smov 0   ;;  %s782_s13 = smov 0   ;;  %s880_s0 = inlined_call_operand.vmem [shape: bf16[2,18], index: 0, kind: input, shape index: {}]   ;;  %s881_s1 = inlined_call_operand.vmem [shape: bf16[2,18,1024], index: 1, kind: input, shape index: {}]   ;;  %s882_s2 = inlined_call_operand.vmem [shape: f32[2,1], index: 2, kind: input, shape index: {}]   ;;  %s883_s3 = inlined_call_operand.vmem [shape: bf16[2,2,1024], index: 3, kind: output, shape index: {}]  }
   0x1   :  { %s784_s14 = smov 0   ;;  %s786_s15 = smov 0  }
   0x2   :  { %s788_s16 = smov 0   ;;  %s790_s17 = smov 0  }
   0x3   :  { %s792_s18 = smov 0  }
   0x4 LB: > { %s28_s19 = sadd.s32 1, %s746_s16  ;;  %s32_s20 = sadd.s32 1, %s750_s17  ;;  %s754_s18 = sphi %s792_s18, %s13_s18   ;;  %s750_s17 = sphi %s790_s17, %s889_s17   ;;  %s746_s16 = sphi %s788_s16, %s888_s16   ;;  %s742_s15 = sphi %s786_s15, %s887_s15   ;;  %s738_s14 = sphi %s784_s14, %s886_s14   ;;  %s734_s13 = sphi %s782_s13, %s885_s13   ;;  %s730_s12 = sphi %s780_s12, %s884_s12  }
   0x5   : > { %p30_p0 = scmp.ge.s32.totalorder %s28_s19, 2  ;;  %p76_p1 = scmp.ne.s32.totalorder %s734_s13, %s730_s12 }
   0x6   : > { %p77_p2 = scmp.eq.s32.totalorder %s754_s18, 0  ;;  %s69_s24 = sadd.s32 1, %s734_s13 }
   0x7   : > { %s891_s19 = smov (%p30_p0, %s28_s19), 0  ;;  %s893_s20 = smov (!%p30_p0, %s32_s20), %s750_s17 }
   0x8   : > { %p78_p3 = por %p77_p2, %p76_p1  ;;  %p34_p4 = scmp.ge.s32.totalorder %s893_s20, 2 }
   0x9   : > { %s65_s21 = ssub.s32 %s746_s16, %s891_s19  ;;  %p603_p6 = scmp.ge.s32.totalorder %s754_s18, 4 }
   0xa   : > { %s895_s20 = smov (%p34_p4, %s893_s20), 0 }
   0xb   : > { %s62_s22 = ssub.s32 %s750_s17, %s895_s20  ;;  %160 = sbr.rel (%p603_p6) target bundleno = 29 (0x1d), region = 24 }
   0xc   : > { %s66_s23 = sor.u32 %s65_s21, %s62_s22 }
   0xd   : > { %p67_p5 = scmp.eq.s32.totalorder %s66_s23, 0 }
   0xf   : > { %s831_s25 = scalar_select %p67_p5, %s734_s13, %s69_s24  }
  0x12   : > { %163 = sbr.rel (!%p78_p3) target bundleno = 29 (0x1d), region = 28  ;;  %s165_s26 = sand.u32 (%p78_p3), 1, %s734_s13  }
  0x13   : > { %s626_s27 = smul.u32 (%p78_p3), 48, %s165_s26  ;;  %s604_s28 = sshll.u32 (%p78_p3), %s746_s16, 2 }
  0x14   : > { %s627_s29 = smul.u32 (%p78_p3), 24, %s750_s17 }
  0x15   : > { %s167_s8 = scalar_lea.vmem (%p78_p3), [#allocation3], %s626_s27 }
  0x16   : > { %s173_s30 = sadd.s32 (%p78_p3), %s627_s29, %s604_s28 }
  0x17   : > { %s605_s4 = sshll.u32 (%p78_p3), %s173_s30, 2 }
  0x18   : > { %s175_s7 = scalar_lea.vmem (%p78_p3), %s881_s1, %s605_s4 }
  0x19   : > { %v188_v0 = vld [vmem:[%s175_s7] sm:$0xff]  ;;  %v190_v1 = vld [vmem:[%s175_s7 + $0x8] sm:$0xff] }
  0x1a   : > { %v192_v2 = vld [vmem:[%s175_s7 + $0x20] sm:$0xff]  ;;  %189 = vst [vmem:[%s167_s8] sm:$0xff] %v188_v0  ;;  %191 = vst [vmem:[%s167_s8 + $0x8] sm:$0xff] %v190_v1  ;;  %v194_v3 = vld [vmem:[%s175_s7 + $0x28] sm:$0xff] }
  0x1b   : > { %193 = vst [vmem:[%s167_s8 + $0x10] sm:$0xff] %v192_v2  ;;  %v196_v4 = vld [vmem:[%s175_s7 + $0x40] sm:$0xff]  ;;  %v198_v5 = vld [vmem:[%s175_s7 + $0x48] sm:$0xff]  ;;  %195 = vst [vmem:[%s167_s8 + $0x18] sm:$0xff] %v194_v3 }
  0x1c   : > { %197 = vst [vmem:[%s167_s8 + $0x20] sm:$0xff] %v196_v4  ;;  %199 = vst [vmem:[%s167_s8 + $0x28] sm:$0xff] %v198_v5 }
  0x1d PF: > { %p606_p7 = scmp.ge.s32.totalorder %s754_s18, 1  ;;  %p204_p8 = scmp.lt.s32.totalorder %s754_s18, 5 }
  0x1f   : > { %p205_p9 = pnand %p606_p7, %p204_p8 }
  0x20   : > { %s211_s9 = sand.u32 (!%p205_p9), 1, %s730_s12   ;;  %v756_v6 = vmov (!%p205_p9), 0   ;;  %v425_v7 = vld [vmem:[%s882_s2] sm:$0x3] (!%p205_p9)  ;;  %vm302_vm0 = vcmask (!%p205_p9), 1040384   ;;  %vm298_vm1 = vcmask (!%p205_p9), 146432   ;;  %v406_v23 = vlaneseq (!%p205_p9) }
  0x21   : > { %208 = sbr.rel (%p205_p9) target bundleno = 280 (0x118), region = 51  ;;  %347 = vmatprep.mubr.bf16.mxu0 (!%p205_p9), %v756_v6  ;;  %388 = vmatprep.mubr.bf16.mxu1 (!%p205_p9), %v756_v6  ;;  %v261_v20 = vld [vmem:[%s880_s0] sm:$0x1] (!%p205_p9)  ;;  %v757_v21 = vmov (!%p205_p9), 1983009808   ;;  %s607_s24 = sshll.u32 (!%p205_p9), %s738_s14, 2 }
  0x22   : > { %s628_s10 = smul.u32 (!%p205_p9), 48, %s211_s9  ;;  %689 = vset.pattern.permute.xlu0 (!%p205_p9), %v756_v6  ;;  %v404_v22 = vunpack.c.l.s4 (!%p205_p9), %v757_v21  ;;  %v758_v24 = vmov (!%p205_p9), 269488144   ;;  %v407_v27 = vshrl.u32 (!%p205_p9), %v406_v23, 7  ;;  %p246_p10 = scmp.lt.s32.totalorder (!%p205_p9), %s742_s15, 1 }
  0x23   : > { %428 = vperm.xlu0 (!%p205_p9), %689, %v425_v7   ;;  %v431_v25 = vunpack.c.l.s4 (!%p205_p9), %v758_v24  ;;  %v759_v45 = vmov (!%p205_p9), 1966171168   ;;  %p248_p11 = scmp.lt.s32.totalorder (!%p205_p9), %s607_s24, 7 }
  0x24   : > { %s213_s22 = scalar_lea.vmem (!%p205_p9), [#allocation3], %s628_s10  ;;  %v405_v26 = vunpack.c.0.s8 (!%p205_p9), %v404_v22  ;;  %v472_v46 = vunpack.c.l.s4 (!%p205_p9), %v759_v45 }
  0x25   : > { %v690_v8 = vld [vmem:[%s213_s22 + $0x4] ss:$16 sps:$4 sm:$0xff] (!%p205_p9)   ;;  %v692_v9 = vld [vmem:[%s213_s22 + $0xc] ss:$16 sps:$4 sm:$0xff] (!%p205_p9)   ;;  %v694_v10 = vld [vmem:[%s213_s22] ss:$16 sps:$4 sm:$0xff] (!%p205_p9)   ;;  %v432_v28 = vunpack.c.0.s8 (!%p205_p9), %v431_v25 }
  0x26   : > { %315 = vmatprep.subr.bf16.mxu0 (!%p205_p9), %v690_v8  ;;  %v695_v11 = vld [vmem:[%s213_s22 + $0x8] ss:$16 sps:$4 sm:$0xff] (!%p205_p9)   ;;  %v266_v12 = vld [vmem:[%s213_s22 + $0x20] sm:$0x11] (!%p205_p9)  ;;  %356 = vmatprep.subr.bf16.mxu1 (!%p205_p9), %v692_v9  ;;  %v408_v32 = vsub.s32 (!%p205_p9), %v405_v26, %v407_v27  ;;  %v473_v49 = vunpack.c.0.s8 (!%p205_p9), %v472_v46 }
  0x27   : > { %v614_v13 = vcombine.high (!%p205_p9), %v266_v12, %v266_v12  ;;  %v267_v14 = vld [vmem:[%s213_s22 + $0x28] sm:$0x11] (!%p205_p9)  ;;  %v613_v15 = vcombine.low (!%p205_p9), %v266_v12, %v266_v12  ;;  %316 = vmatpush1.bf16.msra.mxu0 (!%p205_p9), %v694_v10  ;;  %357 = vmatpush1.bf16.msra.mxu1 (!%p205_p9), %v695_v11  ;;  %v435_v33 = vsub.s32 (!%p205_p9), %v432_v28, %v407_v27 }
  0x28   : > { %v616_v16 = vcombine.high %v267_v14, %v267_v14  ;;  %v615_v17 = vcombine.low %v267_v14, %v267_v14  ;;  %s897_s15 = smov (!%p246_p10, %s742_s15), 1  ;;  %s899_s24 = smov (!%p248_p11, %s607_s24), 7  ;;  %v476_v54 = vsub.s32 %v473_v49, %v407_v27 }
  0x29   : > { %617 = vmatprep.subr.msk.bf16.mxu0 %vm302_vm0, %v614_v13  ;;  %v304_v18 = vsel %vm302_vm0, %v613_v15, 0  ;;  %s608_s26 = sshll.u32 %s897_s15, 3 }
  0x2a   : > { %619 = vmatprep.subr.msk.bf16.mxu1 %vm302_vm0, %v616_v16  ;;  %v310_v19 = vsel %vm302_vm0, %v615_v17, 0  ;;  %s251_s27 = sadd.s32 %s608_s26, %s899_s24 }
  0x2b   : > { %318 = vmatpush1.bf16.msra.mxu0 %v304_v18  ;;  %359 = vmatpush1.bf16.msra.mxu1 %v310_v19  ;;  %s252_s29 = scalar_lea.vmem %s883_s3, %s251_s27 }
  0x2e   : > { %618 = vmatmul.mubr.msk.bf16.vlgmr.msra.gmra.mrb[0].mxu0 %vm298_vm1, %v261_v20  ;;  %620 = vmatmul.mubr.msk.bf16.vlgmr.msra.gmra.mrb[0].mxu1 %vm298_vm1, %v261_v20 }
  0xa2   : > { %v429_v29 = vpop.permute.xlu0 %428 }
  0xa3   : > { %v436_v44 = vrot.slane %v429_v29, %v435_v33 }
 0x101   : > { %v349_v30 = vpop.f32.mrb[0].mxu0  ;;  %v390_v31 = vpop.f32.mrb[0].mxu1 }
 0x102   : > { %v351_v34 = vpop.f32.mrb[1].mxu0  ;;  %v392_v35 = vpop.f32.mrb[1].mxu1 }
 0x103   : > { %v401_v36 = vcombine.low %v349_v30, %v351_v34  ;;  %v402_v37 = vcombine.low %v390_v31, %v392_v35  ;;  %v353_v38 = vpop.f32.mrb[2].mxu0  ;;  %v394_v39 = vpop.f32.mrb[2].mxu1 }
 0x104   : > { %v354_v40 = vpop.f32.mrb[3].mxu0  ;;  %v395_v41 = vpop.f32.mrb[3].mxu1 }
 0x105   : > { %v409_v42 = vrot.slane %v401_v36, %v408_v32  ;;  %v416_v43 = vrot.slane %v402_v37, %v408_v32 }
 0x107   : > { %v417_v47 = vcombine.low %v409_v42, %v416_v43 }
 0x109   : > { %v438_v48 = vadd.f32 %v436_v44, %v417_v47 }
 0x10b   : > { %v440_v50 = vcombine.high %v438_v48, %v438_v48  ;;  %v447_v51 = vrot.slane %v438_v48, %v408_v32 }
 0x10d   : > { %v454_v52 = vrot.slane %v440_v50, %v408_v32  ;;  %v455_v53 = vcombine.high %v447_v51, %v447_v51 }
 0x10f   : > { %v456_v55 = vcombine.high %v454_v52, %v454_v52  ;;  %v621_v56 = vpack.c.bf16 %v455_v53, %v447_v51 }
 0x111   : > { %v622_v57 = vpack.c.bf16 %v456_v55, %v454_v52  ;;  %v477_v58 = vrot.slane %v621_v56, %v476_v54 }
 0x113   : > { %v484_v59 = vrot.slane %v622_v57, %v476_v54 }
 0x115   : > { %v485_v60 = vcombine.low %v477_v58, %v484_v59 }
 0x117   : > { %623 = vst.sshfl [vmem:[%s252_s29] sm:$0x55 pattern:$0x73625140] %v485_v60 }
 0x118 PF: > { %s13_s18 = sadd.s32 1, %s754_s18   ;;  %s884_s12 = smov %s734_s13 }
 0x119   : > { %p10_p12 = scmp.ge.s32.totalorder %s13_s18, 6   ;;  %s885_s13 = smov %s831_s25 }
 0x11a   : > { %s886_s14 = smov %s746_s16  ;;  %s887_s15 = smov %s750_s17 }
 0x11b   : > { %s888_s16 = smov %s891_s19  ;;  %s889_s17 = smov %s895_s20 }
 0x11c   :  { %12 = sbr.rel (!%p10_p12) target bundleno = 4 (0x4), region = 101 }

// kernel: d_forward.33
= control target key start
LH: loop header
LB: loop body
LE: loop exit
PB: predicated region body
PF: predicated region fallthrough
CT: control target
= control target key end

     0   :  { %s1076_s15 = smov 0   ;;  %s1078_s16 = smov 0   ;;  %s1263_s0 = inlined_call_operand.vmem [shape: bf16[2,100], index: 0, kind: input, shape index: {}]   ;;  %s1264_s1 = inlined_call_operand.vmem [shape: bf16[2,100,1024], index: 1, kind: input, shape index: {}]   ;;  %s1265_s2 = inlined_call_operand.vmem [shape: f32[2,1], index: 2, kind: input, shape index: {}]   ;;  %s1266_s3 = inlined_call_operand.vmem [shape: bf16[2,2,1024], index: 3, kind: input, shape index: {}]   ;;  %s1267_s4 = inlined_call_operand.vmem [shape: bf16[2,2,1024], index: 4, kind: output, shape index: {}]  }
   0x1   :  { %s1080_s17 = smov 0   ;;  %s1082_s18 = smov 0  }
   0x2   :  { %s1084_s19 = smov 0   ;;  %s1086_s20 = smov 0  }
   0x3   :  { %s1088_s21 = smov 0  }
   0x4 LB: > { %s29_s22 = sadd.s32 1, %s1037_s19  ;;  %s33_s23 = sadd.s32 1, %s1041_s20  ;;  %s1045_s21 = sphi %s1088_s21, %s14_s21   ;;  %s1041_s20 = sphi %s1086_s20, %s1273_s20   ;;  %s1037_s19 = sphi %s1084_s19, %s1272_s19   ;;  %s1033_s18 = sphi %s1082_s18, %s1271_s18   ;;  %s1029_s17 = sphi %s1080_s17, %s1270_s17   ;;  %s1025_s16 = sphi %s1078_s16, %s1269_s16   ;;  %s1021_s15 = sphi %s1076_s15, %s1268_s15  }
   0x5   : > { %p31_p0 = scmp.ge.s32.totalorder %s29_s22, 2  ;;  %p77_p1 = scmp.ne.s32.totalorder %s1025_s16, %s1021_s15 }
   0x6   : > { %p78_p2 = scmp.eq.s32.totalorder %s1045_s21, 0  ;;  %s70_s27 = sadd.s32 1, %s1025_s16 }
   0x7   : > { %s1275_s22 = smov (%p31_p0, %s29_s22), 0  ;;  %s1277_s23 = smov (!%p31_p0, %s33_s23), %s1041_s20 }
   0x8   : > { %p79_p3 = por %p78_p2, %p77_p1  ;;  %p35_p4 = scmp.ge.s32.totalorder %s1277_s23, 2 }
   0x9   : > { %s66_s24 = ssub.s32 %s1037_s19, %s1275_s22  ;;  %p842_p6 = scmp.ge.s32.totalorder %s1045_s21, 4 }
   0xa   : > { %s1279_s23 = smov (%p35_p4, %s1277_s23), 0 }
   0xb   : > { %s63_s25 = ssub.s32 %s1041_s20, %s1279_s23  ;;  %189 = sbr.rel (%p842_p6) target bundleno = 39 (0x27), region = 24 }
   0xc   : > { %s67_s26 = sor.u32 %s66_s24, %s63_s25 }
   0xd   : > { %p68_p5 = scmp.eq.s32.totalorder %s67_s26, 0 }
   0xf   : > { %s1127_s28 = scalar_select %p68_p5, %s1025_s16, %s70_s27  }
  0x12   : > { %192 = sbr.rel (!%p79_p3) target bundleno = 39 (0x27), region = 28  ;;  %s194_s29 = sand.u32 (%p79_p3), 1, %s1025_s16  }
  0x13   : > { %s887_s30 = smul.u32 (%p79_p3), 208, %s194_s29  ;;  %s843_s5 = sshll.u32 (%p79_p3), %s1037_s19, 2 }
  0x14   : > { %s888_s6 = smul.u32 (%p79_p3), 104, %s1041_s20 }
  0x15   : > { %s1141_s12 = scalar_lea.vmem (%p79_p3), [#allocation3], %s887_s30 }
  0x16   : > { %s202_s7 = sadd.s32 (%p79_p3), %s888_s6, %s843_s5 }
  0x17   : > { %s844_s8 = sshll.u32 (%p79_p3), %s202_s7, 2 }
  0x18   : > { %s1136_s11 = scalar_lea.vmem (%p79_p3), %s1264_s1, %s844_s8 }
  0x19   : > { %v217_v0 = vld [vmem:[%s1136_s11] sm:$0xff]  ;;  %v219_v1 = vld [vmem:[%s1136_s11 + $0x8] sm:$0xff] }
  0x1a   : > { %v221_v2 = vld [vmem:[%s1136_s11 + $0x20] sm:$0xff]  ;;  %218 = vst [vmem:[%s1141_s12] sm:$0xff] %v217_v0  ;;  %220 = vst [vmem:[%s1141_s12 + $0x8] sm:$0xff] %v219_v1  ;;  %v223_v3 = vld [vmem:[%s1136_s11 + $0x28] sm:$0xff] }
  0x1b   : > { %222 = vst [vmem:[%s1141_s12 + $0x10] sm:$0xff] %v221_v2  ;;  %v225_v4 = vld [vmem:[%s1136_s11 + $0x40] sm:$0xff]  ;;  %v227_v5 = vld [vmem:[%s1136_s11 + $0x48] sm:$0xff]  ;;  %224 = vst [vmem:[%s1141_s12 + $0x18] sm:$0xff] %v223_v3 }
  0x1c   : > { %226 = vst [vmem:[%s1141_s12 + $0x20] sm:$0xff] %v225_v4  ;;  %228 = vst [vmem:[%s1141_s12 + $0x28] sm:$0xff] %v227_v5  ;;  %v229_v6 = vld [vmem:[%s1136_s11 + $0x60] sm:$0xff]  ;;  %v231_v7 = vld [vmem:[%s1136_s11 + $0x68] sm:$0xff] }
  0x1d   : > { %v233_v8 = vld [vmem:[%s1136_s11 + $0x80] sm:$0xff]  ;;  %230 = vst [vmem:[%s1141_s12 + $0x30] sm:$0xff] %v229_v6  ;;  %232 = vst [vmem:[%s1141_s12 + $0x38] sm:$0xff] %v231_v7  ;;  %v235_v9 = vld [vmem:[%s1136_s11 + $0x88] sm:$0xff] }
  0x1e   : > { %234 = vst [vmem:[%s1141_s12 + $0x40] sm:$0xff] %v233_v8  ;;  %v237_v10 = vld [vmem:[%s1136_s11 + $0xa0] sm:$0xff]  ;;  %v239_v11 = vld [vmem:[%s1136_s11 + $0xa8] sm:$0xff]  ;;  %236 = vst [vmem:[%s1141_s12 + $0x48] sm:$0xff] %v235_v9 }
  0x1f   : > { %238 = vst [vmem:[%s1141_s12 + $0x50] sm:$0xff] %v237_v10  ;;  %240 = vst [vmem:[%s1141_s12 + $0x58] sm:$0xff] %v239_v11  ;;  %v241_v12 = vld [vmem:[%s1136_s11 + $0xc0] sm:$0xff]  ;;  %v243_v13 = vld [vmem:[%s1136_s11 + $0xc8] sm:$0xff] }
  0x20   : > { %v245_v14 = vld [vmem:[%s1136_s11 + $0xe0] sm:$0xff]  ;;  %242 = vst [vmem:[%s1141_s12 + $0x60] sm:$0xff] %v241_v12  ;;  %244 = vst [vmem:[%s1141_s12 + $0x68] sm:$0xff] %v243_v13  ;;  %v247_v15 = vld [vmem:[%s1136_s11 + $0xe8] sm:$0xff] }
  0x21   : > { %246 = vst [vmem:[%s1141_s12 + $0x70] sm:$0xff] %v245_v14  ;;  %v249_v16 = vld [vmem:[%s1136_s11 + $0x100] sm:$0xff]  ;;  %v251_v17 = vld [vmem:[%s1136_s11 + $0x108] sm:$0xff]  ;;  %248 = vst [vmem:[%s1141_s12 + $0x78] sm:$0xff] %v247_v15 }
  0x22   : > { %250 = vst [vmem:[%s1141_s12 + $0x80] sm:$0xff] %v249_v16  ;;  %252 = vst [vmem:[%s1141_s12 + $0x88] sm:$0xff] %v251_v17  ;;  %v253_v18 = vld [vmem:[%s1136_s11 + $0x120] sm:$0xff]  ;;  %v255_v19 = vld [vmem:[%s1136_s11 + $0x128] sm:$0xff] }
  0x23   : > { %v257_v20 = vld [vmem:[%s1136_s11 + $0x140] sm:$0xff]  ;;  %254 = vst [vmem:[%s1141_s12 + $0x90] sm:$0xff] %v253_v18  ;;  %256 = vst [vmem:[%s1141_s12 + $0x98] sm:$0xff] %v255_v19  ;;  %v259_v21 = vld [vmem:[%s1136_s11 + $0x148] sm:$0xff] }
  0x24   : > { %258 = vst [vmem:[%s1141_s12 + $0xa0] sm:$0xff] %v257_v20  ;;  %v261_v22 = vld [vmem:[%s1136_s11 + $0x160] sm:$0xff]  ;;  %v263_v23 = vld [vmem:[%s1136_s11 + $0x168] sm:$0xff]  ;;  %260 = vst [vmem:[%s1141_s12 + $0xa8] sm:$0xff] %v259_v21 }
  0x25   : > { %262 = vst [vmem:[%s1141_s12 + $0xb0] sm:$0xff] %v261_v22  ;;  %264 = vst [vmem:[%s1141_s12 + $0xb8] sm:$0xff] %v263_v23  ;;  %v265_v24 = vld [vmem:[%s1136_s11 + $0x180] sm:$0xff]  ;;  %v267_v25 = vld [vmem:[%s1136_s11 + $0x188] sm:$0xff] }
  0x26   : > { %266 = vst [vmem:[%s1141_s12 + $0xc0] sm:$0xff] %v265_v24  ;;  %268 = vst [vmem:[%s1141_s12 + $0xc8] sm:$0xff] %v267_v25 }
  0x27 PF: > { %p845_p7 = scmp.ge.s32.totalorder %s1045_s21, 1  ;;  %p285_p8 = scmp.lt.s32.totalorder %s1045_s21, 5 }
  0x29   : > { %p286_p9 = pnand %p845_p7, %p285_p8 }
  0x2a   : > { %s292_s13 = sand.u32 (!%p286_p9), 1, %s1021_s15   ;;  %v1047_v26 = vmov (!%p286_p9), 0   ;;  %v645_v27 = vld [vmem:[%s1265_s2] sm:$0x3] (!%p286_p9)  ;;  %vm522_vm0 = vcmask (!%p286_p9), 1041408   ;;  %vm518_vm1 = vcmask (!%p286_p9), 818176   ;;  %v626_v63 = vlaneseq (!%p286_p9) }
  0x2b   : > { %289 = sbr.rel (%p286_p9) target bundleno = 314 (0x13a), region = 55  ;;  %567 = vmatprep.mubr.bf16.mxu0 (!%p286_p9), %v1047_v26  ;;  %608 = vmatprep.mubr.bf16.mxu1 (!%p286_p9), %v1047_v26  ;;  %v361_v60 = vld [vmem:[%s1263_s0] sm:$0x1] (!%p286_p9)  ;;  %s846_s29 = sshll.u32 (!%p286_p9), %s1029_s17, 2  ;;  %v1048_v61 = vmov (!%p286_p9), 1983009808  }
  0x2c   : > { %s889_s14 = smul.u32 (!%p286_p9), 208, %s292_s13  ;;  %950 = vset.pattern.permute.xlu0 (!%p286_p9), %v1047_v26  ;;  %p337_p10 = scmp.lt.s32.totalorder (!%p286_p9), %s1033_s18, 1  ;;  %v624_v62 = vunpack.c.l.s4 (!%p286_p9), %v1048_v61  ;;  %v1049_v0 = vmov (!%p286_p9), 269488144   ;;  %v627_v3 = vshrl.u32 (!%p286_p9), %v626_v63, 7 }
  0x2d   : > { %648 = vperm.xlu0 (!%p286_p9), %950, %v645_v27   ;;  %p339_p11 = scmp.lt.s32.totalorder (!%p286_p9), %s846_s29, 7  ;;  %v651_v1 = vunpack.c.l.s4 (!%p286_p9), %v1049_v0  ;;  %v1050_v25 = vmov (!%p286_p9), 1966171168  }
  0x2e   : > { %s1198_s26 = scalar_lea.vmem (!%p286_p9), [#allocation3], %s889_s14  ;;  %v625_v2 = vunpack.c.0.s8 (!%p286_p9), %v624_v62  ;;  %v696_v26 = vunpack.c.l.s4 (!%p286_p9), %v1050_v25 }
  0x2f   : > { %v951_v28 = vld [vmem:[%s1198_s26 + $0x4] ss:$16 sps:$4 sm:$0xff] (!%p286_p9)   ;;  %v953_v29 = vld [vmem:[%s1198_s26 + $0xc] ss:$16 sps:$4 sm:$0xff] (!%p286_p9)   ;;  %v955_v30 = vld [vmem:[%s1198_s26] ss:$16 sps:$4 sm:$0xff] (!%p286_p9)   ;;  %v652_v4 = vunpack.c.0.s8 (!%p286_p9), %v651_v1 }
  0x30   : > { %535 = vmatprep.subr.bf16.mxu0 (!%p286_p9), %v951_v28  ;;  %v956_v31 = vld [vmem:[%s1198_s26 + $0x8] ss:$16 sps:$4 sm:$0xff] (!%p286_p9)   ;;  %576 = vmatprep.subr.bf16.mxu1 (!%p286_p9), %v953_v29  ;;  %v957_v32 = vld [vmem:[%s1198_s26 + $0x24] ss:$16 sps:$4 sm:$0xff] (!%p286_p9)   ;;  %v959_v33 = vld [vmem:[%s1198_s26 + $0x2c] ss:$16 sps:$4 sm:$0xff] (!%p286_p9)   ;;  %v628_v8 = vsub.s32 (!%p286_p9), %v625_v2, %v627_v3  ;;  %v697_v29 = vunpack.c.0.s8 (!%p286_p9), %v696_v26 }
  0x31   : > { %536 = vmatpush1.bf16.msra.mxu0 (!%p286_p9), %v955_v30  ;;  %577 = vmatpush1.bf16.msra.mxu1 (!%p286_p9), %v956_v31  ;;  %v961_v34 = vld [vmem:[%s1198_s26 + $0x20] ss:$16 sps:$4 sm:$0xff] (!%p286_p9)   ;;  %v962_v35 = vld [vmem:[%s1198_s26 + $0x28] ss:$16 sps:$4 sm:$0xff] (!%p286_p9)   ;;  %v963_v36 = vld [vmem:[%s1198_s26 + $0x44] ss:$16 sps:$4 sm:$0xff] (!%p286_p9)   ;;  %v655_v9 = vsub.s32 (!%p286_p9), %v652_v4, %v627_v3 }
  0x32   : > { %537 = vmatprep.subr.bf16.mxu0 %v957_v32  ;;  %578 = vmatprep.subr.bf16.mxu1 %v959_v33  ;;  %v965_v37 = vld [vmem:[%s1198_s26 + $0x4c] ss:$16 sps:$4 sm:$0xff]   ;;  %v967_v38 = vld [vmem:[%s1198_s26 + $0x40] ss:$16 sps:$4 sm:$0xff]   ;;  %v968_v39 = vld [vmem:[%s1198_s26 + $0x48] ss:$16 sps:$4 sm:$0xff]  }
  0x33   : > { %v969_v40 = vld [vmem:[%s1198_s26 + $0x64] ss:$16 sps:$4 sm:$0xff]   ;;  %v971_v41 = vld [vmem:[%s1198_s26 + $0x6c] ss:$16 sps:$4 sm:$0xff]   ;;  %v973_v42 = vld [vmem:[%s1198_s26 + $0x60] ss:$16 sps:$4 sm:$0xff]  }
  0x34   : > { %v974_v43 = vld [vmem:[%s1198_s26 + $0x68] ss:$16 sps:$4 sm:$0xff]   ;;  %v975_v44 = vld [vmem:[%s1198_s26 + $0x84] ss:$16 sps:$4 sm:$0xff]   ;;  %v977_v45 = vld [vmem:[%s1198_s26 + $0x8c] ss:$16 sps:$4 sm:$0xff]  }
  0x35   : > { %538 = vmatpush1.bf16.msra.mxu0 %v961_v34  ;;  %579 = vmatpush1.bf16.msra.mxu1 %v962_v35  ;;  %v979_v46 = vld [vmem:[%s1198_s26 + $0x80] ss:$16 sps:$4 sm:$0xff]   ;;  %v980_v47 = vld [vmem:[%s1198_s26 + $0x88] ss:$16 sps:$4 sm:$0xff]   ;;  %v981_v48 = vld [vmem:[%s1198_s26 + $0xa4] ss:$16 sps:$4 sm:$0xff]   ;;  %v700_v34 = vsub.s32 %v697_v29, %v627_v3 }
  0x36   : > { %539 = vmatprep.subr.bf16.mxu0 %v963_v36  ;;  %580 = vmatprep.subr.bf16.mxu1 %v965_v37  ;;  %v983_v49 = vld [vmem:[%s1198_s26 + $0xac] ss:$16 sps:$4 sm:$0xff]   ;;  %v386_v50 = vld [vmem:[%s1198_s26 + $0xc0] sm:$0x33]  ;;  %v986_v53 = vld [vmem:[%s1198_s26 + $0xa8] ss:$16 sps:$4 sm:$0xff]  }
  0x37   : > { %v387_v51 = vld [vmem:[%s1198_s26 + $0xc8] sm:$0x33]  ;;  %v985_v52 = vld [vmem:[%s1198_s26 + $0xa0] ss:$16 sps:$4 sm:$0xff]   ;;  %v875_v54 = vcombine.high %v386_v50, %v386_v50  ;;  %v874_v56 = vcombine.low %v386_v50, %v386_v50  ;;  %s1281_s18 = smov (!%p337_p10, %s1033_s18), 1  ;;  %s1283_s29 = smov (!%p339_p11, %s846_s29), 7 }
  0x38   : > { %v877_v55 = vcombine.high %v387_v51, %v387_v51  ;;  %v876_v57 = vcombine.low %v387_v51, %v387_v51  ;;  %s847_s30 = sshll.u32 %s1281_s18, 3 }
  0x39   : > { %540 = vmatpush1.bf16.msra.mxu0 %v967_v38  ;;  %581 = vmatpush1.bf16.msra.mxu1 %v968_v39  ;;  %v524_v58 = vsel %vm522_vm0, %v874_v56, 0  ;;  %s1232_s5 = sadd.s32 %s847_s30, %s1283_s29 }
  0x3a   : > { %541 = vmatprep.subr.bf16.mxu0 %v969_v40  ;;  %582 = vmatprep.subr.bf16.mxu1 %v971_v41  ;;  %v530_v59 = vsel %vm522_vm0, %v876_v57, 0  ;;  %s343_s7 = scalar_lea.vmem %s1266_s3, %s1232_s5  ;;  %s352_s9 = scalar_lea.vmem %s1267_s4, %s1232_s5 }
  0x3b   : > { %v659_v18 = vld [vmem:[%s343_s7] sm:$0xf] }
  0x3c   : > { %v660_v23 = vunpack.c.l.bf16 %v659_v18 }
  0x3d   : > { %542 = vmatpush1.bf16.msra.mxu0 %v973_v42  ;;  %583 = vmatpush1.bf16.msra.mxu1 %v974_v43 }
  0x3e   : > { %543 = vmatprep.subr.bf16.mxu0 %v975_v44  ;;  %584 = vmatprep.subr.bf16.mxu1 %v977_v45 }
  0x41   : > { %544 = vmatpush1.bf16.msra.mxu0 %v979_v46  ;;  %585 = vmatpush1.bf16.msra.mxu1 %v980_v47 }
  0x42   : > { %545 = vmatprep.subr.bf16.mxu0 %v981_v48  ;;  %586 = vmatprep.subr.bf16.mxu1 %v983_v49 }
  0x45   : > { %546 = vmatpush1.bf16.msra.mxu0 %v985_v52  ;;  %587 = vmatpush1.bf16.msra.mxu1 %v986_v53 }
  0x46   : > { %878 = vmatprep.subr.msk.bf16.mxu0 %vm522_vm0, %v875_v54  ;;  %880 = vmatprep.subr.msk.bf16.mxu1 %vm522_vm0, %v877_v55 }
  0x49   : > { %548 = vmatpush1.bf16.msra.mxu0 %v524_v58  ;;  %589 = vmatpush1.bf16.msra.mxu1 %v530_v59 }
  0x4c   : > { %879 = vmatmul.mubr.msk.bf16.vlgmr.msra.gmra.mrb[0].mxu0 %vm518_vm1, %v361_v60  ;;  %881 = vmatmul.mubr.msk.bf16.vlgmr.msra.gmra.mrb[0].mxu1 %vm518_vm1, %v361_v60 }
  0xac   : > { %v649_v5 = vpop.permute.xlu0 %648 }
  0xad   : > { %v656_v21 = vrot.slane %v649_v5, %v655_v9 }
 0x11f   : > { %v569_v6 = vpop.f32.mrb[0].mxu0  ;;  %v610_v7 = vpop.f32.mrb[0].mxu1 }
 0x120   : > { %v571_v10 = vpop.f32.mrb[1].mxu0  ;;  %v612_v11 = vpop.f32.mrb[1].mxu1 }
 0x121   : > { %v621_v12 = vcombine.low %v569_v6, %v571_v10  ;;  %v622_v13 = vcombine.low %v610_v7, %v612_v11  ;;  %v573_v14 = vpop.f32.mrb[2].mxu0  ;;  %v614_v15 = vpop.f32.mrb[2].mxu1 }
 0x122   : > { %v574_v16 = vpop.f32.mrb[3].mxu0  ;;  %v615_v17 = vpop.f32.mrb[3].mxu1 }
 0x123   : > { %v629_v19 = vrot.slane %v621_v12, %v628_v8  ;;  %v636_v20 = vrot.slane %v622_v13, %v628_v8 }
 0x125   : > { %v637_v22 = vcombine.low %v629_v19, %v636_v20 }
 0x127   : > { %v658_v24 = vadd.f32 %v656_v21, %v637_v22 }
 0x129   : > { %v661_v27 = vadd.f32 %v660_v23, %v658_v24 }
 0x12b   : > { %v662_v28 = vmax.f32 %v661_v27, 0.0 }
 0x12d   : > { %v664_v30 = vcombine.high %v662_v28, %v662_v28  ;;  %v671_v31 = vrot.slane %v662_v28, %v628_v8 }
 0x12f   : > { %v678_v32 = vrot.slane %v664_v30, %v628_v8  ;;  %v679_v33 = vcombine.high %v671_v31, %v671_v31 }
 0x131   : > { %v680_v35 = vcombine.high %v678_v32, %v678_v32  ;;  %v882_v36 = vpack.c.bf16 %v679_v33, %v671_v31 }
 0x133   : > { %v883_v37 = vpack.c.bf16 %v680_v35, %v678_v32  ;;  %v701_v38 = vrot.slane %v882_v36, %v700_v34 }
 0x135   : > { %v708_v39 = vrot.slane %v883_v37, %v700_v34 }
 0x137   : > { %v709_v40 = vcombine.low %v701_v38, %v708_v39 }
 0x139   : > { %884 = vst.sshfl [vmem:[%s352_s9] sm:$0x55 pattern:$0x73625140] %v709_v40 }
 0x13a PF: > { %s14_s21 = sadd.s32 1, %s1045_s21   ;;  %s1268_s15 = smov %s1025_s16 }
 0x13b   : > { %p11_p12 = scmp.ge.s32.totalorder %s14_s21, 6   ;;  %s1269_s16 = smov %s1127_s28 }
 0x13c   : > { %s1270_s17 = smov %s1037_s19  ;;  %s1271_s18 = smov %s1041_s20 }
 0x13d   : > { %s1272_s19 = smov %s1275_s22  ;;  %s1273_s20 = smov %s1279_s23 }
 0x13e   :  { %13 = sbr.rel (!%p11_p12) target bundleno = 4 (0x4), region = 108 }

</bundles_post_ra>
